<compile_context>
chip_gen: v7x
topology: tpu7x:2x2x1
jax: 0.10.0
libtpu: 0.0.40
codegen_flags: <defaults>
</compile_context>

<pallas_src>
import functools

import jax
import jax.numpy as jnp
from jax.experimental import pallas as pl
from jax.experimental.pallas import tpu as pltpu


# ----------------------------- config ---------------------------------------
class Cfg:
    embed = 32          # must equal hidden (torch code bmm's Vec(embed) with hidden-dim tensors)
    hidden = 32
    init_min = -0.08
    init_max = 0.08
    clip_logits = 10.0
    softmax_T = 1.0
    n_glimpse = 1
    decode_type = "greedy"


IN_FEAT = 17
N_DECODE_STEPS = 3
NEG_INF = -1e8

E = 32
H = 32
H4 = 4 * H

# --------------------- parameter slab layout (rows x 128 lanes, f32) ----------
ROW_EMB = 0          # rows [0,17)    lanes [0,32)  : Embedding.weight^T         (17, E)
ROW_ENC_WIH = 24     # rows [24,56)   lanes [0,128) : encoder W_ih packed (i,f,o,g)
ROW_ENC_WHH = 56     # rows [56,88)                 : encoder W_hh packed
ROW_DEC_WIH = 88     # rows [88,120)                : decoder W_ih packed
ROW_DEC_WHH = 120    # rows [120,152)               : decoder W_hh packed
ROW_ATTN = 152       # rows [152,184) lanes: [0,32) W_q^T | [32,64) W_q2^T | [64,128) [W_ref^T|W_ref2^T]
ROW_TAIL = 184       # +0 enc bias(128) | +1 dec bias(128) | +2 [bq|bq2|br|br2] | +3 [vec|vec2|0]
SLAB_ROWS = 192


# --------------------------- fused forward kernel -----------------------------
def _ptrnet1_kernel(x_ref, red_ref, slab_ref, pi_ref, ll_ref, ref_scr,
                    *, n_glimpse, clip_logits, softmax_T):
    f32 = jnp.float32
    bf16 = jnp.bfloat16
    B, N, F = x_ref.shape

    # ---- parameter slab: ONE DMA, sliced in-kernel; bf16 copies for MXU -------
    emb_w = slab_ref[ROW_EMB:ROW_EMB + IN_FEAT, 0:E].astype(bf16)        # (17, E)
    enc_wih = slab_ref[ROW_ENC_WIH:ROW_ENC_WIH + E, :].astype(bf16)      # (E, 4H)
    enc_whh = slab_ref[ROW_ENC_WHH:ROW_ENC_WHH + H, :].astype(bf16)      # (H, 4H)
    dec_wih = slab_ref[ROW_DEC_WIH:ROW_DEC_WIH + E, :].astype(bf16)
    dec_whh = slab_ref[ROW_DEC_WHH:ROW_DEC_WHH + H, :].astype(bf16)
    attn_w = slab_ref[ROW_ATTN:ROW_ATTN + H, :].astype(bf16)             # (H, 4H)
    wq = attn_w[:, 0:H]
    wq2 = attn_w[:, H:2 * H]
    wr12 = attn_w[:, 2 * H:4 * H]                                        # fused W_ref | W_ref2
    tail = slab_ref[ROW_TAIL:ROW_TAIL + 8, :]                            # (8, 128) f32
    enc_b = tail[0:1, :]                                                 # (1, 4H)
    dec_b = tail[1:2, :]
    bq = tail[2:3, 0:H]
    bq2 = tail[2:3, H:2 * H]
    br12 = tail[2:3, 2 * H:4 * H]                                        # (1, 2H)
    vec = tail[3:4, 0:H]                                                 # (1, H)
    vec2 = tail[3:4, H:2 * H]

    # ---- embedding: encoder inputs + decoder seed (one launch, bf16 matmuls) --
    x2d = x_ref[...].reshape(B * N, F).astype(bf16)
    emb2d = jnp.dot(x2d, emb_w, preferred_element_type=f32)              # (B*N, E) f32
    emb_x = emb2d.reshape(B, N, E)                                       # gather source (VMEM)
    dec_input = jnp.dot(red_ref[...].reshape(B, F).astype(bf16), emb_w,
                        preferred_element_type=f32)                      # (B, E)

    # ---- encoder LSTM: packed gates, hoisted input projection -----------------
    px = (jnp.dot(emb2d.astype(bf16), enc_wih, preferred_element_type=f32)
          + enc_b).reshape(B, N, H4)                                     # (B, N, 4H)

    def lstm_cell(gates, c_prev):
        sig = jax.nn.sigmoid(gates[:, 0:3 * H])      # i | f | o  (one EUP issue)
        g_g = jnp.tanh(gates[:, 3 * H:H4])           # g          (one EUP issue)
        i_g = sig[:, 0:H]
        f_g = sig[:, H:2 * H]
        o_g = sig[:, 2 * H:3 * H]
        c_new = f_g * c_prev + i_g * g_g
        h_new = o_g * jnp.tanh(c_new)
        return h_new, c_new

    h = jnp.zeros((B, H), f32)
    c = jnp.zeros((B, H), f32)
    for t in range(N):                               # static unroll: 1 matmul / step
        gates = px[:, t, :] + jnp.dot(h.astype(bf16), enc_whh,
                                      preferred_element_type=f32)
        h, c = lstm_cell(gates, c)
        ref_scr[:, t:t + 1, :] = h[:, None, :]       # encoder hidden -> VMEM scratch

    # ---- hoisted ref projections: fused W_ref|W_ref2, one matmul, reused -------
    ref2d = ref_scr[...].reshape(B * N, H).astype(bf16)
    u2all = (jnp.dot(ref2d, wr12, preferred_element_type=f32)
             + br12).reshape(B, N, 2 * H)
    u2 = u2all[:, :, 0:H]                            # glimpse projection (B, N, H)
    u2p = u2all[:, :, H:2 * H]                       # pointer projection (B, N, H)

    # ---- decode loop: 3 greedy steps, fully in-kernel --------------------------
    mask = jnp.zeros((B, N), jnp.bool_)
    ll = jnp.zeros((B, 1), f32)
    lane_idx = jax.lax.broadcasted_iota(jnp.int32, (B, N), 1)
    lane_idx_f = lane_idx.astype(f32)

    for step in range(N_DECODE_STEPS):
        # NOTE: torch computes mask2 / combined_mask here but never feeds them to
        # glimpse/pointer (it passes `mask`), so we reproduce that exactly.

        # decoder LSTM, single timestep, packed gates (2 matmuls per step)
        gates = (jnp.dot(dec_input.astype(bf16), dec_wih, preferred_element_type=f32)
                 + jnp.dot(h.astype(bf16), dec_whh, preferred_element_type=f32)
                 + dec_b)
        h, c = lstm_cell(gates, c)

        # glimpse(s)
        query = h
        for _ in range(n_glimpse):
            u1 = jnp.dot(query.astype(bf16), wq, preferred_element_type=f32) + bq
            th = jnp.tanh(u1[:, None, :] + u2)                           # (B, N, H)
            u = jnp.sum(th * vec[None, :, :], axis=-1)                   # (B, N)
            u = jnp.where(mask, NEG_INF, u)
            a = jax.nn.softmax(u / softmax_T, axis=-1)
            query = jnp.sum(u2 * a[:, :, None], axis=1)                  # (B, H)

        # pointer
        u1p = jnp.dot(query.astype(bf16), wq2, preferred_element_type=f32) + bq2
        thp = clip_logits * jnp.tanh(u1p[:, None, :] + u2p)
        logits = jnp.sum(thp * vec2[None, :, :], axis=-1)                # (B, N)
        logits = jnp.where(mask, NEG_INF, logits)
        log_p = jax.nn.log_softmax(logits, axis=-1)

        # greedy argmax (first-occurrence tie-break), gather, mask/ll update
        # TODO(synk): decode_type='sampling' (torch.multinomial) not implemented; greedy only.
        max_v = jnp.max(log_p, axis=-1, keepdims=True)
        cand = jnp.where(log_p >= max_v, lane_idx_f, float(N))
        next_node = jnp.min(cand, axis=-1, keepdims=True).astype(jnp.int32)  # (B, 1)

        sel = lane_idx == next_node                                      # (B, N) bool
        dec_input = jnp.sum(sel.astype(f32)[:, :, None] * emb_x, axis=1)  # (B, E) gather
        ll = ll + jnp.sum(jnp.where(sel, log_p, 0.0), axis=-1, keepdims=True)
        mask = jnp.logical_or(mask, sel)
        pi_ref[:, step:step + 1] = next_node                             # per-step store

    ll_ref[...] = ll


# ------------------------------- parameters -----------------------------------
def _pack_gate_w(w):
    """torch LSTM weight (4H, X), row blocks (i,f,g,o) -> (X, 4H), col blocks (i,f,o,g)."""
    Hh = w.shape[0] // 4
    i, f, g, o = (w[k * Hh:(k + 1) * Hh] for k in range(4))
    return jnp.concatenate([i.T, f.T, o.T, g.T], axis=1)


def _pack_gate_b(bih, bhh):
    b = bih + bhh
    Hh = b.shape[0] // 4
    i, f, g, o = (b[k * Hh:(k + 1) * Hh] for k in range(4))
    return jnp.concatenate([i, f, o, g])


def init_params(key, cfg):
    assert cfg.embed == E and cfg.hidden == H
    names_shapes = [
        ('emb_w', (E, IN_FEAT)),                     # nn.Linear(17, E, bias=False).weight
        ('enc_wih', (4 * H, E)), ('enc_whh', (4 * H, H)),
        ('enc_bih', (4 * H,)), ('enc_bhh', (4 * H,)),
        ('dec_wih', (4 * H, E)), ('dec_whh', (4 * H, H)),
        ('dec_bih', (4 * H,)), ('dec_bhh', (4 * H,)),
        ('vec', (E,)), ('vec2', (E,)),
        ('wq_w', (H, H)), ('wq_b', (H,)),
        ('wr_w', (H, H, 1)), ('wr_b', (H,)),         # Conv1d(H, H, 1)
        ('wq2_w', (H, H)), ('wq2_b', (H,)),
        ('wr2_w', (H, H, 1)), ('wr2_b', (H,)),
    ]
    keys = jax.random.split(key, len(names_shapes))
    raw = {n: jax.random.uniform(k, s, jnp.float32, cfg.init_min, cfg.init_max)
           for (n, s), k in zip(names_shapes, keys)}

    slab = jnp.zeros((SLAB_ROWS, 128), jnp.float32)
    slab = slab.at[ROW_EMB:ROW_EMB + IN_FEAT, 0:E].set(raw['emb_w'].T)
    slab = slab.at[ROW_ENC_WIH:ROW_ENC_WIH + E, :].set(_pack_gate_w(raw['enc_wih']))
    slab = slab.at[ROW_ENC_WHH:ROW_ENC_WHH + H, :].set(_pack_gate_w(raw['enc_whh']))
    slab = slab.at[ROW_DEC_WIH:ROW_DEC_WIH + E, :].set(_pack_gate_w(raw['dec_wih']))
    slab = slab.at[ROW_DEC_WHH:ROW_DEC_WHH + H, :].set(_pack_gate_w(raw['dec_whh']))
    slab = slab.at[ROW_ATTN:ROW_ATTN + H, 0:H].set(raw['wq_w'].T)
    slab = slab.at[ROW_ATTN:ROW_ATTN + H, H:2 * H].set(raw['wq2_w'].T)
    slab = slab.at[ROW_ATTN:ROW_ATTN + H, 2 * H:3 * H].set(raw['wr_w'][:, :, 0].T)
    slab = slab.at[ROW_ATTN:ROW_ATTN + H, 3 * H:4 * H].set(raw['wr2_w'][:, :, 0].T)
    slab = slab.at[ROW_TAIL + 0, :].set(_pack_gate_b(raw['enc_bih'], raw['enc_bhh']))
    slab = slab.at[ROW_TAIL + 1, :].set(_pack_gate_b(raw['dec_bih'], raw['dec_bhh']))
    slab = slab.at[ROW_TAIL + 2, 0:H].set(raw['wq_b'])
    slab = slab.at[ROW_TAIL + 2, H:2 * H].set(raw['wq2_b'])
    slab = slab.at[ROW_TAIL + 2, 2 * H:3 * H].set(raw['wr_b'])
    slab = slab.at[ROW_TAIL + 2, 3 * H:4 * H].set(raw['wr2_b'])
    slab = slab.at[ROW_TAIL + 3, 0:H].set(raw['vec'])
    slab = slab.at[ROW_TAIL + 3, H:2 * H].set(raw['vec2'])
    return {'slab': slab}


# ------------------------------- forward --------------------------------------
def _pick_batch_tile(B, cap=512):
    """Batch tile: full batch for tiny B; else a multiple of 8 dividing B, capped (VMEM on v7x)."""
    if B <= 8:
        return B
    bt = min(cap, B)
    bt -= bt % 8
    while bt >= 8 and B % bt != 0:
        bt -= 8
    return bt if bt >= 8 and B % bt == 0 else B


def ptrnet1_forward(p, x, red_device, cfg):
    B, N, F = x.shape
    red3d = red_device.reshape(B, 1, F)
    bt = _pick_batch_tile(B)
    grid = (B // bt,)
    kern = functools.partial(_ptrnet1_kernel, n_glimpse=cfg.n_glimpse,
                             clip_logits=cfg.clip_logits, softmax_T=cfg.softmax_T)
    pi, ll = pl.pallas_call(
        kern,
        grid=grid,
        in_specs=[
            pl.BlockSpec((bt, N, F), lambda b: (b, 0, 0)),
            pl.BlockSpec((bt, 1, F), lambda b: (b, 0, 0)),
            pl.BlockSpec((SLAB_ROWS, 128), lambda b: (0, 0)),
        ],
        out_specs=(
            pl.BlockSpec((bt, N_DECODE_STEPS), lambda b: (b, 0)),
            pl.BlockSpec((bt, 1), lambda b: (b, 0)),
        ),
        out_shape=(jax.ShapeDtypeStruct((B, N_DECODE_STEPS), jnp.int32),
                   jax.ShapeDtypeStruct((B, 1), jnp.float32)),
        scratch_shapes=[pltpu.VMEM((bt, N, H), jnp.float32)],
        compiler_params=pltpu.CompilerParams(
            dimension_semantics=("parallel",)),
    )(x, red3d, p['slab'])
    return pi, ll[:, 0]


# --------------------------------- main ----------------------------------------
if __name__ == "__main__":
    cfg = Cfg()
    key = jax.random.PRNGKey(0)
    kp, kx, kr = jax.random.split(key, 3)
    params = init_params(kp, cfg)

    batch, n_blue_device = 2, 8
    x = jax.random.normal(kx, (batch, n_blue_device, IN_FEAT), jnp.float32)
    red_device = jax.random.normal(kr, (batch, 1, IN_FEAT), jnp.float32)

    pi, ll = ptrnet1_forward(params, x, red_device, cfg)
    jax.block_until_ready((pi, ll))
    assert pi.shape == (batch, N_DECODE_STEPS) and ll.shape == (batch,)
    assert bool(jnp.all((pi >= 0) & (pi < n_blue_device)))
    print("KERNEL_OK")
</pallas_src>

<mosaic_0001>
module attributes {stable_mosaic.version = 11 : i64} {
  func.func @_ptrnet1_kernel(%arg0: i32, %arg1: memref<2x8x17xf32, #tpu.memory_space<vmem>>, %arg2: memref<2x1x17xf32, #tpu.memory_space<vmem>>, %arg3: memref<192x128xf32, #tpu.memory_space<vmem>>, %arg4: memref<2x3xi32, #tpu.memory_space<vmem>>, %arg5: memref<2x1xf32, #tpu.memory_space<vmem>>, %arg6: memref<2x8x32xf32, #tpu.memory_space<vmem>>) attributes {dimension_semantics = [#tpu.dimension_semantics<parallel>], iteration_bounds = array<i64: 1>, scalar_prefetch = 0 : i64, scratch_operands = 1 : i64, tpu.core_type = #tpu.core_type<tc>, window_params = [{transform_indices = @transform_0, window_bounds = array<i64: 2, 8, 17>}, {transform_indices = @transform_1, window_bounds = array<i64: 2, 1, 17>}, {pipeline_mode = #tpu.pipeline_mode<synchronous>, transform_indices = @transform_2, window_bounds = array<i64: 192, 128>}, {transform_indices = @transform_3, window_bounds = array<i64: 2, 3>}, {transform_indices = @transform_4, window_bounds = array<i64: 2, 1>}]} {
    %c0 = arith.constant 0 : index
    %c0_0 = arith.constant 0 : index
    %0 = vector.load %arg3[%c0, %c0_0] : memref<192x128xf32, #tpu.memory_space<vmem>>, vector<17x32xf32>
    %1 = arith.truncf %0 : vector<17x32xf32> to vector<17x32xbf16>
    %c24 = arith.constant 24 : index
    %c0_1 = arith.constant 0 : index
    %2 = vector.load %arg3[%c24, %c0_1] : memref<192x128xf32, #tpu.memory_space<vmem>>, vector<32x128xf32>
    %3 = arith.truncf %2 : vector<32x128xf32> to vector<32x128xbf16>
    %c56 = arith.constant 56 : index
    %c0_2 = arith.constant 0 : index
    %4 = vector.load %arg3[%c56, %c0_2] : memref<192x128xf32, #tpu.memory_space<vmem>>, vector<32x128xf32>
    %5 = arith.truncf %4 : vector<32x128xf32> to vector<32x128xbf16>
    %c88 = arith.constant 88 : index
    %c0_3 = arith.constant 0 : index
    %6 = vector.load %arg3[%c88, %c0_3] : memref<192x128xf32, #tpu.memory_space<vmem>>, vector<32x128xf32>
    %7 = arith.truncf %6 : vector<32x128xf32> to vector<32x128xbf16>
    %c120 = arith.constant 120 : index
    %c0_4 = arith.constant 0 : index
    %8 = vector.load %arg3[%c120, %c0_4] : memref<192x128xf32, #tpu.memory_space<vmem>>, vector<32x128xf32>
    %9 = arith.truncf %8 : vector<32x128xf32> to vector<32x128xbf16>
    %c152 = arith.constant 152 : index
    %c0_5 = arith.constant 0 : index
    %10 = vector.load %arg3[%c152, %c0_5] : memref<192x128xf32, #tpu.memory_space<vmem>>, vector<32x128xf32>
    %11 = arith.truncf %10 : vector<32x128xf32> to vector<32x128xbf16>
    %12 = vector.extract_strided_slice %11 {offsets = [0, 0], sizes = [32, 32], strides = [1, 1]} : vector<32x128xbf16> to vector<32x32xbf16>
    %13 = vector.extract_strided_slice %11 {offsets = [0, 32], sizes = [32, 32], strides = [1, 1]} : vector<32x128xbf16> to vector<32x32xbf16>
    %14 = vector.extract_strided_slice %11 {offsets = [0, 64], sizes = [32, 64], strides = [1, 1]} : vector<32x128xbf16> to vector<32x64xbf16>
    %c184 = arith.constant 184 : index
    %c0_6 = arith.constant 0 : index
    %15 = vector.load %arg3[%c184, %c0_6] : memref<192x128xf32, #tpu.memory_space<vmem>>, vector<8x128xf32>
    %16 = vector.extract_strided_slice %15 {offsets = [0, 0], sizes = [1, 128], strides = [1, 1]} : vector<8x128xf32> to vector<1x128xf32>
    %17 = vector.extract_strided_slice %15 {offsets = [1, 0], sizes = [1, 128], strides = [1, 1]} : vector<8x128xf32> to vector<1x128xf32>
    %18 = vector.extract_strided_slice %15 {offsets = [2, 0], sizes = [1, 32], strides = [1, 1]} : vector<8x128xf32> to vector<1x32xf32>
    %19 = vector.extract_strided_slice %15 {offsets = [2, 32], sizes = [1, 32], strides = [1, 1]} : vector<8x128xf32> to vector<1x32xf32>
    %20 = vector.extract_strided_slice %15 {offsets = [2, 64], sizes = [1, 64], strides = [1, 1]} : vector<8x128xf32> to vector<1x64xf32>
    %21 = vector.extract_strided_slice %15 {offsets = [3, 0], sizes = [1, 32], strides = [1, 1]} : vector<8x128xf32> to vector<1x32xf32>
    %22 = vector.extract_strided_slice %15 {offsets = [3, 32], sizes = [1, 32], strides = [1, 1]} : vector<8x128xf32> to vector<1x32xf32>
    %c0_7 = arith.constant 0 : index
    %c0_8 = arith.constant 0 : index
    %c0_9 = arith.constant 0 : index
    %23 = vector.load %arg1[%c0_7, %c0_8, %c0_9] : memref<2x8x17xf32, #tpu.memory_space<vmem>>, vector<2x8x17xf32>
    %24 = vector.shape_cast %23 : vector<2x8x17xf32> to vector<16x17xf32>
    %25 = arith.truncf %24 : vector<16x17xf32> to vector<16x17xbf16>
    %cst = arith.constant dense<0.000000e+00> : vector<16x32xf32>
    %26 = tpu.matmul %25, %1, %cst {dimension_numbers = #tpu.dot_dimension_numbers<[1], [0], [0], [1], [0, 0, 1, 1], [], []>} : vector<16x17xbf16>, vector<17x32xbf16>, vector<16x32xf32> -> vector<16x32xf32>
    %27 = vector.shape_cast %26 : vector<16x32xf32> to vector<2x8x32xf32>
    %c0_10 = arith.constant 0 : index
    %c0_11 = arith.constant 0 : index
    %c0_12 = arith.constant 0 : index
    %28 = vector.load %arg2[%c0_10, %c0_11, %c0_12] : memref<2x1x17xf32, #tpu.memory_space<vmem>>, vector<2x1x17xf32>
    %29 = vector.shape_cast %28 : vector<2x1x17xf32> to vector<2x17xf32>
    %30 = arith.truncf %29 : vector<2x17xf32> to vector<2x17xbf16>
    %cst_13 = arith.constant dense<0.000000e+00> : vector<2x32xf32>
    %31 = tpu.matmul %30, %1, %cst_13 {dimension_numbers = #tpu.dot_dimension_numbers<[1], [0], [0], [1], [0, 0, 1, 1], [], []>} : vector<2x17xbf16>, vector<17x32xbf16>, vector<2x32xf32> -> vector<2x32xf32>
    %32 = arith.truncf %26 : vector<16x32xf32> to vector<16x32xbf16>
    %cst_14 = arith.constant dense<0.000000e+00> : vector<16x128xf32>
    %33 = tpu.matmul %32, %3, %cst_14 {dimension_numbers = #tpu.dot_dimension_numbers<[1], [0], [0], [1], [0, 0, 1, 1], [], []>} : vector<16x32xbf16>, vector<32x128xbf16>, vector<16x128xf32> -> vector<16x128xf32>
    %34 = vector.broadcast %16 : vector<1x128xf32> to vector<16x128xf32>
    %35 = arith.addf %33, %34 : vector<16x128xf32>
    %36 = vector.shape_cast %35 : vector<16x128xf32> to vector<2x8x128xf32>
    %cst_15 = arith.constant 0.000000e+00 : f32
    %37 = vector.broadcast %cst_15 : f32 to vector<2x32xf32>
    %cst_16 = arith.constant 0.000000e+00 : f32
    %38 = vector.broadcast %cst_16 : f32 to vector<2x32xf32>
    %39 = vector.extract_strided_slice %36 {offsets = [0, 0, 0], sizes = [2, 1, 128], strides = [1, 1, 1]} : vector<2x8x128xf32> to vector<2x1x128xf32>
    %40 = vector.shape_cast %39 : vector<2x1x128xf32> to vector<2x128xf32>
    %41 = arith.truncf %37 : vector<2x32xf32> to vector<2x32xbf16>
    %cst_17 = arith.constant dense<0.000000e+00> : vector<2x128xf32>
    %42 = tpu.matmul %41, %5, %cst_17 {dimension_numbers = #tpu.dot_dimension_numbers<[1], [0], [0], [1], [0, 0, 1, 1], [], []>} : vector<2x32xbf16>, vector<32x128xbf16>, vector<2x128xf32> -> vector<2x128xf32>
    %43 = arith.addf %40, %42 : vector<2x128xf32>
    %44 = vector.extract_strided_slice %43 {offsets = [0, 0], sizes = [2, 96], strides = [1, 1]} : vector<2x128xf32> to vector<2x96xf32>
    %45 = arith.negf %44 : vector<2x96xf32>
    %46 = math.exp %45 : vector<2x96xf32>
    %cst_18 = arith.constant 1.000000e+00 : f32
    %47 = vector.broadcast %cst_18 : f32 to vector<2x96xf32>
    %48 = arith.addf %47, %46 : vector<2x96xf32>
    %49 = arith.divf %47, %48 : vector<2x96xf32>
    %50 = vector.extract_strided_slice %43 {offsets = [0, 96], sizes = [2, 32], strides = [1, 1]} : vector<2x128xf32> to vector<2x32xf32>
    %51 = math.tanh %50 : vector<2x32xf32>
    %52 = vector.extract_strided_slice %49 {offsets = [0, 0], sizes = [2, 32], strides = [1, 1]} : vector<2x96xf32> to vector<2x32xf32>
    %53 = vector.extract_strided_slice %49 {offsets = [0, 32], sizes = [2, 32], strides = [1, 1]} : vector<2x96xf32> to vector<2x32xf32>
    %54 = vector.extract_strided_slice %49 {offsets = [0, 64], sizes = [2, 32], strides = [1, 1]} : vector<2x96xf32> to vector<2x32xf32>
    %55 = arith.mulf %53, %38 : vector<2x32xf32>
    %56 = arith.mulf %52, %51 : vector<2x32xf32>
    %57 = arith.addf %55, %56 : vector<2x32xf32>
    %58 = math.tanh %57 : vector<2x32xf32>
    %59 = arith.mulf %54, %58 : vector<2x32xf32>
    %60 = vector.shape_cast %59 : vector<2x32xf32> to vector<2x1x32xf32>
    %c0_19 = arith.constant 0 : index
    %c0_20 = arith.constant 0 : index
    %c0_21 = arith.constant 0 : index
    %61 = vector.load %arg6[%c0_19, %c0_20, %c0_21] : memref<2x8x32xf32, #tpu.memory_space<vmem>>, vector<2x1x32xf32>
    tpu.vector_store %arg6[%c0_19, %c0_20, %c0_21], %60 {strides = array<i32>} : memref<2x8x32xf32, #tpu.memory_space<vmem>>, vector<2x1x32xf32>,
    %62 = vector.extract_strided_slice %36 {offsets = [0, 1, 0], sizes = [2, 1, 128], strides = [1, 1, 1]} : vector<2x8x128xf32> to vector<2x1x128xf32>
    %63 = vector.shape_cast %62 : vector<2x1x128xf32> to vector<2x128xf32>
    %64 = arith.truncf %59 : vector<2x32xf32> to vector<2x32xbf16>
    %cst_22 = arith.constant dense<0.000000e+00> : vector<2x128xf32>
    %65 = tpu.matmul %64, %5, %cst_22 {dimension_numbers = #tpu.dot_dimension_numbers<[1], [0], [0], [1], [0, 0, 1, 1], [], []>} : vector<2x32xbf16>, vector<32x128xbf16>, vector<2x128xf32> -> vector<2x128xf32>
    %66 = arith.addf %63, %65 : vector<2x128xf32>
    %67 = vector.extract_strided_slice %66 {offsets = [0, 0], sizes = [2, 96], strides = [1, 1]} : vector<2x128xf32> to vector<2x96xf32>
    %68 = arith.negf %67 : vector<2x96xf32>
    %69 = math.exp %68 : vector<2x96xf32>
    %cst_23 = arith.constant 1.000000e+00 : f32
    %70 = vector.broadcast %cst_23 : f32 to vector<2x96xf32>
    %71 = arith.addf %70, %69 : vector<2x96xf32>
    %72 = arith.divf %70, %71 : vector<2x96xf32>
    %73 = vector.extract_strided_slice %66 {offsets = [0, 96], sizes = [2, 32], strides = [1, 1]} : vector<2x128xf32> to vector<2x32xf32>
    %74 = math.tanh %73 : vector<2x32xf32>
    %75 = vector.extract_strided_slice %72 {offsets = [0, 0], sizes = [2, 32], strides = [1, 1]} : vector<2x96xf32> to vector<2x32xf32>
    %76 = vector.extract_strided_slice %72 {offsets = [0, 32], sizes = [2, 32], strides = [1, 1]} : vector<2x96xf32> to vector<2x32xf32>
    %77 = vector.extract_strided_slice %72 {offsets = [0, 64], sizes = [2, 32], strides = [1, 1]} : vector<2x96xf32> to vector<2x32xf32>
    %78 = arith.mulf %76, %57 : vector<2x32xf32>
    %79 = arith.mulf %75, %74 : vector<2x32xf32>
    %80 = arith.addf %78, %79 : vector<2x32xf32>
    %81 = math.tanh %80 : vector<2x32xf32>
    %82 = arith.mulf %77, %81 : vector<2x32xf32>
    %83 = vector.shape_cast %82 : vector<2x32xf32> to vector<2x1x32xf32>
    %c0_24 = arith.constant 0 : index
    %c1 = arith.constant 1 : index
    %c0_25 = arith.constant 0 : index
    %84 = vector.load %arg6[%c0_24, %c1, %c0_25] : memref<2x8x32xf32, #tpu.memory_space<vmem>>, vector<2x1x32xf32>
    tpu.vector_store %arg6[%c0_24, %c1, %c0_25], %83 {strides = array<i32>} : memref<2x8x32xf32, #tpu.memory_space<vmem>>, vector<2x1x32xf32>,
    %85 = vector.extract_strided_slice %36 {offsets = [0, 2, 0], sizes = [2, 1, 128], strides = [1, 1, 1]} : vector<2x8x128xf32> to vector<2x1x128xf32>
    %86 = vector.shape_cast %85 : vector<2x1x128xf32> to vector<2x128xf32>
    %87 = arith.truncf %82 : vector<2x32xf32> to vector<2x32xbf16>
    %cst_26 = arith.constant dense<0.000000e+00> : vector<2x128xf32>
    %88 = tpu.matmul %87, %5, %cst_26 {dimension_numbers = #tpu.dot_dimension_numbers<[1], [0], [0], [1], [0, 0, 1, 1], [], []>} : vector<2x32xbf16>, vector<32x128xbf16>, vector<2x128xf32> -> vector<2x128xf32>
    %89 = arith.addf %86, %88 : vector<2x128xf32>
    %90 = vector.extract_strided_slice %89 {offsets = [0, 0], sizes = [2, 96], strides = [1, 1]} : vector<2x128xf32> to vector<2x96xf32>
    %91 = arith.negf %90 : vector<2x96xf32>
    %92 = math.exp %91 : vector<2x96xf32>
    %cst_27 = arith.constant 1.000000e+00 : f32
    %93 = vector.broadcast %cst_27 : f32 to vector<2x96xf32>
    %94 = arith.addf %93, %92 : vector<2x96xf32>
    %95 = arith.divf %93, %94 : vector<2x96xf32>
    %96 = vector.extract_strided_slice %89 {offsets = [0, 96], sizes = [2, 32], strides = [1, 1]} : vector<2x128xf32> to vector<2x32xf32>
    %97 = math.tanh %96 : vector<2x32xf32>
    %98 = vector.extract_strided_slice %95 {offsets = [0, 0], sizes = [2, 32], strides = [1, 1]} : vector<2x96xf32> to vector<2x32xf32>
    %99 = vector.extract_strided_slice %95 {offsets = [0, 32], sizes = [2, 32], strides = [1, 1]} : vector<2x96xf32> to vector<2x32xf32>
    %100 = vector.extract_strided_slice %95 {offsets = [0, 64], sizes = [2, 32], strides = [1, 1]} : vector<2x96xf32> to vector<2x32xf32>
    %101 = arith.mulf %99, %80 : vector<2x32xf32>
    %102 = arith.mulf %98, %97 : vector<2x32xf32>
    %103 = arith.addf %101, %102 : vector<2x32xf32>
    %104 = math.tanh %103 : vector<2x32xf32>
    %105 = arith.mulf %100, %104 : vector<2x32xf32>
    %106 = vector.shape_cast %105 : vector<2x32xf32> to vector<2x1x32xf32>
    %c0_28 = arith.constant 0 : index
    %c2 = arith.constant 2 : index
    %c0_29 = arith.constant 0 : index
    %107 = vector.load %arg6[%c0_28, %c2, %c0_29] : memref<2x8x32xf32, #tpu.memory_space<vmem>>, vector<2x1x32xf32>
    tpu.vector_store %arg6[%c0_28, %c2, %c0_29], %106 {strides = array<i32>} : memref<2x8x32xf32, #tpu.memory_space<vmem>>, vector<2x1x32xf32>,
    %108 = vector.extract_strided_slice %36 {offsets = [0, 3, 0], sizes = [2, 1, 128], strides = [1, 1, 1]} : vector<2x8x128xf32> to vector<2x1x128xf32>
    %109 = vector.shape_cast %108 : vector<2x1x128xf32> to vector<2x128xf32>
    %110 = arith.truncf %105 : vector<2x32xf32> to vector<2x32xbf16>
    %cst_30 = arith.constant dense<0.000000e+00> : vector<2x128xf32>
    %111 = tpu.matmul %110, %5, %cst_30 {dimension_numbers = #tpu.dot_dimension_numbers<[1], [0], [0], [1], [0, 0, 1, 1], [], []>} : vector<2x32xbf16>, vector<32x128xbf16>, vector<2x128xf32> -> vector<2x128xf32>
    %112 = arith.addf %109, %111 : vector<2x128xf32>
    %113 = vector.extract_strided_slice %112 {offsets = [0, 0], sizes = [2, 96], strides = [1, 1]} : vector<2x128xf32> to vector<2x96xf32>
    %114 = arith.negf %113 : vector<2x96xf32>
    %115 = math.exp %114 : vector<2x96xf32>
    %cst_31 = arith.constant 1.000000e+00 : f32
    %116 = vector.broadcast %cst_31 : f32 to vector<2x96xf32>
    %117 = arith.addf %116, %115 : vector<2x96xf32>
    %118 = arith.divf %116, %117 : vector<2x96xf32>
    %119 = vector.extract_strided_slice %112 {offsets = [0, 96], sizes = [2, 32], strides = [1, 1]} : vector<2x128xf32> to vector<2x32xf32>
    %120 = math.tanh %119 : vector<2x32xf32>
    %121 = vector.extract_strided_slice %118 {offsets = [0, 0], sizes = [2, 32], strides = [1, 1]} : vector<2x96xf32> to vector<2x32xf32>
    %122 = vector.extract_strided_slice %118 {offsets = [0, 32], sizes = [2, 32], strides = [1, 1]} : vector<2x96xf32> to vector<2x32xf32>
    %123 = vector.extract_strided_slice %118 {offsets = [0, 64], sizes = [2, 32], strides = [1, 1]} : vector<2x96xf32> to vector<2x32xf32>
    %124 = arith.mulf %122, %103 : vector<2x32xf32>
    %125 = arith.mulf %121, %120 : vector<2x32xf32>
    %126 = arith.addf %124, %125 : vector<2x32xf32>
    %127 = math.tanh %126 : vector<2x32xf32>
    %128 = arith.mulf %123, %127 : vector<2x32xf32>
    %129 = vector.shape_cast %128 : vector<2x32xf32> to vector<2x1x32xf32>
    %c0_32 = arith.constant 0 : index
    %c3 = arith.constant 3 : index
    %c0_33 = arith.constant 0 : index
    %130 = vector.load %arg6[%c0_32, %c3, %c0_33] : memref<2x8x32xf32, #tpu.memory_space<vmem>>, vector<2x1x32xf32>
    tpu.vector_store %arg6[%c0_32, %c3, %c0_33], %129 {strides = array<i32>} : memref<2x8x32xf32, #tpu.memory_space<vmem>>, vector<2x1x32xf32>,
    %131 = vector.extract_strided_slice %36 {offsets = [0, 4, 0], sizes = [2, 1, 128], strides = [1, 1, 1]} : vector<2x8x128xf32> to vector<2x1x128xf32>
    %132 = vector.shape_cast %131 : vector<2x1x128xf32> to vector<2x128xf32>
    %133 = arith.truncf %128 : vector<2x32xf32> to vector<2x32xbf16>
    %cst_34 = arith.constant dense<0.000000e+00> : vector<2x128xf32>
    %134 = tpu.matmul %133, %5, %cst_34 {dimension_numbers = #tpu.dot_dimension_numbers<[1], [0], [0], [1], [0, 0, 1, 1], [], []>} : vector<2x32xbf16>, vector<32x128xbf16>, vector<2x128xf32> -> vector<2x128xf32>
    %135 = arith.addf %132, %134 : vector<2x128xf32>
    %136 = vector.extract_strided_slice %135 {offsets = [0, 0], sizes = [2, 96], strides = [1, 1]} : vector<2x128xf32> to vector<2x96xf32>
    %137 = arith.negf %136 : vector<2x96xf32>
    %138 = math.exp %137 : vector<2x96xf32>
    %cst_35 = arith.constant 1.000000e+00 : f32
    %139 = vector.broadcast %cst_35 : f32 to vector<2x96xf32>
    %140 = arith.addf %139, %138 : vector<2x96xf32>
    %141 = arith.divf %139, %140 : vector<2x96xf32>
    %142 = vector.extract_strided_slice %135 {offsets = [0, 96], sizes = [2, 32], strides = [1, 1]} : vector<2x128xf32> to vector<2x32xf32>
    %143 = math.tanh %142 : vector<2x32xf32>
    %144 = vector.extract_strided_slice %141 {offsets = [0, 0], sizes = [2, 32], strides = [1, 1]} : vector<2x96xf32> to vector<2x32xf32>
    %145 = vector.extract_strided_slice %141 {offsets = [0, 32], sizes = [2, 32], strides = [1, 1]} : vector<2x96xf32> to vector<2x32xf32>
    %146 = vector.extract_strided_slice %141 {offsets = [0, 64], sizes = [2, 32], strides = [1, 1]} : vector<2x96xf32> to vector<2x32xf32>
    %147 = arith.mulf %145, %126 : vector<2x32xf32>
    %148 = arith.mulf %144, %143 : vector<2x32xf32>
    %149 = arith.addf %147, %148 : vector<2x32xf32>
    %150 = math.tanh %149 : vector<2x32xf32>
    %151 = arith.mulf %146, %150 : vector<2x32xf32>
    %152 = vector.shape_cast %151 : vector<2x32xf32> to vector<2x1x32xf32>
    %c0_36 = arith.constant 0 : index
    %c4 = arith.constant 4 : index
    %c0_37 = arith.constant 0 : index
    %153 = vector.load %arg6[%c0_36, %c4, %c0_37] : memref<2x8x32xf32, #tpu.memory_space<vmem>>, vector<2x1x32xf32>
    tpu.vector_store %arg6[%c0_36, %c4, %c0_37], %152 {strides = array<i32>} : memref<2x8x32xf32, #tpu.memory_space<vmem>>, vector<2x1x32xf32>,
    %154 = vector.extract_strided_slice %36 {offsets = [0, 5, 0], sizes = [2, 1, 128], strides = [1, 1, 1]} : vector<2x8x128xf32> to vector<2x1x128xf32>
    %155 = vector.shape_cast %154 : vector<2x1x128xf32> to vector<2x128xf32>
    %156 = arith.truncf %151 : vector<2x32xf32> to vector<2x32xbf16>
    %cst_38 = arith.constant dense<0.000000e+00> : vector<2x128xf32>
    %157 = tpu.matmul %156, %5, %cst_38 {dimension_numbers = #tpu.dot_dimension_numbers<[1], [0], [0], [1], [0, 0, 1, 1], [], []>} : vector<2x32xbf16>, vector<32x128xbf16>, vector<2x128xf32> -> vector<2x128xf32>
    %158 = arith.addf %155, %157 : vector<2x128xf32>
    %159 = vector.extract_strided_slice %158 {offsets = [0, 0], sizes = [2, 96], strides = [1, 1]} : vector<2x128xf32> to vector<2x96xf32>
    %160 = arith.negf %159 : vector<2x96xf32>
    %161 = math.exp %160 : vector<2x96xf32>
    %cst_39 = arith.constant 1.000000e+00 : f32
    %162 = vector.broadcast %cst_39 : f32 to vector<2x96xf32>
    %163 = arith.addf %162, %161 : vector<2x96xf32>
    %164 = arith.divf %162, %163 : vector<2x96xf32>
    %165 = vector.extract_strided_slice %158 {offsets = [0, 96], sizes = [2, 32], strides = [1, 1]} : vector<2x128xf32> to vector<2x32xf32>
    %166 = math.tanh %165 : vector<2x32xf32>
    %167 = vector.extract_strided_slice %164 {offsets = [0, 0], sizes = [2, 32], strides = [1, 1]} : vector<2x96xf32> to vector<2x32xf32>
    %168 = vector.extract_strided_slice %164 {offsets = [0, 32], sizes = [2, 32], strides = [1, 1]} : vector<2x96xf32> to vector<2x32xf32>
    %169 = vector.extract_strided_slice %164 {offsets = [0, 64], sizes = [2, 32], strides = [1, 1]} : vector<2x96xf32> to vector<2x32xf32>
    %170 = arith.mulf %168, %149 : vector<2x32xf32>
    %171 = arith.mulf %167, %166 : vector<2x32xf32>
    %172 = arith.addf %170, %171 : vector<2x32xf32>
    %173 = math.tanh %172 : vector<2x32xf32>
    %174 = arith.mulf %169, %173 : vector<2x32xf32>
    %175 = vector.shape_cast %174 : vector<2x32xf32> to vector<2x1x32xf32>
    %c0_40 = arith.constant 0 : index
    %c5 = arith.constant 5 : index
    %c0_41 = arith.constant 0 : index
    %176 = vector.load %arg6[%c0_40, %c5, %c0_41] : memref<2x8x32xf32, #tpu.memory_space<vmem>>, vector<2x1x32xf32>
    tpu.vector_store %arg6[%c0_40, %c5, %c0_41], %175 {strides = array<i32>} : memref<2x8x32xf32, #tpu.memory_space<vmem>>, vector<2x1x32xf32>,
    %177 = vector.extract_strided_slice %36 {offsets = [0, 6, 0], sizes = [2, 1, 128], strides = [1, 1, 1]} : vector<2x8x128xf32> to vector<2x1x128xf32>
    %178 = vector.shape_cast %177 : vector<2x1x128xf32> to vector<2x128xf32>
    %179 = arith.truncf %174 : vector<2x32xf32> to vector<2x32xbf16>
    %cst_42 = arith.constant dense<0.000000e+00> : vector<2x128xf32>
    %180 = tpu.matmul %179, %5, %cst_42 {dimension_numbers = #tpu.dot_dimension_numbers<[1], [0], [0], [1], [0, 0, 1, 1], [], []>} : vector<2x32xbf16>, vector<32x128xbf16>, vector<2x128xf32> -> vector<2x128xf32>
    %181 = arith.addf %178, %180 : vector<2x128xf32>
    %182 = vector.extract_strided_slice %181 {offsets = [0, 0], sizes = [2, 96], strides = [1, 1]} : vector<2x128xf32> to vector<2x96xf32>
    %183 = arith.negf %182 : vector<2x96xf32>
    %184 = math.exp %183 : vector<2x96xf32>
    %cst_43 = arith.constant 1.000000e+00 : f32
    %185 = vector.broadcast %cst_43 : f32 to vector<2x96xf32>
    %186 = arith.addf %185, %184 : vector<2x96xf32>
    %187 = arith.divf %185, %186 : vector<2x96xf32>
    %188 = vector.extract_strided_slice %181 {offsets = [0, 96], sizes = [2, 32], strides = [1, 1]} : vector<2x128xf32> to vector<2x32xf32>
    %189 = math.tanh %188 : vector<2x32xf32>
    %190 = vector.extract_strided_slice %187 {offsets = [0, 0], sizes = [2, 32], strides = [1, 1]} : vector<2x96xf32> to vector<2x32xf32>
    %191 = vector.extract_strided_slice %187 {offsets = [0, 32], sizes = [2, 32], strides = [1, 1]} : vector<2x96xf32> to vector<2x32xf32>
    %192 = vector.extract_strided_slice %187 {offsets = [0, 64], sizes = [2, 32], strides = [1, 1]} : vector<2x96xf32> to vector<2x32xf32>
    %193 = arith.mulf %191, %172 : vector<2x32xf32>
    %194 = arith.mulf %190, %189 : vector<2x32xf32>
    %195 = arith.addf %193, %194 : vector<2x32xf32>
    %196 = math.tanh %195 : vector<2x32xf32>
    %197 = arith.mulf %192, %196 : vector<2x32xf32>
    %198 = vector.shape_cast %197 : vector<2x32xf32> to vector<2x1x32xf32>
    %c0_44 = arith.constant 0 : index
    %c6 = arith.constant 6 : index
    %c0_45 = arith.constant 0 : index
    %199 = vector.load %arg6[%c0_44, %c6, %c0_45] : memref<2x8x32xf32, #tpu.memory_space<vmem>>, vector<2x1x32xf32>
    tpu.vector_store %arg6[%c0_44, %c6, %c0_45], %198 {strides = array<i32>} : memref<2x8x32xf32, #tpu.memory_space<vmem>>, vector<2x1x32xf32>,
    %200 = vector.extract_strided_slice %36 {offsets = [0, 7, 0], sizes = [2, 1, 128], strides = [1, 1, 1]} : vector<2x8x128xf32> to vector<2x1x128xf32>
    %201 = vector.shape_cast %200 : vector<2x1x128xf32> to vector<2x128xf32>
    %202 = arith.truncf %197 : vector<2x32xf32> to vector<2x32xbf16>
    %cst_46 = arith.constant dense<0.000000e+00> : vector<2x128xf32>
    %203 = tpu.matmul %202, %5, %cst_46 {dimension_numbers = #tpu.dot_dimension_numbers<[1], [0], [0], [1], [0, 0, 1, 1], [], []>} : vector<2x32xbf16>, vector<32x128xbf16>, vector<2x128xf32> -> vector<2x128xf32>
    %204 = arith.addf %201, %203 : vector<2x128xf32>
    %205 = vector.extract_strided_slice %204 {offsets = [0, 0], sizes = [2, 96], strides = [1, 1]} : vector<2x128xf32> to vector<2x96xf32>
    %206 = arith.negf %205 : vector<2x96xf32>
    %207 = math.exp %206 : vector<2x96xf32>
    %cst_47 = arith.constant 1.000000e+00 : f32
    %208 = vector.broadcast %cst_47 : f32 to vector<2x96xf32>
    %209 = arith.addf %208, %207 : vector<2x96xf32>
    %210 = arith.divf %208, %209 : vector<2x96xf32>
    %211 = vector.extract_strided_slice %204 {offsets = [0, 96], sizes = [2, 32], strides = [1, 1]} : vector<2x128xf32> to vector<2x32xf32>
    %212 = math.tanh %211 : vector<2x32xf32>
    %213 = vector.extract_strided_slice %210 {offsets = [0, 0], sizes = [2, 32], strides = [1, 1]} : vector<2x96xf32> to vector<2x32xf32>
    %214 = vector.extract_strided_slice %210 {offsets = [0, 32], sizes = [2, 32], strides = [1, 1]} : vector<2x96xf32> to vector<2x32xf32>
    %215 = vector.extract_strided_slice %210 {offsets = [0, 64], sizes = [2, 32], strides = [1, 1]} : vector<2x96xf32> to vector<2x32xf32>
    %216 = arith.mulf %214, %195 : vector<2x32xf32>
    %217 = arith.mulf %213, %212 : vector<2x32xf32>
    %218 = arith.addf %216, %217 : vector<2x32xf32>
    %219 = math.tanh %218 : vector<2x32xf32>
    %220 = arith.mulf %215, %219 : vector<2x32xf32>
    %221 = vector.shape_cast %220 : vector<2x32xf32> to vector<2x1x32xf32>
    %c0_48 = arith.constant 0 : index
    %c7 = arith.constant 7 : index
    %c0_49 = arith.constant 0 : index
    %222 = vector.load %arg6[%c0_48, %c7, %c0_49] : memref<2x8x32xf32, #tpu.memory_space<vmem>>, vector<2x1x32xf32>
    tpu.vector_store %arg6[%c0_48, %c7, %c0_49], %221 {strides = array<i32>} : memref<2x8x32xf32, #tpu.memory_space<vmem>>, vector<2x1x32xf32>,
    %c0_50 = arith.constant 0 : index
    %c0_51 = arith.constant 0 : index
    %c0_52 = arith.constant 0 : index
    %223 = vector.load %arg6[%c0_50, %c0_51, %c0_52] : memref<2x8x32xf32, #tpu.memory_space<vmem>>, vector<2x8x32xf32>
    %224 = vector.shape_cast %223 : vector<2x8x32xf32> to vector<16x32xf32>
    %225 = arith.truncf %224 : vector<16x32xf32> to vector<16x32xbf16>
    %cst_53 = arith.constant dense<0.000000e+00> : vector<16x64xf32>
    %226 = tpu.matmul %225, %14, %cst_53 {dimension_numbers = #tpu.dot_dimension_numbers<[1], [0], [0], [1], [0, 0, 1, 1], [], []>} : vector<16x32xbf16>, vector<32x64xbf16>, vector<16x64xf32> -> vector<16x64xf32>
    %227 = vector.broadcast %20 : vector<1x64xf32> to vector<16x64xf32>
    %228 = arith.addf %226, %227 : vector<16x64xf32>
    %229 = vector.shape_cast %228 : vector<16x64xf32> to vector<2x8x64xf32>
    %230 = vector.extract_strided_slice %229 {offsets = [0, 0, 0], sizes = [2, 8, 32], strides = [1, 1, 1]} : vector<2x8x64xf32> to vector<2x8x32xf32>
    %231 = vector.extract_strided_slice %229 {offsets = [0, 0, 32], sizes = [2, 8, 32], strides = [1, 1, 1]} : vector<2x8x64xf32> to vector<2x8x32xf32>
    %false = arith.constant false
    %232 = vector.broadcast %false : i1 to vector<2x8xi1>
    %cst_54 = arith.constant 0.000000e+00 : f32
    %233 = vector.broadcast %cst_54 : f32 to vector<2x1xf32>
    %234 = tpu.iota {dimensions = array<i32: 1>} : vector<2x8xi32>
    %235 = arith.sitofp %234 : vector<2x8xi32> to vector<2x8xf32>
    %236 = arith.truncf %31 : vector<2x32xf32> to vector<2x32xbf16>
    %cst_55 = arith.constant dense<0.000000e+00> : vector<2x128xf32>
    %237 = tpu.matmul %236, %7, %cst_55 {dimension_numbers = #tpu.dot_dimension_numbers<[1], [0], [0], [1], [0, 0, 1, 1], [], []>} : vector<2x32xbf16>, vector<32x128xbf16>, vector<2x128xf32> -> vector<2x128xf32>
    %238 = arith.truncf %220 : vector<2x32xf32> to vector<2x32xbf16>
    %cst_56 = arith.constant dense<0.000000e+00> : vector<2x128xf32>
    %239 = tpu.matmul %238, %9, %cst_56 {dimension_numbers = #tpu.dot_dimension_numbers<[1], [0], [0], [1], [0, 0, 1, 1], [], []>} : vector<2x32xbf16>, vector<32x128xbf16>, vector<2x128xf32> -> vector<2x128xf32>
    %240 = arith.addf %237, %239 : vector<2x128xf32>
    %241 = vector.broadcast %17 : vector<1x128xf32> to vector<2x128xf32>
    %242 = arith.addf %240, %241 : vector<2x128xf32>
    %243 = vector.extract_strided_slice %242 {offsets = [0, 0], sizes = [2, 96], strides = [1, 1]} : vector<2x128xf32> to vector<2x96xf32>
    %244 = arith.negf %243 : vector<2x96xf32>
    %245 = math.exp %244 : vector<2x96xf32>
    %cst_57 = arith.constant 1.000000e+00 : f32
    %246 = vector.broadcast %cst_57 : f32 to vector<2x96xf32>
    %247 = arith.addf %246, %245 : vector<2x96xf32>
    %248 = arith.divf %246, %247 : vector<2x96xf32>
    %249 = vector.extract_strided_slice %242 {offsets = [0, 96], sizes = [2, 32], strides = [1, 1]} : vector<2x128xf32> to vector<2x32xf32>
    %250 = math.tanh %249 : vector<2x32xf32>
    %251 = vector.extract_strided_slice %248 {offsets = [0, 0], sizes = [2, 32], strides = [1, 1]} : vector<2x96xf32> to vector<2x32xf32>
    %252 = vector.extract_strided_slice %248 {offsets = [0, 32], sizes = [2, 32], strides = [1, 1]} : vector<2x96xf32> to vector<2x32xf32>
    %253 = vector.extract_strided_slice %248 {offsets = [0, 64], sizes = [2, 32], strides = [1, 1]} : vector<2x96xf32> to vector<2x32xf32>
    %254 = arith.mulf %252, %218 : vector<2x32xf32>
    %255 = arith.mulf %251, %250 : vector<2x32xf32>
    %256 = arith.addf %254, %255 : vector<2x32xf32>
    %257 = math.tanh %256 : vector<2x32xf32>
    %258 = arith.mulf %253, %257 : vector<2x32xf32>
    %259 = arith.truncf %258 : vector<2x32xf32> to vector<2x32xbf16>
    %cst_58 = arith.constant dense<0.000000e+00> : vector<2x32xf32>
    %260 = tpu.matmul %259, %12, %cst_58 {dimension_numbers = #tpu.dot_dimension_numbers<[1], [0], [0], [1], [0, 0, 1, 1], [], []>} : vector<2x32xbf16>, vector<32x32xbf16>, vector<2x32xf32> -> vector<2x32xf32>
    %261 = vector.broadcast %18 : vector<1x32xf32> to vector<2x32xf32>
    %262 = arith.addf %260, %261 : vector<2x32xf32>
    %263 = vector.shape_cast %262 : vector<2x32xf32> to vector<2x1x32xf32>
    %264 = vector.broadcast %263 : vector<2x1x32xf32> to vector<2x8x32xf32>
    %265 = arith.addf %264, %230 : vector<2x8x32xf32>
    %266 = math.tanh %265 : vector<2x8x32xf32>
    %267 = vector.shape_cast %21 : vector<1x32xf32> to vector<1x1x32xf32>
    %268 = vector.broadcast %267 : vector<1x1x32xf32> to vector<2x8x32xf32>
    %269 = arith.mulf %266, %268 : vector<2x8x32xf32>
    %cst_59 = arith.constant dense<0.000000e+00> : vector<2x8xf32>
    %270 = vector.multi_reduction <add>, %269, %cst_59 [2] : vector<2x8x32xf32> to vector<2x8xf32>
    %cst_60 = arith.constant -1.000000e+08 : f32
    %271 = vector.broadcast %cst_60 : f32 to vector<2x8xf32>
    %272 = arith.select %232, %271, %270 : vector<2x8xi1>, vector<2x8xf32>
    %cst_61 = arith.constant 1.000000e+00 : f32
    %273 = vector.broadcast %cst_61 : f32 to vector<2x8xf32>
    %274 = arith.divf %272, %273 : vector<2x8xf32>
    %cst_62 = arith.constant dense<0xFF800000> : vector<2xf32>
    %275 = vector.multi_reduction <maximumf>, %274, %cst_62 [1] : vector<2x8xf32> to vector<2xf32>
    %cst_63 = arith.constant 0xFF800000 : f32
    %276 = vector.broadcast %cst_63 : f32 to vector<2xf32>
    %277 = arith.maximumf %276, %275 : vector<2xf32>
    %278 = vector.shape_cast %277 : vector<2xf32> to vector<2x1xf32>
    %279 = vector.broadcast %278 : vector<2x1xf32> to vector<2x8xf32>
    %280 = arith.subf %274, %279 : vector<2x8xf32>
    %281 = math.exp %280 : vector<2x8xf32>
    %cst_64 = arith.constant dense<0.000000e+00> : vector<2xf32>
    %282 = vector.multi_reduction <add>, %281, %cst_64 [1] : vector<2x8xf32> to vector<2xf32>
    %283 = vector.shape_cast %282 : vector<2xf32> to vector<2x1xf32>
    %284 = vector.broadcast %283 : vector<2x1xf32> to vector<2x8xf32>
    %285 = arith.divf %281, %284 : vector<2x8xf32>
    %286 = vector.shape_cast %285 : vector<2x8xf32> to vector<2x8x1xf32>
    %287 = vector.broadcast %286 : vector<2x8x1xf32> to vector<2x8x32xf32>
    %288 = arith.mulf %230, %287 : vector<2x8x32xf32>
    %cst_65 = arith.constant dense<0.000000e+00> : vector<2x32xf32>
    %289 = vector.multi_reduction <add>, %288, %cst_65 [1] : vector<2x8x32xf32> to vector<2x32xf32>
    %290 = arith.truncf %289 : vector<2x32xf32> to vector<2x32xbf16>
    %cst_66 = arith.constant dense<0.000000e+00> : vector<2x32xf32>
    %291 = tpu.matmul %290, %13, %cst_66 {dimension_numbers = #tpu.dot_dimension_numbers<[1], [0], [0], [1], [0, 0, 1, 1], [], []>} : vector<2x32xbf16>, vector<32x32xbf16>, vector<2x32xf32> -> vector<2x32xf32>
    %292 = vector.broadcast %19 : vector<1x32xf32> to vector<2x32xf32>
    %293 = arith.addf %291, %292 : vector<2x32xf32>
    %294 = vector.shape_cast %293 : vector<2x32xf32> to vector<2x1x32xf32>
    %295 = vector.broadcast %294 : vector<2x1x32xf32> to vector<2x8x32xf32>
    %296 = arith.addf %295, %231 : vector<2x8x32xf32>
    %297 = math.tanh %296 : vector<2x8x32xf32>
    %cst_67 = arith.constant 1.000000e+01 : f32
    %298 = vector.broadcast %cst_67 : f32 to vector<2x8x32xf32>
    %299 = arith.mulf %298, %297 : vector<2x8x32xf32>
    %300 = vector.shape_cast %22 : vector<1x32xf32> to vector<1x1x32xf32>
    %301 = vector.broadcast %300 : vector<1x1x32xf32> to vector<2x8x32xf32>
    %302 = arith.mulf %299, %301 : vector<2x8x32xf32>
    %cst_68 = arith.constant dense<0.000000e+00> : vector<2x8xf32>
    %303 = vector.multi_reduction <add>, %302, %cst_68 [2] : vector<2x8x32xf32> to vector<2x8xf32>
    %cst_69 = arith.constant -1.000000e+08 : f32
    %304 = vector.broadcast %cst_69 : f32 to vector<2x8xf32>
    %305 = arith.select %232, %304, %303 : vector<2x8xi1>, vector<2x8xf32>
    %cst_70 = arith.constant dense<0xFF800000> : vector<2xf32>
    %306 = vector.multi_reduction <maximumf>, %305, %cst_70 [1] : vector<2x8xf32> to vector<2xf32>
    %cst_71 = arith.constant 0xFF800000 : f32
    %307 = vector.broadcast %cst_71 : f32 to vector<2xf32>
    %308 = arith.maximumf %307, %306 : vector<2xf32>
    %309 = vector.shape_cast %308 : vector<2xf32> to vector<2x1xf32>
    %310 = vector.broadcast %309 : vector<2x1xf32> to vector<2x8xf32>
    %311 = arith.subf %305, %310 : vector<2x8xf32>
    %312 = math.exp %311 : vector<2x8xf32>
    %cst_72 = arith.constant dense<0.000000e+00> : vector<2xf32>
    %313 = vector.multi_reduction <add>, %312, %cst_72 [1] : vector<2x8xf32> to vector<2xf32>
    %314 = vector.shape_cast %313 : vector<2xf32> to vector<2x1xf32>
    %315 = math.log %314 : vector<2x1xf32>
    %316 = vector.broadcast %315 : vector<2x1xf32> to vector<2x8xf32>
    %317 = arith.subf %311, %316 : vector<2x8xf32>
    %cst_73 = arith.constant dense<0xFF800000> : vector<2xf32>
    %318 = vector.multi_reduction <maximumf>, %317, %cst_73 [1] : vector<2x8xf32> to vector<2xf32>
    %319 = vector.shape_cast %318 : vector<2xf32> to vector<2x1xf32>
    %320 = vector.broadcast %319 : vector<2x1xf32> to vector<2x8xf32>
    %321 = arith.cmpf oge, %317, %320 : vector<2x8xf32>
    %cst_74 = arith.constant 8.000000e+00 : f32
    %322 = vector.broadcast %cst_74 : f32 to vector<2x8xf32>
    %323 = arith.select %321, %235, %322 : vector<2x8xi1>, vector<2x8xf32>
    %cst_75 = arith.constant dense<0x7F800000> : vector<2xf32>
    %324 = vector.multi_reduction <minimumf>, %323, %cst_75 [1] : vector<2x8xf32> to vector<2xf32>
    %325 = vector.shape_cast %324 : vector<2xf32> to vector<2x1xf32>
    %326 = arith.fptosi %325 : vector<2x1xf32> to vector<2x1xi32>
    %327 = vector.broadcast %326 : vector<2x1xi32> to vector<2x8xi32>
    %328 = arith.cmpi eq, %234, %327 : vector<2x8xi32>
    %329 = arith.extui %328 : vector<2x8xi1> to vector<2x8xi32>
    %330 = arith.sitofp %329 : vector<2x8xi32> to vector<2x8xf32>
    %331 = vector.shape_cast %330 : vector<2x8xf32> to vector<2x8x1xf32>
    %332 = vector.broadcast %331 : vector<2x8x1xf32> to vector<2x8x32xf32>
    %333 = arith.mulf %332, %27 : vector<2x8x32xf32>
    %cst_76 = arith.constant dense<0.000000e+00> : vector<2x32xf32>
    %334 = vector.multi_reduction <add>, %333, %cst_76 [1] : vector<2x8x32xf32> to vector<2x32xf32>
    %cst_77 = arith.constant 0.000000e+00 : f32
    %335 = vector.broadcast %cst_77 : f32 to vector<2x8xf32>
    %336 = arith.select %328, %317, %335 : vector<2x8xi1>, vector<2x8xf32>
    %cst_78 = arith.constant dense<0.000000e+00> : vector<2xf32>
    %337 = vector.multi_reduction <add>, %336, %cst_78 [1] : vector<2x8xf32> to vector<2xf32>
    %338 = vector.shape_cast %337 : vector<2xf32> to vector<2x1xf32>
    %339 = arith.addf %233, %338 : vector<2x1xf32>
    %340 = arith.ori %232, %328 : vector<2x8xi1>
    %c0_79 = arith.constant 0 : index
    %c0_80 = arith.constant 0 : index
    %341 = vector.load %arg4[%c0_79, %c0_80] : memref<2x3xi32, #tpu.memory_space<vmem>>, vector<2x1xi32>
    tpu.vector_store %arg4[%c0_79, %c0_80], %326 {strides = array<i32>} : memref<2x3xi32, #tpu.memory_space<vmem>>, vector<2x1xi32>,
    %342 = arith.truncf %334 : vector<2x32xf32> to vector<2x32xbf16>
    %cst_81 = arith.constant dense<0.000000e+00> : vector<2x128xf32>
    %343 = tpu.matmul %342, %7, %cst_81 {dimension_numbers = #tpu.dot_dimension_numbers<[1], [0], [0], [1], [0, 0, 1, 1], [], []>} : vector<2x32xbf16>, vector<32x128xbf16>, vector<2x128xf32> -> vector<2x128xf32>
    %344 = arith.truncf %258 : vector<2x32xf32> to vector<2x32xbf16>
    %cst_82 = arith.constant dense<0.000000e+00> : vector<2x128xf32>
    %345 = tpu.matmul %344, %9, %cst_82 {dimension_numbers = #tpu.dot_dimension_numbers<[1], [0], [0], [1], [0, 0, 1, 1], [], []>} : vector<2x32xbf16>, vector<32x128xbf16>, vector<2x128xf32> -> vector<2x128xf32>
    %346 = arith.addf %343, %345 : vector<2x128xf32>
    %347 = vector.broadcast %17 : vector<1x128xf32> to vector<2x128xf32>
    %348 = arith.addf %346, %347 : vector<2x128xf32>
    %349 = vector.extract_strided_slice %348 {offsets = [0, 0], sizes = [2, 96], strides = [1, 1]} : vector<2x128xf32> to vector<2x96xf32>
    %350 = arith.negf %349 : vector<2x96xf32>
    %351 = math.exp %350 : vector<2x96xf32>
    %cst_83 = arith.constant 1.000000e+00 : f32
    %352 = vector.broadcast %cst_83 : f32 to vector<2x96xf32>
    %353 = arith.addf %352, %351 : vector<2x96xf32>
    %354 = arith.divf %352, %353 : vector<2x96xf32>
    %355 = vector.extract_strided_slice %348 {offsets = [0, 96], sizes = [2, 32], strides = [1, 1]} : vector<2x128xf32> to vector<2x32xf32>
    %356 = math.tanh %355 : vector<2x32xf32>
    %357 = vector.extract_strided_slice %354 {offsets = [0, 0], sizes = [2, 32], strides = [1, 1]} : vector<2x96xf32> to vector<2x32xf32>
    %358 = vector.extract_strided_slice %354 {offsets = [0, 32], sizes = [2, 32], strides = [1, 1]} : vector<2x96xf32> to vector<2x32xf32>
    %359 = vector.extract_strided_slice %354 {offsets = [0, 64], sizes = [2, 32], strides = [1, 1]} : vector<2x96xf32> to vector<2x32xf32>
    %360 = arith.mulf %358, %256 : vector<2x32xf32>
    %361 = arith.mulf %357, %356 : vector<2x32xf32>
    %362 = arith.addf %360, %361 : vector<2x32xf32>
    %363 = math.tanh %362 : vector<2x32xf32>
    %364 = arith.mulf %359, %363 : vector<2x32xf32>
    %365 = arith.truncf %364 : vector<2x32xf32> to vector<2x32xbf16>
    %cst_84 = arith.constant dense<0.000000e+00> : vector<2x32xf32>
    %366 = tpu.matmul %365, %12, %cst_84 {dimension_numbers = #tpu.dot_dimension_numbers<[1], [0], [0], [1], [0, 0, 1, 1], [], []>} : vector<2x32xbf16>, vector<32x32xbf16>, vector<2x32xf32> -> vector<2x32xf32>
    %367 = vector.broadcast %18 : vector<1x32xf32> to vector<2x32xf32>
    %368 = arith.addf %366, %367 : vector<2x32xf32>
    %369 = vector.shape_cast %368 : vector<2x32xf32> to vector<2x1x32xf32>
    %370 = vector.broadcast %369 : vector<2x1x32xf32> to vector<2x8x32xf32>
    %371 = arith.addf %370, %230 : vector<2x8x32xf32>
    %372 = math.tanh %371 : vector<2x8x32xf32>
    %373 = vector.shape_cast %21 : vector<1x32xf32> to vector<1x1x32xf32>
    %374 = vector.broadcast %373 : vector<1x1x32xf32> to vector<2x8x32xf32>
    %375 = arith.mulf %372, %374 : vector<2x8x32xf32>
    %cst_85 = arith.constant dense<0.000000e+00> : vector<2x8xf32>
    %376 = vector.multi_reduction <add>, %375, %cst_85 [2] : vector<2x8x32xf32> to vector<2x8xf32>
    %cst_86 = arith.constant -1.000000e+08 : f32
    %377 = vector.broadcast %cst_86 : f32 to vector<2x8xf32>
    %378 = arith.select %340, %377, %376 : vector<2x8xi1>, vector<2x8xf32>
    %cst_87 = arith.constant 1.000000e+00 : f32
    %379 = vector.broadcast %cst_87 : f32 to vector<2x8xf32>
    %380 = arith.divf %378, %379 : vector<2x8xf32>
    %cst_88 = arith.constant dense<0xFF800000> : vector<2xf32>
    %381 = vector.multi_reduction <maximumf>, %380, %cst_88 [1] : vector<2x8xf32> to vector<2xf32>
    %cst_89 = arith.constant 0xFF800000 : f32
    %382 = vector.broadcast %cst_89 : f32 to vector<2xf32>
    %383 = arith.maximumf %382, %381 : vector<2xf32>
    %384 = vector.shape_cast %383 : vector<2xf32> to vector<2x1xf32>
    %385 = vector.broadcast %384 : vector<2x1xf32> to vector<2x8xf32>
    %386 = arith.subf %380, %385 : vector<2x8xf32>
    %387 = math.exp %386 : vector<2x8xf32>
    %cst_90 = arith.constant dense<0.000000e+00> : vector<2xf32>
    %388 = vector.multi_reduction <add>, %387, %cst_90 [1] : vector<2x8xf32> to vector<2xf32>
    %389 = vector.shape_cast %388 : vector<2xf32> to vector<2x1xf32>
    %390 = vector.broadcast %389 : vector<2x1xf32> to vector<2x8xf32>
    %391 = arith.divf %387, %390 : vector<2x8xf32>
    %392 = vector.shape_cast %391 : vector<2x8xf32> to vector<2x8x1xf32>
    %393 = vector.broadcast %392 : vector<2x8x1xf32> to vector<2x8x32xf32>
    %394 = arith.mulf %230, %393 : vector<2x8x32xf32>
    %cst_91 = arith.constant dense<0.000000e+00> : vector<2x32xf32>
    %395 = vector.multi_reduction <add>, %394, %cst_91 [1] : vector<2x8x32xf32> to vector<2x32xf32>
    %396 = arith.truncf %395 : vector<2x32xf32> to vector<2x32xbf16>
    %cst_92 = arith.constant dense<0.000000e+00> : vector<2x32xf32>
    %397 = tpu.matmul %396, %13, %cst_92 {dimension_numbers = #tpu.dot_dimension_numbers<[1], [0], [0], [1], [0, 0, 1, 1], [], []>} : vector<2x32xbf16>, vector<32x32xbf16>, vector<2x32xf32> -> vector<2x32xf32>
    %398 = vector.broadcast %19 : vector<1x32xf32> to vector<2x32xf32>
    %399 = arith.addf %397, %398 : vector<2x32xf32>
    %400 = vector.shape_cast %399 : vector<2x32xf32> to vector<2x1x32xf32>
    %401 = vector.broadcast %400 : vector<2x1x32xf32> to vector<2x8x32xf32>
    %402 = arith.addf %401, %231 : vector<2x8x32xf32>
    %403 = math.tanh %402 : vector<2x8x32xf32>
    %cst_93 = arith.constant 1.000000e+01 : f32
    %404 = vector.broadcast %cst_93 : f32 to vector<2x8x32xf32>
    %405 = arith.mulf %404, %403 : vector<2x8x32xf32>
    %406 = vector.shape_cast %22 : vector<1x32xf32> to vector<1x1x32xf32>
    %407 = vector.broadcast %406 : vector<1x1x32xf32> to vector<2x8x32xf32>
    %408 = arith.mulf %405, %407 : vector<2x8x32xf32>
    %cst_94 = arith.constant dense<0.000000e+00> : vector<2x8xf32>
    %409 = vector.multi_reduction <add>, %408, %cst_94 [2] : vector<2x8x32xf32> to vector<2x8xf32>
    %cst_95 = arith.constant -1.000000e+08 : f32
    %410 = vector.broadcast %cst_95 : f32 to vector<2x8xf32>
    %411 = arith.select %340, %410, %409 : vector<2x8xi1>, vector<2x8xf32>
    %cst_96 = arith.constant dense<0xFF800000> : vector<2xf32>
    %412 = vector.multi_reduction <maximumf>, %411, %cst_96 [1] : vector<2x8xf32> to vector<2xf32>
    %cst_97 = arith.constant 0xFF800000 : f32
    %413 = vector.broadcast %cst_97 : f32 to vector<2xf32>
    %414 = arith.maximumf %413, %412 : vector<2xf32>
    %415 = vector.shape_cast %414 : vector<2xf32> to vector<2x1xf32>
    %416 = vector.broadcast %415 : vector<2x1xf32> to vector<2x8xf32>
    %417 = arith.subf %411, %416 : vector<2x8xf32>
    %418 = math.exp %417 : vector<2x8xf32>
    %cst_98 = arith.constant dense<0.000000e+00> : vector<2xf32>
    %419 = vector.multi_reduction <add>, %418, %cst_98 [1] : vector<2x8xf32> to vector<2xf32>
    %420 = vector.shape_cast %419 : vector<2xf32> to vector<2x1xf32>
    %421 = math.log %420 : vector<2x1xf32>
    %422 = vector.broadcast %421 : vector<2x1xf32> to vector<2x8xf32>
    %423 = arith.subf %417, %422 : vector<2x8xf32>
    %cst_99 = arith.constant dense<0xFF800000> : vector<2xf32>
    %424 = vector.multi_reduction <maximumf>, %423, %cst_99 [1] : vector<2x8xf32> to vector<2xf32>
    %425 = vector.shape_cast %424 : vector<2xf32> to vector<2x1xf32>
    %426 = vector.broadcast %425 : vector<2x1xf32> to vector<2x8xf32>
    %427 = arith.cmpf oge, %423, %426 : vector<2x8xf32>
    %cst_100 = arith.constant 8.000000e+00 : f32
    %428 = vector.broadcast %cst_100 : f32 to vector<2x8xf32>
    %429 = arith.select %427, %235, %428 : vector<2x8xi1>, vector<2x8xf32>
    %cst_101 = arith.constant dense<0x7F800000> : vector<2xf32>
    %430 = vector.multi_reduction <minimumf>, %429, %cst_101 [1] : vector<2x8xf32> to vector<2xf32>
    %431 = vector.shape_cast %430 : vector<2xf32> to vector<2x1xf32>
    %432 = arith.fptosi %431 : vector<2x1xf32> to vector<2x1xi32>
    %433 = vector.broadcast %432 : vector<2x1xi32> to vector<2x8xi32>
    %434 = arith.cmpi eq, %234, %433 : vector<2x8xi32>
    %435 = arith.extui %434 : vector<2x8xi1> to vector<2x8xi32>
    %436 = arith.sitofp %435 : vector<2x8xi32> to vector<2x8xf32>
    %437 = vector.shape_cast %436 : vector<2x8xf32> to vector<2x8x1xf32>
    %438 = vector.broadcast %437 : vector<2x8x1xf32> to vector<2x8x32xf32>
    %439 = arith.mulf %438, %27 : vector<2x8x32xf32>
    %cst_102 = arith.constant dense<0.000000e+00> : vector<2x32xf32>
    %440 = vector.multi_reduction <add>, %439, %cst_102 [1] : vector<2x8x32xf32> to vector<2x32xf32>
    %cst_103 = arith.constant 0.000000e+00 : f32
    %441 = vector.broadcast %cst_103 : f32 to vector<2x8xf32>
    %442 = arith.select %434, %423, %441 : vector<2x8xi1>, vector<2x8xf32>
    %cst_104 = arith.constant dense<0.000000e+00> : vector<2xf32>
    %443 = vector.multi_reduction <add>, %442, %cst_104 [1] : vector<2x8xf32> to vector<2xf32>
    %444 = vector.shape_cast %443 : vector<2xf32> to vector<2x1xf32>
    %445 = arith.addf %339, %444 : vector<2x1xf32>
    %446 = arith.ori %340, %434 : vector<2x8xi1>
    %c0_105 = arith.constant 0 : index
    %c1_106 = arith.constant 1 : index
    %447 = vector.load %arg4[%c0_105, %c1_106] : memref<2x3xi32, #tpu.memory_space<vmem>>, vector<2x1xi32>
    tpu.vector_store %arg4[%c0_105, %c1_106], %432 {strides = array<i32>} : memref<2x3xi32, #tpu.memory_space<vmem>>, vector<2x1xi32>,
    %448 = arith.truncf %440 : vector<2x32xf32> to vector<2x32xbf16>
    %cst_107 = arith.constant dense<0.000000e+00> : vector<2x128xf32>
    %449 = tpu.matmul %448, %7, %cst_107 {dimension_numbers = #tpu.dot_dimension_numbers<[1], [0], [0], [1], [0, 0, 1, 1], [], []>} : vector<2x32xbf16>, vector<32x128xbf16>, vector<2x128xf32> -> vector<2x128xf32>
    %450 = arith.truncf %364 : vector<2x32xf32> to vector<2x32xbf16>
    %cst_108 = arith.constant dense<0.000000e+00> : vector<2x128xf32>
    %451 = tpu.matmul %450, %9, %cst_108 {dimension_numbers = #tpu.dot_dimension_numbers<[1], [0], [0], [1], [0, 0, 1, 1], [], []>} : vector<2x32xbf16>, vector<32x128xbf16>, vector<2x128xf32> -> vector<2x128xf32>
    %452 = arith.addf %449, %451 : vector<2x128xf32>
    %453 = vector.broadcast %17 : vector<1x128xf32> to vector<2x128xf32>
    %454 = arith.addf %452, %453 : vector<2x128xf32>
    %455 = vector.extract_strided_slice %454 {offsets = [0, 0], sizes = [2, 96], strides = [1, 1]} : vector<2x128xf32> to vector<2x96xf32>
    %456 = arith.negf %455 : vector<2x96xf32>
    %457 = math.exp %456 : vector<2x96xf32>
    %cst_109 = arith.constant 1.000000e+00 : f32
    %458 = vector.broadcast %cst_109 : f32 to vector<2x96xf32>
    %459 = arith.addf %458, %457 : vector<2x96xf32>
    %460 = arith.divf %458, %459 : vector<2x96xf32>
    %461 = vector.extract_strided_slice %454 {offsets = [0, 96], sizes = [2, 32], strides = [1, 1]} : vector<2x128xf32> to vector<2x32xf32>
    %462 = math.tanh %461 : vector<2x32xf32>
    %463 = vector.extract_strided_slice %460 {offsets = [0, 0], sizes = [2, 32], strides = [1, 1]} : vector<2x96xf32> to vector<2x32xf32>
    %464 = vector.extract_strided_slice %460 {offsets = [0, 32], sizes = [2, 32], strides = [1, 1]} : vector<2x96xf32> to vector<2x32xf32>
    %465 = vector.extract_strided_slice %460 {offsets = [0, 64], sizes = [2, 32], strides = [1, 1]} : vector<2x96xf32> to vector<2x32xf32>
    %466 = arith.mulf %464, %362 : vector<2x32xf32>
    %467 = arith.mulf %463, %462 : vector<2x32xf32>
    %468 = arith.addf %466, %467 : vector<2x32xf32>
    %469 = math.tanh %468 : vector<2x32xf32>
    %470 = arith.mulf %465, %469 : vector<2x32xf32>
    %471 = arith.truncf %470 : vector<2x32xf32> to vector<2x32xbf16>
    %cst_110 = arith.constant dense<0.000000e+00> : vector<2x32xf32>
    %472 = tpu.matmul %471, %12, %cst_110 {dimension_numbers = #tpu.dot_dimension_numbers<[1], [0], [0], [1], [0, 0, 1, 1], [], []>} : vector<2x32xbf16>, vector<32x32xbf16>, vector<2x32xf32> -> vector<2x32xf32>
    %473 = vector.broadcast %18 : vector<1x32xf32> to vector<2x32xf32>
    %474 = arith.addf %472, %473 : vector<2x32xf32>
    %475 = vector.shape_cast %474 : vector<2x32xf32> to vector<2x1x32xf32>
    %476 = vector.broadcast %475 : vector<2x1x32xf32> to vector<2x8x32xf32>
    %477 = arith.addf %476, %230 : vector<2x8x32xf32>
    %478 = math.tanh %477 : vector<2x8x32xf32>
    %479 = vector.shape_cast %21 : vector<1x32xf32> to vector<1x1x32xf32>
    %480 = vector.broadcast %479 : vector<1x1x32xf32> to vector<2x8x32xf32>
    %481 = arith.mulf %478, %480 : vector<2x8x32xf32>
    %cst_111 = arith.constant dense<0.000000e+00> : vector<2x8xf32>
    %482 = vector.multi_reduction <add>, %481, %cst_111 [2] : vector<2x8x32xf32> to vector<2x8xf32>
    %cst_112 = arith.constant -1.000000e+08 : f32
    %483 = vector.broadcast %cst_112 : f32 to vector<2x8xf32>
    %484 = arith.select %446, %483, %482 : vector<2x8xi1>, vector<2x8xf32>
    %cst_113 = arith.constant 1.000000e+00 : f32
    %485 = vector.broadcast %cst_113 : f32 to vector<2x8xf32>
    %486 = arith.divf %484, %485 : vector<2x8xf32>
    %cst_114 = arith.constant dense<0xFF800000> : vector<2xf32>
    %487 = vector.multi_reduction <maximumf>, %486, %cst_114 [1] : vector<2x8xf32> to vector<2xf32>
    %cst_115 = arith.constant 0xFF800000 : f32
    %488 = vector.broadcast %cst_115 : f32 to vector<2xf32>
    %489 = arith.maximumf %488, %487 : vector<2xf32>
    %490 = vector.shape_cast %489 : vector<2xf32> to vector<2x1xf32>
    %491 = vector.broadcast %490 : vector<2x1xf32> to vector<2x8xf32>
    %492 = arith.subf %486, %491 : vector<2x8xf32>
    %493 = math.exp %492 : vector<2x8xf32>
    %cst_116 = arith.constant dense<0.000000e+00> : vector<2xf32>
    %494 = vector.multi_reduction <add>, %493, %cst_116 [1] : vector<2x8xf32> to vector<2xf32>
    %495 = vector.shape_cast %494 : vector<2xf32> to vector<2x1xf32>
    %496 = vector.broadcast %495 : vector<2x1xf32> to vector<2x8xf32>
    %497 = arith.divf %493, %496 : vector<2x8xf32>
    %498 = vector.shape_cast %497 : vector<2x8xf32> to vector<2x8x1xf32>
    %499 = vector.broadcast %498 : vector<2x8x1xf32> to vector<2x8x32xf32>
    %500 = arith.mulf %230, %499 : vector<2x8x32xf32>
    %cst_117 = arith.constant dense<0.000000e+00> : vector<2x32xf32>
    %501 = vector.multi_reduction <add>, %500, %cst_117 [1] : vector<2x8x32xf32> to vector<2x32xf32>
    %502 = arith.truncf %501 : vector<2x32xf32> to vector<2x32xbf16>
    %cst_118 = arith.constant dense<0.000000e+00> : vector<2x32xf32>
    %503 = tpu.matmul %502, %13, %cst_118 {dimension_numbers = #tpu.dot_dimension_numbers<[1], [0], [0], [1], [0, 0, 1, 1], [], []>} : vector<2x32xbf16>, vector<32x32xbf16>, vector<2x32xf32> -> vector<2x32xf32>
    %504 = vector.broadcast %19 : vector<1x32xf32> to vector<2x32xf32>
    %505 = arith.addf %503, %504 : vector<2x32xf32>
    %506 = vector.shape_cast %505 : vector<2x32xf32> to vector<2x1x32xf32>
    %507 = vector.broadcast %506 : vector<2x1x32xf32> to vector<2x8x32xf32>
    %508 = arith.addf %507, %231 : vector<2x8x32xf32>
    %509 = math.tanh %508 : vector<2x8x32xf32>
    %cst_119 = arith.constant 1.000000e+01 : f32
    %510 = vector.broadcast %cst_119 : f32 to vector<2x8x32xf32>
    %511 = arith.mulf %510, %509 : vector<2x8x32xf32>
    %512 = vector.shape_cast %22 : vector<1x32xf32> to vector<1x1x32xf32>
    %513 = vector.broadcast %512 : vector<1x1x32xf32> to vector<2x8x32xf32>
    %514 = arith.mulf %511, %513 : vector<2x8x32xf32>
    %cst_120 = arith.constant dense<0.000000e+00> : vector<2x8xf32>
    %515 = vector.multi_reduction <add>, %514, %cst_120 [2] : vector<2x8x32xf32> to vector<2x8xf32>
    %cst_121 = arith.constant -1.000000e+08 : f32
    %516 = vector.broadcast %cst_121 : f32 to vector<2x8xf32>
    %517 = arith.select %446, %516, %515 : vector<2x8xi1>, vector<2x8xf32>
    %cst_122 = arith.constant dense<0xFF800000> : vector<2xf32>
    %518 = vector.multi_reduction <maximumf>, %517, %cst_122 [1] : vector<2x8xf32> to vector<2xf32>
    %cst_123 = arith.constant 0xFF800000 : f32
    %519 = vector.broadcast %cst_123 : f32 to vector<2xf32>
    %520 = arith.maximumf %519, %518 : vector<2xf32>
    %521 = vector.shape_cast %520 : vector<2xf32> to vector<2x1xf32>
    %522 = vector.broadcast %521 : vector<2x1xf32> to vector<2x8xf32>
    %523 = arith.subf %517, %522 : vector<2x8xf32>
    %524 = math.exp %523 : vector<2x8xf32>
    %cst_124 = arith.constant dense<0.000000e+00> : vector<2xf32>
    %525 = vector.multi_reduction <add>, %524, %cst_124 [1] : vector<2x8xf32> to vector<2xf32>
    %526 = vector.shape_cast %525 : vector<2xf32> to vector<2x1xf32>
    %527 = math.log %526 : vector<2x1xf32>
    %528 = vector.broadcast %527 : vector<2x1xf32> to vector<2x8xf32>
    %529 = arith.subf %523, %528 : vector<2x8xf32>
    %cst_125 = arith.constant dense<0xFF800000> : vector<2xf32>
    %530 = vector.multi_reduction <maximumf>, %529, %cst_125 [1] : vector<2x8xf32> to vector<2xf32>
    %531 = vector.shape_cast %530 : vector<2xf32> to vector<2x1xf32>
    %532 = vector.broadcast %531 : vector<2x1xf32> to vector<2x8xf32>
    %533 = arith.cmpf oge, %529, %532 : vector<2x8xf32>
    %cst_126 = arith.constant 8.000000e+00 : f32
    %534 = vector.broadcast %cst_126 : f32 to vector<2x8xf32>
    %535 = arith.select %533, %235, %534 : vector<2x8xi1>, vector<2x8xf32>
    %cst_127 = arith.constant dense<0x7F800000> : vector<2xf32>
    %536 = vector.multi_reduction <minimumf>, %535, %cst_127 [1] : vector<2x8xf32> to vector<2xf32>
    %537 = vector.shape_cast %536 : vector<2xf32> to vector<2x1xf32>
    %538 = arith.fptosi %537 : vector<2x1xf32> to vector<2x1xi32>
    %539 = vector.broadcast %538 : vector<2x1xi32> to vector<2x8xi32>
    %540 = arith.cmpi eq, %234, %539 : vector<2x8xi32>
    %cst_128 = arith.constant 0.000000e+00 : f32
    %541 = vector.broadcast %cst_128 : f32 to vector<2x8xf32>
    %542 = arith.select %540, %529, %541 : vector<2x8xi1>, vector<2x8xf32>
    %cst_129 = arith.constant dense<0.000000e+00> : vector<2xf32>
    %543 = vector.multi_reduction <add>, %542, %cst_129 [1] : vector<2x8xf32> to vector<2xf32>
    %544 = vector.shape_cast %543 : vector<2xf32> to vector<2x1xf32>
    %545 = arith.addf %445, %544 : vector<2x1xf32>
    %c0_130 = arith.constant 0 : index
    %c2_131 = arith.constant 2 : index
    %546 = vector.load %arg4[%c0_130, %c2_131] : memref<2x3xi32, #tpu.memory_space<vmem>>, vector<2x1xi32>
    tpu.vector_store %arg4[%c0_130, %c2_131], %538 {strides = array<i32>} : memref<2x3xi32, #tpu.memory_space<vmem>>, vector<2x1xi32>,
    %c0_132 = arith.constant 0 : index
    %c0_133 = arith.constant 0 : index
    %547 = vector.load %arg5[%c0_132, %c0_133] : memref<2x1xf32, #tpu.memory_space<vmem>>, vector<2x1xf32>
    tpu.vector_store %arg5[%c0_132, %c0_133], %545 {strides = array<i32>} : memref<2x1xf32, #tpu.memory_space<vmem>>, vector<2x1xf32>,
    return
  }
  func.func @transform_0(%arg0: i32) -> (i32, i32, i32) {
    %c0_i32 = arith.constant 0 : i32
    %c0_i32_0 = arith.constant 0 : i32
    %c0_i32_1 = arith.constant 0 : i32
    return %arg0, %c0_i32, %c0_i32_0 : i32, i32, i32
  }
  func.func @transform_1(%arg0: i32) -> (i32, i32, i32) {
    %c0_i32 = arith.constant 0 : i32
    %c0_i32_0 = arith.constant 0 : i32
    %c0_i32_1 = arith.constant 0 : i32
    return %arg0, %c0_i32, %c0_i32_0 : i32, i32, i32
  }
  func.func @transform_2(%arg0: i32) -> (i32, i32) {
    %c0_i32 = arith.constant 0 : i32
    %c0_i32_0 = arith.constant 0 : i32
    %c0_i32_1 = arith.constant 0 : i32
    return %c0_i32, %c0_i32_0 : i32, i32
  }
  func.func @transform_3(%arg0: i32) -> (i32, i32) {
    %c0_i32 = arith.constant 0 : i32
    %c0_i32_0 = arith.constant 0 : i32
    return %arg0, %c0_i32 : i32, i32
  }
  func.func @transform_4(%arg0: i32) -> (i32, i32) {
    %c0_i32 = arith.constant 0 : i32
    %c0_i32_0 = arith.constant 0 : i32
    return %arg0, %c0_i32 : i32, i32
  }
}

</mosaic_0001>

<bundles_post_ra>
// kernel: tpu_custom_call.1
= control target key start
LH: loop header
LB: loop body
LE: loop exit
PB: predicated region body
PF: predicated region fallthrough
CT: control target
= control target key end

     0   :  { %10 = vsyncpa [#allocation4], 0  ;;  %s4177_s0 = inlined_call_operand.hbm [shape: f32[2,8,17], index: 0, kind: input, shape index: {}]   ;;  %s4178_s1 = inlined_call_operand.vmem [shape: f32[2,1,17], index: 1, kind: input, shape index: {}]   ;;  %s4179_s2 = inlined_call_operand.hbm [shape: f32[192,128], index: 2, kind: input, shape index: {}]   ;;  %s4180_s3 = inlined_call_operand.hbm [shape: s32[2,3], index: 3, kind: output, shape index: {0}]   ;;  %s4181_s4 = inlined_call_operand.vmem [shape: f32[2,1], index: 4, kind: output, shape index: {1}]  }
   0x1   :  { %11 = vsyncpa [#allocation7], 0 }
   0x2   :  { %12 = vsyncpa [#allocation5], 0  ;;  %s3381_s15 = smov [#allocation3]   ;;  %s3309_s19 = scalar_lea.hbm %s4177_s0, 256 }
   0x3   :  { %s18_s16 = sshll.u32 %s3381_s15, 4  ;;  %p3310_p0 = scmp.ne.s32.totalorder %s4177_s0, %s3309_s19  ;;  %s19_s16 = int_to_ptr.vmem [resolvable:$true] %s18_s16 }
   0x4   :  { %p3313_p1 = scmp.lt.u32.totalorder %s3309_s19, %s4177_s0 }
   0x6   :  { %p3315_p2 = pnand %p3313_p1, %p3310_p0 }
   0x8   :  { %3318 = shalt.err (!%p3315_p2)
}
   0x9   :  { %s3319_s24 = scalar_lea.vmem %s19_s16, 256  ;;  %p3324_p4 = scmp.lt.s32.totalorder %s19_s16, %s19_s16 }
   0xa   :  { %p3320_p3 = scmp.ne.s32.totalorder %s19_s16, %s3319_s24  ;;  %p3325_p5 = scmp.lt.s32.totalorder %s3319_s24, %s3319_s24 }
   0xc   :  { %p3326_p6 = por %p3325_p5, %p3324_p4 }
   0xe   :  { %p3327_p7 = pnand %p3326_p6, %p3320_p3 }
  0x10   :  { %3330 = shalt.err (!%p3327_p7)
}
  0x11   :  { %s3382_s25 = smov 128   ;;  %s3383_s26 = smov 8  }
  0x12   :  { %24 = dma.hbm_to_vmem [thread:$0]  %s4177_s0, 256, %s19_s16, [#allocation4], %s3382_s25, %s3382_s25, %s3383_s26  }
  0x13   :  { %s3384_s29 = smov [#allocation6]   ;;  %s3331_s7 = scalar_lea.hbm %s4179_s2, 3072 }
  0x14   :  { %s32_s30 = sshll.u32 %s3384_s29, 4  ;;  %p3332_p8 = scmp.ne.s32.totalorder %s4179_s2, %s3331_s7  ;;  %s33_s30 = int_to_ptr.vmem [resolvable:$true] %s32_s30 }
  0x15   :  { %p3335_p9 = scmp.lt.u32.totalorder %s3331_s7, %s4179_s2 }
  0x17   :  { %p3337_p10 = pnand %p3335_p9, %p3332_p8 }
  0x19   :  { %3340 = shalt.err (!%p3337_p10)
}
  0x1a   :  { %s3341_s12 = scalar_lea.vmem %s33_s30, 3072  ;;  %p3346_p12 = scmp.lt.s32.totalorder %s33_s30, %s33_s30 }
  0x1b   :  { %p3342_p11 = scmp.ne.s32.totalorder %s33_s30, %s3341_s12  ;;  %p3347_p13 = scmp.lt.s32.totalorder %s3341_s12, %s3341_s12 }
  0x1d   :  { %p3348_p0 = por %p3347_p13, %p3346_p12 }
  0x1f   :  { %p3349_p1 = pnand %p3348_p0, %p3342_p11 }
  0x21   :  { %3352 = shalt.err (!%p3349_p1)
}
  0x22   :  { %38 = dma.hbm_to_vmem [thread:$0]  %s4179_s2, 3072, %s33_s30, [#allocation7], %s3382_s25, %s3382_s25, %s3383_s26  }
  0x23   :  { %3375 = dma.done.wait [#allocation4], 256  }
  0x24   :  { %3376 = vsyncadd [#allocation4], 4294967040 }
  0x25   :  { %3377 = dma.done.wait [#allocation7], 3072  }
  0x26   :  { %3378 = vsyncadd [#allocation7], 4294964224  ;;  %v3385_v0 = vmov 0.0   ;;  %vm3386_vm0 = vmmov 0   ;;  %v3387_v1 = vmov 0   ;;  %vm89_vm1 = vcmask 1040384  }
  0x27   :  { %2890 = vmatprep.subr.bf16.mxu0 %v3385_v0  ;;  %2894 = vmatprep.mubr.msk.bf16.mxu0 %vm3386_vm0, %v3385_v0  ;;  %v46_v2 = vld [vmem:[#allocation6] sm:$0xff]  ;;  %v47_v3 = vld [vmem:[#allocation6 + $0x8] sm:$0xff]  ;;  %v48_v4 = vld [vmem:[#allocation6 + $0x10] sm:$0x1]  ;;  %v91_v5 = vsel %vm89_vm1, 65535, %v3387_v1  ;;  %vm145_vm2 = vcmask 1041409   ;;  %v192_v46 = vlaneseq }
  0x28   :  { %2898 = vmatprep.subr.bf16.mxu1 %v3385_v0  ;;  %2902 = vmatprep.mubr.msk.bf16.mxu1 %vm3386_vm0, %v3385_v0  ;;  %v49_v6 = vpack.c.bf16 %v47_v3, %v46_v2  ;;  %v50_v7 = vpack.c.bf16 %v48_v4, %v48_v4  ;;  %v136_v8 = vld [vmem:[%s4178_s1] sm:$0x1]  ;;  %v137_v9 = vld [vmem:[%s4178_s1 + $0x1] sm:$0x1]  ;;  %v82_v12 = vld [vmem:[#allocation3] sm:$0xff]  ;;  %vm85_vm3 = vcmask 138240  }
  0x29   :  { %3101 = vset.pattern.permute.xlu0 %v3387_v1  ;;  %3100 = vset.pattern.permute.xlu1 %v3387_v1  ;;  %v138_v10 = vpack.c.bf16 %v136_v8, %v136_v8  ;;  %v83_v13 = vld [vmem:[#allocation3 + $0x8] sm:$0xff]  ;;  %v139_v14 = vpack.c.bf16 %v137_v9, %v137_v9  ;;  %v52_v16 = vld [vmem:[#allocation6 + $0x20] sm:$0xff]  ;;  %v59_v27 = vld [vmem:[#allocation6 + $0x48] sm:$0xff]  ;;  %vm196_vm4 = vcmask 261120   ;;  %v3495_v47 = vshrl.u32 %v192_v46, 7  ;;  %s3388_s1 = smov 32  }
  0x2a   :  { %2891 = vmatpush3.bf16.msra.mxu0 %v49_v6  ;;  %v93_v11 = vand.u32 %v91_v5, %v50_v7  ;;  %2899 = vmatpush3.bf16.msra.mxu1 %v49_v6  ;;  %v51_v15 = vld [vmem:[#allocation6 + $0x18] sm:$0xff]  ;;  %v84_v19 = vpack.c.bf16 %v83_v13, %v82_v12  ;;  %v58_v21 = vld [vmem:[#allocation6 + $0x40] sm:$0xff]  ;;  %v60_v28 = vld [vmem:[#allocation6 + $0x50] sm:$0xff]  ;;  %s3389_s17 = smov 64   ;;  %vm346_vm5 = vcmask 253952   ;;  %vm471_vm6 = vcmask 254977  }
  0x2b   :  { %2892 = vmatprep.subr.bf16.mxu0 %v3385_v0  ;;  %2900 = vmatprep.subr.bf16.mxu1 %v3385_v0  ;;  %v142_v17 = vunpack.c.l.b16 %v138_v10  ;;  %v143_v18 = vunpack.c.l.b16 %v139_v14  ;;  %v57_v20 = vld [vmem:[#allocation6 + $0x38] sm:$0xff]  ;;  %v55_v23 = vpack.c.bf16 %v52_v16, %v51_v15  ;;  %v3468_v29 = vpack.c.bf16 %v60_v28, %v59_v27  ;;  %v53_v30 = vld [vmem:[#allocation6 + $0x28] sm:$0xff]  ;;  %v54_v31 = vld [vmem:[#allocation6 + $0x30] sm:$0xff]  ;;  %s3391_s18 = smov 96   ;;  %s3392_s19 = smov [#allocation8]  }
  0x2c   :  { %v3459_v25 = vpack.c.bf16 %v58_v21, %v57_v20  ;;  %v56_v32 = vpack.c.bf16 %v54_v31, %v53_v30  ;;  %v3498_v48 = vsub.s32 0, %v3495_v47  ;;  %v81_v49 = vld [vmem:[#allocation6 + $0xb8] sm:$0xff]  ;;  %vm597_vm7 = vcmask 256002   ;;  %s2760_s20 = sshll.u32 %s3392_s19, 4  ;;  %s2761_s20 = int_to_ptr.vmem [resolvable:$true] %s2760_s20 }
  0x2d   :  { %v144_v22 = vrot.slane %v143_v18, 7  ;;  %vm724_vm8 = vcmask 257027   ;;  %vm851_vm9 = vcmask 258052   ;;  %vm978_vm10 = vcmask 259077   ;;  %s3353_s21 = scalar_lea.vmem %s2761_s20, 32  ;;  %p3358_p3 = scmp.lt.s32.totalorder %s2761_s20, %s2761_s20 }
  0x2e   :  { %2893 = vmatpush3.bf16.msra.mxu0 %v93_v11  ;;  %2901 = vmatpush3.bf16.msra.mxu1 %v93_v11  ;;  %v195_v50 = vrot.slane %v81_v49, %v3498_v48  ;;  %vm1105_vm11 = vcmask 260102   ;;  %vm1232_vm12 = vcmask 261127   ;;  %vm1543_vm13 = vcmask 58368   ;;  %p3354_p2 = scmp.ne.s32.totalorder %s2761_s20, %s3353_s21  ;;  %p3359_p4 = scmp.lt.s32.totalorder %s3353_s21, %s3353_s21 }
  0x2f   :  { %2914 = vmatprep.subr.bf16.mxu1 %v3385_v0  ;;  %2906 = vmatprep.subr.bf16.mxu0 %v3385_v0  ;;  %v146_v24 = vsel %vm145_vm2, %v144_v22, %v142_v17  ;;  %vm1914_vm1 = vcmask 1024  }
  0x30   :  { %v147_v26 = vpack.c.b16 %v146_v24, %v146_v24  ;;  %p3360_p5 = por %p3359_p4, %p3358_p3 }
  0x31   :  { %2895 = vmatmul.mubr.msk.bf16.vlgmr.msra.gmra.mrb[0].mxu0 %vm85_vm3, %v84_v19 }
  0x32   :  { %2907 = vmatpush3.bf16.msra.mxu0 %v55_v23  ;;  %2910 = vmatprep.mubr.msk.bf16.mxu0 %vm3386_vm0, %v3385_v0  ;;  %p3361_p6 = pnand %p3360_p5, %p3354_p2 }
  0x33   :  { %2903 = vmatmul.mubr.msk.bf16.vlgmr.msra.gmra.mrb[0].mxu1 %vm85_vm3, %v147_v26  ;;  %2908 = vmatprep.subr.bf16.mxu0 %v3385_v0 }
  0x34   :  { %2915 = vmatpush3.bf16.msra.mxu1 %v3459_v25  ;;  %2918 = vmatprep.mubr.msk.bf16.mxu1 %vm3386_vm0, %v3385_v0 }
  0x35   :  { %2916 = vmatprep.subr.bf16.mxu1 %v3385_v0 }
  0x36   :  { %2909 = vmatpush3.bf16.msra.mxu0 %v56_v32 }
  0x37   :  { %2922 = vmatprep.subr.bf16.mxu0 %v3385_v0 }
  0x38   :  { %2917 = vmatpush3.bf16.msra.mxu1 %v3468_v29 }
  0x39   :  { %2930 = vmatprep.subr.bf16.mxu1 %v3385_v0 }
  0x3b   :  { %2919 = vmatmul.mubr.bf16.vlgmr.msra.gmra.mrb[4].mxu1 %v3387_v1 }
  0x3c   :  { %2931 = vmatpush3.bf16.msra.mxu1 %v3459_v25  ;;  %2934 = vmatprep.mubr.msk.bf16.mxu1 %vm3386_vm0, %v3385_v0 }
  0x3d   :  { %2932 = vmatprep.subr.bf16.mxu1 %v3385_v0 }
  0x40   :  { %2933 = vmatpush3.bf16.msra.mxu1 %v3468_v29 }
  0x41   :  { %2946 = vmatprep.subr.bf16.mxu1 %v3385_v0 }
 0x104   :  { %v3479_v33 = vpop.f32.mrb[0].mxu0 }
 0x105   :  { %v2896_v34 = vpop.f32.mrb[1].mxu0 }
 0x106   :  { %v3481_v35 = vpop.f32.mrb[2].mxu0  ;;  %v3483_v36 = vpop.f32.mrb[0].mxu1 }
 0x107   :  { %v191_v37 = vpack.c.bf16 %v3481_v35, %v3479_v33  ;;  %v2897_v38 = vpop.f32.mrb[3].mxu0  ;;  %v2904_v39 = vpop.f32.mrb[1].mxu1 }
 0x108   :  { %v188_v40 = vpop.f32.mrb[2].mxu1 }
 0x109   :  { %2911 = vmatmul.mubr.msk.bf16.vlgmr.msra.gmra.mrb[4].mxu0 %vm196_vm4, %v191_v37  ;;  %v2905_v41 = vpop.f32.mrb[3].mxu1 }
 0x10a   :  { %2923 = vmatpush3.bf16.msra.mxu0 %v3459_v25  ;;  %2926 = vmatprep.mubr.msk.bf16.mxu0 %vm3386_vm0, %v3385_v0 }
 0x10b   :  { %2924 = vmatprep.subr.bf16.mxu0 %v3385_v0 }
 0x10e   :  { %2925 = vmatpush3.bf16.msra.mxu0 %v3468_v29  ;;  %v278_v42 = vpop.f32.mrb[4].mxu1 }
 0x10f   :  { %2938 = vmatprep.subr.bf16.mxu0 %v3385_v0  ;;  %v2920_v43 = vpop.f32.mrb[5].mxu1  ;;  %v285_v52 = vrot.slane %v278_v42, 1 }
 0x110   :  { %v281_v44 = vpop.f32.mrb[6].mxu1 }
 0x111   :  { %v2921_v45 = vpop.f32.mrb[7].mxu1 }
 0x1dc   :  { %v234_v51 = vpop.f32.mrb[4].mxu0 }
 0x1dd   :  { %v2912_v53 = vpop.f32.mrb[5].mxu0  ;;  %v3501_v55 = vadd.f32 %v234_v51, %v195_v50 }
 0x1de   :  { %v237_v54 = vpop.f32.mrb[6].mxu0 }
 0x1df   :  { %v3503_v56 = vadd.f32 %v237_v54, %v195_v50  ;;  %v2913_v57 = vpop.f32.mrb[7].mxu0  ;;  %v288_v59 = vadd.f32 %v278_v42, %v3501_v55 }
 0x1e1   :  { %v289_v58 = vadd.f32 %v285_v52, %v3503_v56  ;;  %v2777_v63 = vmul.f32 -1.442695, %v288_v59 }
 0x1e3   :  { %3102 = vtanh.f32 %v289_v58  ;;  %v2778_v62 = vmul.f32 -1.442695, %v289_v58 }
 0x1e4   :  { %3104 = vtanh.f32 %v288_v59 }
 0x1e5   :  { %3106 = vpow2.f32 %v2778_v62 }
 0x1e6   :  { %3108 = vpow2.f32 %v2777_v63 }
 0x1ed   :  { %v3103_v60 = vpop.eup %3102 }
 0x1ee   :  { %310 = vrot.lane.b32.xlu0 %v3103_v60, %s3388_s1  ;;  %v3105_v61 = vpop.eup %3104 }
 0x1ef   :  { %v3107_v1 = vpop.eup %3106 }
 0x1f0   :  { %v297_v2 = vadd.f32 1.0, %v3107_v1  ;;  %v3109_v3 = vpop.eup %3108 }
 0x1f1   :  { %v296_v4 = vadd.f32 1.0, %v3109_v3 }
 0x1f2   :  { %308 = vrot.lane.b32.xlu0 %v3105_v61, %s3388_s1  ;;  %3110 = vrcp.f32 %v297_v2 }
 0x1f3   :  { %3112 = vrcp.f32 %v296_v4 }
 0x1fc   :  { %v3111_v5 = vpop.eup %3110 }
 0x1fd   :  { %v3113_v8 = vpop.eup %3112  ;;  %v305_v11 = vmul.f32 0.0, %v3111_v5 }
 0x1fe   :  { %v304_v14 = vmul.f32 0.0, %v3113_v8 }
 0x260   :  { %v311_v6 = vpop.permute.xlu0 %310 }
 0x261   :  { %v315_v7 = vmul.f32 %v3111_v5, %v311_v6 }
 0x263   :  { %320 = vrot.lane.b32.xlu1 %v315_v7, %s3388_s1 }
 0x264   :  { %v309_v9 = vpop.permute.xlu0 %308 }
 0x265   :  { %v314_v10 = vmul.f32 %v3113_v8, %v309_v9 }
 0x267   :  { %318 = vrot.lane.b32.xlu1 %v314_v10, %s3388_s1 }
 0x2d5   :  { %v321_v12 = vpop.permute.xlu1 %320 }
 0x2d6   :  { %v3511_v13 = vadd.f32 %v321_v12, %v305_v11 }
 0x2d8   :  { %3114 = vtanh.f32 %v3511_v13  ;;  %v426_v62 = vrot.slane %v3511_v13, 7 }
 0x2d9   :  { %v319_v15 = vpop.permute.xlu1 %318 }
 0x2da   :  { %v3514_v16 = vadd.f32 %v319_v15, %v304_v14 }
 0x2dc   :  { %3116 = vtanh.f32 %v3514_v16  ;;  %v425_v1 = vrot.slane %v3514_v16, 7 }
 0x2e2   :  { %v3115_v17 = vpop.eup %3114 }
 0x2e3   :  { %332 = vrot.lane.b32.xlu0 %v3115_v17, %s3388_s1 }
 0x2e6   :  { %v3117_v18 = vpop.eup %3116 }
 0x2e7   :  { %330 = vrot.lane.b32.xlu1 %v3117_v18, %s3388_s1 }
 0x355   :  { %v333_v19 = vpop.permute.xlu0 %332 }
 0x356   :  { %v3519_v20 = vmul.f32 %v3111_v5, %v333_v19 }
 0x358   :  { %v350_v21 = vpack.c.bf16 %v3519_v20, %v3519_v20 }
 0x359   :  { %v331_v22 = vpop.permute.xlu1 %330 }
 0x35a   :  { %v354_v23 = vunpack.c.l.b16 %v350_v21  ;;  %v3523_v24 = vmul.f32 %v3113_v8, %v331_v22 }
 0x35c   :  { %v349_v26 = vpack.c.bf16 %v3523_v24, %v3523_v24  ;;  %v355_v27 = vrot.slane %v354_v23, 7 }
 0x35e   :  { %v353_v28 = vunpack.c.l.b16 %v349_v26 }
 0x360   :  { %v356_v30 = vsel %vm145_vm2, %v355_v27, %v353_v28 }
 0x361   :  { %v357_v31 = vpack.c.b16 %v356_v30, %v356_v30 }
 0x363   :  { %358 = vrot.lane.b32.xlu0 %v357_v31, %s3389_s17 }
 0x3d5   :  { %v359_v32 = vpop.permute.xlu0 %358 }
 0x3d6   :  { %2927 = vmatmul.mubr.msk.bf16.vlgmr.msra.gmra.mrb[8].mxu0 %vm196_vm4, %v359_v32 }
 0x3d7   :  { %2939 = vmatpush3.bf16.msra.mxu0 %v3459_v25  ;;  %2942 = vmatprep.mubr.msk.bf16.mxu0 %vm3386_vm0, %v3385_v0 }
 0x3d8   :  { %2940 = vmatprep.subr.bf16.mxu0 %v3385_v0 }
 0x3db   :  { %2941 = vmatpush3.bf16.msra.mxu0 %v3468_v29 }
 0x3dc   :  { %2954 = vmatprep.subr.bf16.mxu0 %v3385_v0 }
 0x4a9   :  { %v397_v34 = vpop.f32.mrb[8].mxu0 }
 0x4aa   :  { %v404_v37 = vrot.slane %v397_v34, 7  ;;  %v408_v38 = vadd.f32 %v397_v34, %v3503_v56  ;;  %v2928_v39 = vpop.f32.mrb[9].mxu0 }
 0x4ab   :  { %v400_v40 = vpop.f32.mrb[10].mxu0 }
 0x4ac   :  { %v407_v41 = vadd.f32 %v404_v37, %v3501_v55  ;;  %3118 = vtanh.f32 %v408_v38  ;;  %v2929_v42 = vpop.f32.mrb[11].mxu0  ;;  %v2781_v45 = vmul.f32 -1.442695, %v408_v38 }
 0x4ae   :  { %3120 = vtanh.f32 %v407_v41  ;;  %v2780_v49 = vmul.f32 -1.442695, %v407_v41 }
 0x4af   :  { %3122 = vpow2.f32 %v2781_v45 }
 0x4b0   :  { %3124 = vpow2.f32 %v2780_v49 }
 0x4b6   :  { %v3119_v43 = vpop.eup %3118 }
 0x4b7   :  { %435 = vrot.lane.b32.xlu0 %v3119_v43, %s3388_s1 }
 0x4b8   :  { %v3121_v44 = vpop.eup %3120 }
 0x4b9   :  { %433 = vrot.lane.b32.xlu1 %v3121_v44, %s3388_s1  ;;  %v3123_v50 = vpop.eup %3122 }
 0x4ba   :  { %v3125_v51 = vpop.eup %3124  ;;  %v416_v52 = vadd.f32 1.0, %v3123_v50 }
 0x4bb   :  { %v415_v53 = vadd.f32 1.0, %v3125_v51 }
 0x4bc   :  { %3126 = vrcp.f32 %v416_v52 }
 0x4bd   :  { %3128 = vrcp.f32 %v415_v53 }
 0x4c6   :  { %v3127_v54 = vpop.eup %3126 }
 0x4c7   :  { %v3129_v59 = vpop.eup %3128  ;;  %v430_v63 = vmul.f32 %v3127_v54, %v426_v62 }
 0x4c8   :  { %v429_v4 = vmul.f32 %v3129_v59, %v425_v1 }
 0x529   :  { %v436_v57 = vpop.permute.xlu0 %435 }
 0x52a   :  { %v440_v58 = vmul.f32 %v3127_v54, %v436_v57 }
 0x52b   :  { %v434_v60 = vpop.permute.xlu1 %433 }
 0x52c   :  { %445 = vrot.lane.b32.xlu0 %v440_v58, %s3388_s1  ;;  %v439_v61 = vmul.f32 %v3129_v59, %v434_v60 }
 0x52e   :  { %443 = vrot.lane.b32.xlu1 %v439_v61, %s3388_s1 }
 0x59e   :  { %v446_v2 = vpop.permute.xlu0 %445 }
 0x59f   :  { %v3544_v3 = vadd.f32 %v446_v2, %v430_v63 }
 0x5a0   :  { %v444_v5 = vpop.permute.xlu1 %443 }
 0x5a1   :  { %3130 = vtanh.f32 %v3544_v3  ;;  %v449_v6 = vadd.f32 %v444_v5, %v429_v4 }
 0x5a3   :  { %3132 = vtanh.f32 %v449_v6  ;;  %v551_v53 = vrot.slane %v449_v6, 7 }
 0x5ab   :  { %v3131_v7 = vpop.eup %3130 }
 0x5ac   :  { %457 = vrot.lane.b32.xlu0 %v3131_v7, %s3388_s1 }
 0x5ad   :  { %v3133_v8 = vpop.eup %3132 }
 0x5ae   :  { %455 = vrot.lane.b32.xlu1 %v3133_v8, %s3388_s1 }
 0x61e   :  { %v458_v9 = vpop.permute.xlu0 %457 }
 0x61f   :  { %v3549_v10 = vmul.f32 %v3127_v54, %v458_v9  ;;  %v552_v54 = vrot.slane %v3544_v3, 7 }
 0x620   :  { %v456_v11 = vpop.permute.xlu1 %455 }
 0x621   :  { %v3551_v12 = vmul.f32 %v3129_v59, %v456_v11  ;;  %v475_v13 = vpack.c.bf16 %v3549_v10, %v3549_v10 }
 0x623   :  { %v474_v14 = vpack.c.bf16 %v3551_v12, %v3551_v12  ;;  %v479_v16 = vunpack.c.l.b16 %v475_v13 }
 0x625   :  { %v478_v15 = vunpack.c.l.b16 %v474_v14 }
 0x627   :  { %v480_v17 = vrot.slane %v478_v15, 1 }
 0x629   :  { %v481_v18 = vsel %vm145_vm2, %v479_v16, %v480_v17 }
 0x62a   :  { %v482_v19 = vpack.c.b16 %v481_v18, %v481_v18 }
 0x62c   :  { %483 = vrot.lane.b32.xlu1 %v482_v19, %s3389_s17 }
 0x69e   :  { %v484_v21 = vpop.permute.xlu1 %483 }
 0x69f   :  { %2935 = vmatmul.mubr.msk.bf16.vlgmr.msra.gmra.mrb[8].mxu1 %vm196_vm4, %v484_v21 }
 0x6a0   :  { %2947 = vmatpush3.bf16.msra.mxu1 %v3459_v25  ;;  %2950 = vmatprep.mubr.msk.bf16.mxu1 %vm3386_vm0, %v3385_v0 }
 0x6a1   :  { %2948 = vmatprep.subr.bf16.mxu1 %v3385_v0 }
 0x6a4   :  { %2949 = vmatpush3.bf16.msra.mxu1 %v3468_v29 }
 0x6a5   :  { %2962 = vmatprep.subr.bf16.mxu1 %v3385_v0 }
 0x772   :  { %v522_v22 = vpop.f32.mrb[8].mxu1 }
 0x773   :  { %v529_v23 = vrot.slane %v522_v22, 6  ;;  %v530_v26 = vrot.slane %v522_v22, 7  ;;  %v2936_v27 = vpop.f32.mrb[9].mxu1 }
 0x774   :  { %v525_v28 = vpop.f32.mrb[10].mxu1 }
 0x775   :  { %v533_v30 = vadd.f32 %v529_v23, %v3501_v55  ;;  %v534_v31 = vadd.f32 %v530_v26, %v3503_v56  ;;  %v2937_v32 = vpop.f32.mrb[11].mxu1 }
 0x777   :  { %3134 = vtanh.f32 %v533_v30  ;;  %v2783_v38 = vmul.f32 -1.442695, %v533_v30  ;;  %v2784_v39 = vmul.f32 -1.442695, %v534_v31 }
 0x778   :  { %3136 = vtanh.f32 %v534_v31 }
 0x779   :  { %3138 = vpow2.f32 %v2783_v38 }
 0x77a   :  { %3140 = vpow2.f32 %v2784_v39 }
 0x781   :  { %v3135_v34 = vpop.eup %3134 }
 0x782   :  { %v3137_v37 = vpop.eup %3136  ;;  %559 = vrot.lane.b32.xlu0 %v3135_v34, %s3388_s1 }
 0x783   :  { %561 = vrot.lane.b32.xlu1 %v3137_v37, %s3388_s1  ;;  %v3139_v40 = vpop.eup %3138 }
 0x784   :  { %v3141_v41 = vpop.eup %3140  ;;  %v541_v42 = vadd.f32 1.0, %v3139_v40 }
 0x785   :  { %v542_v43 = vadd.f32 1.0, %v3141_v41 }
 0x786   :  { %3142 = vrcp.f32 %v541_v42 }
 0x787   :  { %3144 = vrcp.f32 %v542_v43 }
 0x790   :  { %v3143_v44 = vpop.eup %3142 }
 0x791   :  { %v3145_v49 = vpop.eup %3144  ;;  %v555_v57 = vmul.f32 %v3143_v44, %v551_v53 }
 0x792   :  { %v556_v58 = vmul.f32 %v3145_v49, %v552_v54 }
 0x7f4   :  { %v560_v45 = vpop.permute.xlu0 %559 }
 0x7f5   :  { %v562_v50 = vpop.permute.xlu1 %561  ;;  %v565_v51 = vmul.f32 %v3143_v44, %v560_v45 }
 0x7f6   :  { %v566_v52 = vmul.f32 %v3145_v49, %v562_v50 }
 0x7f7   :  { %569 = vrot.lane.b32.xlu0 %v565_v51, %s3388_s1 }
 0x7f8   :  { %571 = vrot.lane.b32.xlu1 %v566_v52, %s3388_s1 }
 0x869   :  { %v570_v59 = vpop.permute.xlu0 %569 }
 0x86a   :  { %v572_v60 = vpop.permute.xlu1 %571  ;;  %v3573_v61 = vadd.f32 %v570_v59, %v555_v57 }
 0x86b   :  { %v3575_v62 = vadd.f32 %v572_v60, %v556_v58 }
 0x86c   :  { %3146 = vtanh.f32 %v3573_v61 }
 0x86d   :  { %3148 = vtanh.f32 %v3575_v62  ;;  %v679_v50 = vrot.slane %v3575_v62, 7 }
 0x876   :  { %v3147_v63 = vpop.eup %3146 }
 0x877   :  { %v3149_v1 = vpop.eup %3148  ;;  %581 = vrot.lane.b32.xlu0 %v3147_v63, %s3388_s1 }
 0x878   :  { %583 = vrot.lane.b32.xlu1 %v3149_v1, %s3388_s1 }
 0x8e9   :  { %v582_v2 = vpop.permute.xlu0 %581 }
 0x8ea   :  { %v584_v3 = vpop.permute.xlu1 %583  ;;  %v3581_v4 = vmul.f32 %v3143_v44, %v582_v2 }
 0x8eb   :  { %v3583_v5 = vmul.f32 %v3145_v49, %v584_v3  ;;  %v678_v49 = vrot.slane %v3573_v61, 7 }
 0x8ec   :  { %v600_v6 = vpack.c.bf16 %v3581_v4, %v3581_v4 }
 0x8ed   :  { %v601_v7 = vpack.c.bf16 %v3583_v5, %v3583_v5 }
 0x8ee   :  { %v604_v8 = vunpack.c.l.b16 %v600_v6 }
 0x8ef   :  { %v605_v9 = vunpack.c.l.b16 %v601_v7 }
 0x8f0   :  { %v606_v11 = vrot.slane %v604_v8, 2 }
 0x8f1   :  { %v607_v13 = vrot.slane %v605_v9, 1 }
 0x8f3   :  { %v608_v14 = vsel %vm145_vm2, %v607_v13, %v606_v11 }
 0x8f4   :  { %v609_v15 = vpack.c.b16 %v608_v14, %v608_v14 }
 0x8f6   :  { %610 = vrot.lane.b32.xlu0 %v609_v15, %s3389_s17 }
 0x968   :  { %v611_v16 = vpop.permute.xlu0 %610 }
 0x969   :  { %2943 = vmatmul.mubr.msk.bf16.vlgmr.msra.gmra.mrb[12].mxu0 %vm196_vm4, %v611_v16 }
 0x96a   :  { %2955 = vmatpush3.bf16.msra.mxu0 %v3459_v25  ;;  %2958 = vmatprep.mubr.msk.bf16.mxu0 %vm3386_vm0, %v3385_v0 }
 0x96b   :  { %2956 = vmatprep.subr.bf16.mxu0 %v3385_v0 }
 0x96e   :  { %2957 = vmatpush3.bf16.msra.mxu0 %v3468_v29 }
 0x96f   :  { %2970 = vmatprep.subr.bf16.mxu0 %v3385_v0 }
 0xa3c   :  { %v649_v17 = vpop.f32.mrb[12].mxu0 }
 0xa3d   :  { %v656_v18 = vrot.slane %v649_v17, 5  ;;  %v657_v19 = vrot.slane %v649_v17, 6  ;;  %v2944_v21 = vpop.f32.mrb[13].mxu0 }
 0xa3e   :  { %v652_v22 = vpop.f32.mrb[14].mxu0 }
 0xa3f   :  { %v660_v23 = vadd.f32 %v656_v18, %v3501_v55  ;;  %v661_v26 = vadd.f32 %v657_v19, %v3503_v56  ;;  %v2945_v27 = vpop.f32.mrb[15].mxu0 }
 0xa41   :  { %3150 = vtanh.f32 %v660_v23  ;;  %v2786_v31 = vmul.f32 -1.442695, %v660_v23  ;;  %v2787_v32 = vmul.f32 -1.442695, %v661_v26 }
 0xa42   :  { %3152 = vtanh.f32 %v661_v26 }
 0xa43   :  { %3154 = vpow2.f32 %v2786_v31 }
 0xa44   :  { %3156 = vpow2.f32 %v2787_v32 }
 0xa4b   :  { %v3151_v28 = vpop.eup %3150 }
 0xa4c   :  { %v3153_v30 = vpop.eup %3152  ;;  %686 = vrot.lane.b32.xlu1 %v3151_v28, %s3388_s1 }
 0xa4d   :  { %688 = vrot.lane.b32.xlu0 %v3153_v30, %s3388_s1  ;;  %v3155_v34 = vpop.eup %3154 }
 0xa4e   :  { %v3157_v37 = vpop.eup %3156  ;;  %v668_v38 = vadd.f32 1.0, %v3155_v34 }
 0xa4f   :  { %v669_v39 = vadd.f32 1.0, %v3157_v37 }
 0xa50   :  { %3158 = vrcp.f32 %v668_v38 }
 0xa51   :  { %3160 = vrcp.f32 %v669_v39 }
 0xa5a   :  { %v3159_v40 = vpop.eup %3158 }
 0xa5b   :  { %v3161_v42 = vpop.eup %3160  ;;  %v682_v51 = vmul.f32 %v3159_v40, %v678_v49 }
 0xa5c   :  { %v683_v52 = vmul.f32 %v3161_v42, %v679_v50 }
 0xabe   :  { %v687_v41 = vpop.permute.xlu1 %686 }
 0xabf   :  { %v689_v43 = vpop.permute.xlu0 %688  ;;  %v692_v44 = vmul.f32 %v3159_v40, %v687_v41 }
 0xac0   :  { %v693_v45 = vmul.f32 %v3161_v42, %v689_v43 }
 0xac1   :  { %696 = vrot.lane.b32.xlu1 %v692_v44, %s3388_s1 }
 0xac2   :  { %698 = vrot.lane.b32.xlu0 %v693_v45, %s3388_s1 }
 0xb33   :  { %v697_v53 = vpop.permute.xlu1 %696 }
 0xb34   :  { %v699_v54 = vpop.permute.xlu0 %698  ;;  %v3606_v57 = vadd.f32 %v697_v53, %v682_v51 }
 0xb35   :  { %v3608_v58 = vadd.f32 %v699_v54, %v683_v52 }
 0xb36   :  { %3162 = vtanh.f32 %v3606_v57  ;;  %v805_v44 = vrot.slane %v3606_v57, 7 }
 0xb37   :  { %3164 = vtanh.f32 %v3608_v58  ;;  %v806_v45 = vrot.slane %v3608_v58, 7 }
 0xb40   :  { %v3163_v59 = vpop.eup %3162 }
 0xb41   :  { %v3165_v60 = vpop.eup %3164  ;;  %708 = vrot.lane.b32.xlu1 %v3163_v59, %s3388_s1 }
 0xb42   :  { %710 = vrot.lane.b32.xlu0 %v3165_v60, %s3388_s1 }
 0xbb3   :  { %v709_v61 = vpop.permute.xlu1 %708 }
 0xbb4   :  { %v711_v62 = vpop.permute.xlu0 %710  ;;  %v3614_v63 = vmul.f32 %v3159_v40, %v709_v61 }
 0xbb5   :  { %v3616_v1 = vmul.f32 %v3161_v42, %v711_v62 }
 0xbb6   :  { %v727_v2 = vpack.c.bf16 %v3614_v63, %v3614_v63 }
 0xbb7   :  { %v728_v3 = vpack.c.bf16 %v3616_v1, %v3616_v1 }
 0xbb8   :  { %v731_v6 = vunpack.c.l.b16 %v727_v2 }
 0xbb9   :  { %v732_v7 = vunpack.c.l.b16 %v728_v3 }
 0xbba   :  { %v733_v8 = vrot.slane %v731_v6, 3 }
 0xbbb   :  { %v734_v9 = vrot.slane %v732_v7, 2 }
 0xbbd   :  { %v735_v11 = vsel %vm145_vm2, %v734_v9, %v733_v8 }
 0xbbe   :  { %v736_v13 = vpack.c.b16 %v735_v11, %v735_v11 }
 0xbc0   :  { %737 = vrot.lane.b32.xlu1 %v736_v13, %s3389_s17 }
 0xc32   :  { %v738_v14 = vpop.permute.xlu1 %737 }
 0xc33   :  { %2951 = vmatmul.mubr.msk.bf16.vlgmr.msra.gmra.mrb[12].mxu1 %vm196_vm4, %v738_v14 }
 0xc34   :  { %2963 = vmatpush3.bf16.msra.mxu1 %v3459_v25  ;;  %2966 = vmatprep.mubr.msk.bf16.mxu1 %vm3386_vm0, %v3385_v0 }
 0xc35   :  { %2964 = vmatprep.subr.bf16.mxu1 %v3385_v0 }
 0xc38   :  { %2965 = vmatpush3.bf16.msra.mxu1 %v3468_v29 }
 0xc39   :  { %2978 = vmatprep.subr.bf16.mxu1 %v3385_v0 }
 0xd06   :  { %v776_v15 = vpop.f32.mrb[12].mxu1 }
 0xd07   :  { %v783_v16 = vrot.slane %v776_v15, 4  ;;  %v784_v17 = vrot.slane %v776_v15, 5  ;;  %v2952_v18 = vpop.f32.mrb[13].mxu1 }
 0xd08   :  { %v779_v19 = vpop.f32.mrb[14].mxu1 }
 0xd09   :  { %v787_v21 = vadd.f32 %v783_v16, %v3501_v55  ;;  %v788_v22 = vadd.f32 %v784_v17, %v3503_v56  ;;  %v2953_v23 = vpop.f32.mrb[15].mxu1 }
 0xd0b   :  { %3166 = vtanh.f32 %v787_v21  ;;  %v2789_v28 = vmul.f32 -1.442695, %v787_v21  ;;  %v2790_v30 = vmul.f32 -1.442695, %v788_v22 }
 0xd0c   :  { %3168 = vtanh.f32 %v788_v22 }
 0xd0d   :  { %3170 = vpow2.f32 %v2789_v28 }
 0xd0e   :  { %3172 = vpow2.f32 %v2790_v30 }
 0xd15   :  { %v3167_v26 = vpop.eup %3166 }
 0xd16   :  { %v3169_v27 = vpop.eup %3168  ;;  %813 = vrot.lane.b32.xlu0 %v3167_v26, %s3388_s1 }
 0xd17   :  { %815 = vrot.lane.b32.xlu1 %v3169_v27, %s3388_s1  ;;  %v3171_v31 = vpop.eup %3170 }
 0xd18   :  { %v3173_v32 = vpop.eup %3172  ;;  %v795_v34 = vadd.f32 1.0, %v3171_v31 }
 0xd19   :  { %v796_v37 = vadd.f32 1.0, %v3173_v32 }
 0xd1a   :  { %3174 = vrcp.f32 %v795_v34 }
 0xd1b   :  { %3176 = vrcp.f32 %v796_v37 }
 0xd24   :  { %v3175_v38 = vpop.eup %3174 }
 0xd25   :  { %v3177_v40 = vpop.eup %3176  ;;  %v809_v49 = vmul.f32 %v3175_v38, %v805_v44 }
 0xd26   :  { %v810_v50 = vmul.f32 %v3177_v40, %v806_v45 }
 0xd88   :  { %v814_v39 = vpop.permute.xlu0 %813 }
 0xd89   :  { %v816_v41 = vpop.permute.xlu1 %815  ;;  %v819_v42 = vmul.f32 %v3175_v38, %v814_v39 }
 0xd8a   :  { %v820_v43 = vmul.f32 %v3177_v40, %v816_v41 }
 0xd8b   :  { %823 = vrot.lane.b32.xlu0 %v819_v42, %s3388_s1 }
 0xd8c   :  { %825 = vrot.lane.b32.xlu1 %v820_v43, %s3388_s1 }
 0xdfd   :  { %v824_v51 = vpop.permute.xlu0 %823 }
 0xdfe   :  { %v826_v52 = vpop.permute.xlu1 %825  ;;  %v3639_v53 = vadd.f32 %v824_v51, %v809_v49 }
 0xdff   :  { %v3641_v54 = vadd.f32 %v826_v52, %v810_v50 }
 0xe00   :  { %3178 = vtanh.f32 %v3639_v53  ;;  %v932_v42 = vrot.slane %v3639_v53, 7 }
 0xe01   :  { %3180 = vtanh.f32 %v3641_v54  ;;  %v933_v43 = vrot.slane %v3641_v54, 7 }
 0xe0a   :  { %v3179_v59 = vpop.eup %3178 }
 0xe0b   :  { %v3181_v60 = vpop.eup %3180  ;;  %835 = vrot.lane.b32.xlu0 %v3179_v59, %s3388_s1 }
 0xe0c   :  { %837 = vrot.lane.b32.xlu1 %v3181_v60, %s3388_s1 }
 0xe7d   :  { %v836_v57 = vpop.permute.xlu0 %835 }
 0xe7e   :  { %v838_v58 = vpop.permute.xlu1 %837  ;;  %v3647_v61 = vmul.f32 %v3175_v38, %v836_v57 }
 0xe7f   :  { %v3649_v62 = vmul.f32 %v3177_v40, %v838_v58 }
 0xe80   :  { %v854_v2 = vpack.c.bf16 %v3647_v61, %v3647_v61 }
 0xe81   :  { %v855_v3 = vpack.c.bf16 %v3649_v62, %v3649_v62 }
 0xe82   :  { %v858_v6 = vunpack.c.l.b16 %v854_v2 }
 0xe83   :  { %v859_v7 = vunpack.c.l.b16 %v855_v3 }
 0xe84   :  { %v860_v8 = vrot.slane %v858_v6, 4 }
 0xe85   :  { %v861_v9 = vrot.slane %v859_v7, 3 }
 0xe87   :  { %v862_v11 = vsel %vm145_vm2, %v861_v9, %v860_v8 }
 0xe88   :  { %v863_v13 = vpack.c.b16 %v862_v11, %v862_v11 }
 0xe8a   :  { %864 = vrot.lane.b32.xlu0 %v863_v13, %s3389_s17 }
 0xefc   :  { %v865_v14 = vpop.permute.xlu0 %864 }
 0xefd   :  { %2959 = vmatmul.mubr.msk.bf16.vlgmr.msra.gmra.mrb[16].mxu0 %vm196_vm4, %v865_v14 }
 0xefe   :  { %2971 = vmatpush3.bf16.msra.mxu0 %v3459_v25  ;;  %2974 = vmatprep.mubr.msk.bf16.mxu0 %vm3386_vm0, %v3385_v0 }
 0xeff   :  { %2972 = vmatprep.subr.bf16.mxu0 %v3385_v0 }
 0xf02   :  { %2973 = vmatpush3.bf16.msra.mxu0 %v3468_v29 }
 0xf03   :  { %2986 = vmatprep.subr.bf16.mxu0 %v3385_v0 }
 0xfd0   :  { %v903_v15 = vpop.f32.mrb[16].mxu0 }
 0xfd1   :  { %v910_v16 = vrot.slane %v903_v15, 3  ;;  %v911_v17 = vrot.slane %v903_v15, 4  ;;  %v2960_v18 = vpop.f32.mrb[17].mxu0 }
 0xfd2   :  { %v906_v19 = vpop.f32.mrb[18].mxu0 }
 0xfd3   :  { %v914_v21 = vadd.f32 %v910_v16, %v3501_v55  ;;  %v915_v22 = vadd.f32 %v911_v17, %v3503_v56  ;;  %v2961_v23 = vpop.f32.mrb[19].mxu0 }
 0xfd5   :  { %3182 = vtanh.f32 %v914_v21  ;;  %v2792_v29 = vmul.f32 -1.442695, %v914_v21  ;;  %v2793_v27 = vmul.f32 -1.442695, %v915_v22 }
 0xfd6   :  { %3184 = vtanh.f32 %v915_v22 }
 0xfd7   :  { %3186 = vpow2.f32 %v2792_v29 }
 0xfd8   :  { %3188 = vpow2.f32 %v2793_v27 }
 0xfdf   :  { %v3183_v25 = vpop.eup %3182 }
 0xfe0   :  { %v3185_v26 = vpop.eup %3184  ;;  %940 = vrot.lane.b32.xlu1 %v3183_v25, %s3388_s1 }
 0xfe1   :  { %942 = vrot.lane.b32.xlu0 %v3185_v26, %s3388_s1  ;;  %v3187_v28 = vpop.eup %3186 }
 0xfe2   :  { %v3189_v30 = vpop.eup %3188  ;;  %v922_v31 = vadd.f32 1.0, %v3187_v28 }
 0xfe3   :  { %v923_v32 = vadd.f32 1.0, %v3189_v30 }
 0xfe4   :  { %3190 = vrcp.f32 %v922_v31 }
 0xfe5   :  { %3192 = vrcp.f32 %v923_v32 }
 0xfee   :  { %v3191_v34 = vpop.eup %3190 }
 0xfef   :  { %v3193_v38 = vpop.eup %3192  ;;  %v936_v44 = vmul.f32 %v3191_v34, %v932_v42 }
 0xff0   :  { %v937_v45 = vmul.f32 %v3193_v38, %v933_v43 }
0x1052   :  { %v941_v37 = vpop.permute.xlu1 %940 }
0x1053   :  { %v943_v39 = vpop.permute.xlu0 %942  ;;  %v946_v40 = vmul.f32 %v3191_v34, %v941_v37 }
0x1054   :  { %v947_v41 = vmul.f32 %v3193_v38, %v943_v39 }
0x1055   :  { %950 = vrot.lane.b32.xlu1 %v946_v40, %s3388_s1 }
0x1056   :  { %952 = vrot.lane.b32.xlu0 %v947_v41, %s3388_s1 }
0x10c7   :  { %v951_v49 = vpop.permute.xlu1 %950 }
0x10c8   :  { %v953_v50 = vpop.permute.xlu0 %952  ;;  %v956_v51 = vadd.f32 %v951_v49, %v936_v44 }
0x10c9   :  { %v957_v52 = vadd.f32 %v953_v50, %v937_v45 }
0x10ca   :  { %3194 = vtanh.f32 %v956_v51  ;;  %v1059_v42 = vrot.slane %v956_v51, 7 }
0x10cb   :  { %3196 = vtanh.f32 %v957_v52  ;;  %v1060_v43 = vrot.slane %v957_v52, 7 }
0x10d4   :  { %v3195_v59 = vpop.eup %3194 }
0x10d5   :  { %v3197_v60 = vpop.eup %3196  ;;  %962 = vrot.lane.b32.xlu1 %v3195_v59, %s3388_s1 }
0x10d6   :  { %964 = vrot.lane.b32.xlu0 %v3197_v60, %s3388_s1 }
0x1147   :  { %v963_v57 = vpop.permute.xlu1 %962 }
0x1148   :  { %v965_v58 = vpop.permute.xlu0 %964  ;;  %v3674_v2 = vmul.f32 %v3191_v34, %v963_v57 }
0x1149   :  { %v3676_v53 = vmul.f32 %v3193_v38, %v965_v58 }
0x114a   :  { %v981_v54 = vpack.c.bf16 %v3674_v2, %v3674_v2 }
0x114b   :  { %v982_v3 = vpack.c.bf16 %v3676_v53, %v3676_v53 }
0x114c   :  { %v985_v6 = vunpack.c.l.b16 %v981_v54 }
0x114d   :  { %v986_v7 = vunpack.c.l.b16 %v982_v3 }
0x114e   :  { %v987_v8 = vrot.slane %v985_v6, 5 }
0x114f   :  { %v988_v9 = vrot.slane %v986_v7, 4 }
0x1151   :  { %v989_v11 = vsel %vm145_vm2, %v988_v9, %v987_v8 }
0x1152   :  { %v990_v13 = vpack.c.b16 %v989_v11, %v989_v11 }
0x1154   :  { %991 = vrot.lane.b32.xlu1 %v990_v13, %s3389_s17 }
0x11c6   :  { %v992_v14 = vpop.permute.xlu1 %991 }
0x11c7   :  { %2967 = vmatmul.mubr.msk.bf16.vlgmr.msra.gmra.mrb[16].mxu1 %vm196_vm4, %v992_v14 }
0x11c8   :  { %2982 = vmatprep.mubr.msk.bf16.mxu1 %vm3386_vm0, %v3385_v0 }
0x129a   :  { %v1030_v15 = vpop.f32.mrb[16].mxu1 }
0x129b   :  { %v1037_v16 = vrot.slane %v1030_v15, 2  ;;  %v1038_v17 = vrot.slane %v1030_v15, 3  ;;  %v2968_v18 = vpop.f32.mrb[17].mxu1 }
0x129c   :  { %v1033_v19 = vpop.f32.mrb[18].mxu1 }
0x129d   :  { %v1041_v21 = vadd.f32 %v1037_v16, %v3501_v55  ;;  %v1042_v22 = vadd.f32 %v1038_v17, %v3503_v56  ;;  %v2969_v23 = vpop.f32.mrb[19].mxu1 }
0x129f   :  { %3198 = vtanh.f32 %v1041_v21  ;;  %v2795_v29 = vmul.f32 -1.442695, %v1041_v21  ;;  %v2796_v27 = vmul.f32 -1.442695, %v1042_v22 }
0x12a0   :  { %3200 = vtanh.f32 %v1042_v22 }
0x12a1   :  { %3202 = vpow2.f32 %v2795_v29 }
0x12a2   :  { %3204 = vpow2.f32 %v2796_v27 }
0x12a9   :  { %v3199_v25 = vpop.eup %3198 }
0x12aa   :  { %v3201_v26 = vpop.eup %3200  ;;  %1067 = vrot.lane.b32.xlu0 %v3199_v25, %s3388_s1 }
0x12ab   :  { %1069 = vrot.lane.b32.xlu1 %v3201_v26, %s3388_s1  ;;  %v3203_v28 = vpop.eup %3202 }
0x12ac   :  { %v3205_v30 = vpop.eup %3204  ;;  %v1049_v31 = vadd.f32 1.0, %v3203_v28 }
0x12ad   :  { %v1050_v32 = vadd.f32 1.0, %v3205_v30 }
0x12ae   :  { %3206 = vrcp.f32 %v1049_v31 }
0x12af   :  { %3208 = vrcp.f32 %v1050_v32 }
0x12b8   :  { %v3207_v34 = vpop.eup %3206 }
0x12b9   :  { %v3209_v38 = vpop.eup %3208  ;;  %v1063_v44 = vmul.f32 %v3207_v34, %v1059_v42 }
0x12ba   :  { %v1064_v45 = vmul.f32 %v3209_v38, %v1060_v43 }
0x131c   :  { %v1068_v37 = vpop.permute.xlu0 %1067 }
0x131d   :  { %v1070_v39 = vpop.permute.xlu1 %1069  ;;  %v1073_v40 = vmul.f32 %v3207_v34, %v1068_v37 }
0x131e   :  { %v1074_v41 = vmul.f32 %v3209_v38, %v1070_v39 }
0x131f   :  { %1077 = vrot.lane.b32.xlu0 %v1073_v40, %s3388_s1 }
0x1320   :  { %1079 = vrot.lane.b32.xlu1 %v1074_v41, %s3388_s1 }
0x1391   :  { %v1078_v49 = vpop.permute.xlu0 %1077 }
0x1392   :  { %v1080_v50 = vpop.permute.xlu1 %1079  ;;  %v1083_v59 = vadd.f32 %v1078_v49, %v1063_v44 }
0x1393   :  { %v1084_v60 = vadd.f32 %v1080_v50, %v1064_v45 }
0x1394   :  { %3210 = vtanh.f32 %v1083_v59  ;;  %v1186_v42 = vrot.slane %v1083_v59, 7  ;;  %v78_v59 = vld [vmem:[#allocation6 + $0xb0] sm:$0xff] }
0x1395   :  { %3212 = vtanh.f32 %v1084_v60  ;;  %v1187_v43 = vrot.slane %v1084_v60, 7 }
0x139e   :  { %v3211_v57 = vpop.eup %3210 }
0x139f   :  { %v3213_v58 = vpop.eup %3212  ;;  %1089 = vrot.lane.b32.xlu0 %v3211_v57, %s3388_s1 }
0x13a0   :  { %1091 = vrot.lane.b32.xlu1 %v3213_v58, %s3388_s1 }
0x1411   :  { %v1090_v54 = vpop.permute.xlu0 %1089 }
0x1412   :  { %v1092_v3 = vpop.permute.xlu1 %1091  ;;  %v3695_v6 = vmul.f32 %v3207_v34, %v1090_v54 }
0x1413   :  { %v3697_v51 = vmul.f32 %v3209_v38, %v1092_v3 }
0x1414   :  { %v1108_v52 = vpack.c.bf16 %v3695_v6, %v3695_v6 }
0x1415   :  { %v1109_v7 = vpack.c.bf16 %v3697_v51, %v3697_v51 }
0x1416   :  { %v1112_v8 = vunpack.c.l.b16 %v1108_v52 }
0x1417   :  { %v1113_v9 = vunpack.c.l.b16 %v1109_v7 }
0x1418   :  { %v1114_v11 = vrot.slane %v1112_v8, 6 }
0x1419   :  { %v1115_v13 = vrot.slane %v1113_v9, 5 }
0x141b   :  { %v1116_v14 = vsel %vm145_vm2, %v1115_v13, %v1114_v11 }
0x141c   :  { %v1117_v15 = vpack.c.b16 %v1116_v14, %v1116_v14 }
0x141e   :  { %1118 = vrot.lane.b32.xlu0 %v1117_v15, %s3389_s17 }
0x1490   :  { %v1119_v16 = vpop.permute.xlu0 %1118 }
0x1491   :  { %2975 = vmatmul.mubr.msk.bf16.vlgmr.msra.gmra.mrb[20].mxu0 %vm196_vm4, %v1119_v16 }
0x1492   :  { %2990 = vmatprep.mubr.msk.bf16.mxu0 %vm3386_vm0, %v3385_v0 }
0x1564   :  { %v1157_v17 = vpop.f32.mrb[20].mxu0 }
0x1565   :  { %v1164_v18 = vrot.slane %v1157_v17, 1  ;;  %v1165_v19 = vrot.slane %v1157_v17, 2  ;;  %v2976_v21 = vpop.f32.mrb[21].mxu0 }
0x1566   :  { %v1160_v22 = vpop.f32.mrb[22].mxu0 }
0x1567   :  { %v1168_v23 = vadd.f32 %v1164_v18, %v3501_v55  ;;  %v1169_v25 = vadd.f32 %v1165_v19, %v3503_v56  ;;  %v2977_v26 = vpop.f32.mrb[23].mxu0 }
0x1569   :  { %3214 = vtanh.f32 %v1168_v23  ;;  %v2798_v28 = vmul.f32 -1.442695, %v1168_v23  ;;  %v2799_v30 = vmul.f32 -1.442695, %v1169_v25 }
0x156a   :  { %3216 = vtanh.f32 %v1169_v25 }
0x156b   :  { %3218 = vpow2.f32 %v2798_v28 }
0x156c   :  { %3220 = vpow2.f32 %v2799_v30 }
0x1573   :  { %v3215_v29 = vpop.eup %3214 }
0x1574   :  { %v3217_v27 = vpop.eup %3216  ;;  %1194 = vrot.lane.b32.xlu1 %v3215_v29, %s3388_s1 }
0x1575   :  { %1196 = vrot.lane.b32.xlu0 %v3217_v27, %s3388_s1  ;;  %v3219_v31 = vpop.eup %3218 }
0x1576   :  { %v3221_v32 = vpop.eup %3220  ;;  %v1176_v34 = vadd.f32 1.0, %v3219_v31 }
0x1577   :  { %v1177_v37 = vadd.f32 1.0, %v3221_v32 }
0x1578   :  { %3222 = vrcp.f32 %v1176_v34 }
0x1579   :  { %3224 = vrcp.f32 %v1177_v37 }
0x1582   :  { %v3223_v55 = vpop.eup %3222 }
0x1583   :  { %v3225_v38 = vpop.eup %3224  ;;  %v1190_v44 = vmul.f32 %v3223_v55, %v1186_v42 }
0x1584   :  { %v1191_v45 = vmul.f32 %v3225_v38, %v1187_v43 }
0x15e6   :  { %v1195_v56 = vpop.permute.xlu1 %1194 }
0x15e7   :  { %v1197_v39 = vpop.permute.xlu0 %1196  ;;  %v1200_v40 = vmul.f32 %v3223_v55, %v1195_v56 }
0x15e8   :  { %v1201_v41 = vmul.f32 %v3225_v38, %v1197_v39 }
0x15e9   :  { %1204 = vrot.lane.b32.xlu1 %v1200_v40, %s3388_s1  ;;  %v63_v40 = vld [vmem:[#allocation6 + $0x58] sm:$0xff] }
0x15ea   :  { %1206 = vrot.lane.b32.xlu0 %v1201_v41, %s3388_s1  ;;  %v64_v41 = vld [vmem:[#allocation6 + $0x60] sm:$0xff] }
0x165b   :  { %v1205_v49 = vpop.permute.xlu1 %1204 }
0x165c   :  { %v1207_v50 = vpop.permute.xlu0 %1206  ;;  %v1210_v57 = vadd.f32 %v1205_v49, %v1190_v44  ;;  %v3768_v44 = vpack.c.bf16 %v64_v41, %v63_v40 }
0x165d   :  { %v1211_v58 = vadd.f32 %v1207_v50, %v1191_v45  ;;  %v65_v50 = vld [vmem:[#allocation6 + $0x68] sm:$0xff] }
0x165e   :  { %3226 = vtanh.f32 %v1210_v57  ;;  %v1414_v54 = vrot.slane %v1210_v57, 7  ;;  %v66_v57 = vld [vmem:[#allocation6 + $0x70] sm:$0xff] }
0x165f   :  { %3228 = vtanh.f32 %v1211_v58  ;;  %v1415_v3 = vrot.slane %v1211_v58, 6  ;;  %v3775_v58 = vpack.c.bf16 %v66_v57, %v65_v50 }
0x1661   :  { %v3715_v52 = vsel %vm145_vm2, %v1415_v3, %v1414_v54  ;;  %v1301_v54 = vpack.c.bf16 %v3483_v36, %v3483_v36 }
0x1668   :  { %v3227_v7 = vpop.eup %3226 }
0x1669   :  { %v3229_v8 = vpop.eup %3228  ;;  %1216 = vrot.lane.b32.xlu1 %v3227_v7, %s3388_s1 }
0x166a   :  { %1218 = vrot.lane.b32.xlu0 %v3229_v8, %s3388_s1 }
0x166d   :  { %340 = vrot.lane.b32.xlu1 %v3523_v24, %s3389_s17  ;;  %v70_v24 = vld [vmem:[#allocation6 + $0x80] sm:$0xff] }
0x166e   :  { %342 = vrot.lane.b32.xlu0 %v3519_v20, %s3389_s17  ;;  %v69_v20 = vld [vmem:[#allocation6 + $0x78] sm:$0xff] }
0x1671   :  { %465 = vrot.lane.b32.xlu1 %v3551_v12, %s3389_s17  ;;  %v71_v12 = vld [vmem:[#allocation6 + $0x88] sm:$0xff] }
0x1672   :  { %467 = vrot.lane.b32.xlu0 %v3549_v10, %s3389_s17  ;;  %v3747_v10 = vpack.c.bf16 %v70_v24, %v69_v20 }
0x1674   :  { %2987 = vmatpush3.bf16.msra.mxu0 %v3747_v10 }
0x1675   :  { %591 = vrot.lane.b32.xlu1 %v3581_v4, %s3389_s17  ;;  %2988 = vmatprep.subr.bf16.mxu0 %v3385_v0  ;;  %v72_v4 = vld [vmem:[#allocation6 + $0x90] sm:$0xff] }
0x1676   :  { %593 = vrot.lane.b32.xlu0 %v3583_v5, %s3389_s17  ;;  %v3751_v5 = vpack.c.bf16 %v72_v4, %v71_v12 }
0x1678   :  { %2989 = vmatpush3.bf16.msra.mxu0 %v3751_v5 }
0x1679   :  { %718 = vrot.lane.b32.xlu1 %v3614_v63, %s3389_s17  ;;  %3002 = vmatprep.subr.bf16.mxu0 %v3385_v0 }
0x167a   :  { %720 = vrot.lane.b32.xlu0 %v3616_v1, %s3389_s17  ;;  %v75_v1 = vld [vmem:[#allocation6 + $0x98] sm:$0xff] }
0x167d   :  { %845 = vrot.lane.b32.xlu1 %v3647_v61, %s3389_s17  ;;  %v76_v61 = vld [vmem:[#allocation6 + $0xa0] sm:$0xff] }
0x167e   :  { %847 = vrot.lane.b32.xlu0 %v3649_v62, %s3389_s17 }
0x1681   :  { %972 = vrot.lane.b32.xlu1 %v3674_v2, %s3389_s17 }
0x1682   :  { %974 = vrot.lane.b32.xlu0 %v3676_v53, %s3389_s17  ;;  %v77_v53 = vld [vmem:[#allocation6 + $0xa8] sm:$0xff] }
0x1683   :  { %v3759_v13 = vpack.c.bf16 %v78_v59, %v77_v53 }
0x1685   :  { %1099 = vrot.lane.b32.xlu1 %v3695_v6, %s3389_s17 }
0x1686   :  { %1101 = vrot.lane.b32.xlu0 %v3697_v51, %s3389_s17  ;;  %v3756_v51 = vpack.c.bf16 %v76_v61, %v75_v1  ;;  %v3799_v1 = vld [vmem:[#allocation6 + $0xb8] sm:$0xff] }
0x16db   :  { %v1217_v63 = vpop.permute.xlu1 %1216 }
0x16dc   :  { %v1219_v62 = vpop.permute.xlu0 %1218  ;;  %v1222_v2 = vmul.f32 %v3223_v55, %v1217_v63  ;;  %v3797_v63 = vsub.s32 1, %v3495_v47 }
0x16dd   :  { %v1223_v60 = vmul.f32 %v3225_v38, %v1219_v62 }
0x16de   :  { %v1302_v6 = vpack.c.bf16 %v1222_v2, %v1222_v2  ;;  %1226 = vrot.lane.b32.xlu1 %v1222_v2, %s3389_s17  ;;  %v3803_v61 = vrot.slane %v3799_v1, %v3797_v63 }
0x16df   :  { %v1303_v9 = vpack.c.bf16 %v1223_v60, %v1223_v60  ;;  %1228 = vrot.lane.b32.xlu0 %v1223_v60, %s3389_s17  ;;  %v341_v11 = vpop.permute.xlu1 %340 }
0x16e0   :  { %v1306_v14 = vunpack.c.l.b16 %v1302_v6  ;;  %v343_v15 = vpop.permute.xlu0 %342  ;;  %347 = vst.msk [vmem:[#allocation2] sm:$0x1] %vm346_vm5, %v341_v11 }
0x16e1   :  { %v1307_v16 = vunpack.c.l.b16 %v1303_v9  ;;  %348 = vst.msk [vmem:[#allocation2 + $0x8] sm:$0x1] %vm346_vm5, %v343_v15 }
0x16e2   :  { %v1308_v17 = vrot.slane %v1306_v14, 7  ;;  %1244 = vrot.lane.b32.xlu1 %v3756_v51, %s3389_s17 }
0x16e3   :  { %v1309_v18 = vrot.slane %v1307_v16, 6  ;;  %v466_v19 = vpop.permute.xlu1 %465  ;;  %1246 = vrot.lane.b32.xlu0 %v3759_v13, %s3389_s17 }
0x16e4   :  { %v468_v21 = vpop.permute.xlu0 %467  ;;  %472 = vst.msk [vmem:[#allocation2] sm:$0x2] %vm471_vm6, %v466_v19 }
0x16e5   :  { %473 = vst.msk [vmem:[#allocation2 + $0x8] sm:$0x2] %vm471_vm6, %v468_v21  ;;  %v1310_v22 = vsel %vm145_vm2, %v1309_v18, %v1308_v17  ;;  %vm2349_vm6 = vcmask 9224  }
0x16e6   :  { %v1311_v23 = vpack.c.b16 %v1310_v22, %v1310_v22 }
0x16e7   :  { %v592_v25 = vpop.permute.xlu1 %591 }
0x16e8   :  { %v594_v26 = vpop.permute.xlu0 %593  ;;  %1312 = vrot.lane.b32.xlu1 %v1311_v23, %s3389_s17  ;;  %598 = vst.msk [vmem:[#allocation2] sm:$0x4] %vm597_vm7, %v592_v25  ;;  %v1240_v23 = vsub.s32 2, %v3495_v47 }
0x16e9   :  { %599 = vst.msk [vmem:[#allocation2 + $0x8] sm:$0x4] %vm597_vm7, %v594_v26 }
0x16ea   :  { %v3814_v26 = vrot.slane %v3799_v1, %v1240_v23 }
0x16eb   :  { %v719_v29 = vpop.permute.xlu1 %718 }
0x16ec   :  { %v721_v27 = vpop.permute.xlu0 %720  ;;  %725 = vst.msk [vmem:[#allocation2] sm:$0x8] %vm724_vm8, %v719_v29 }
0x16ed   :  { %726 = vst.msk [vmem:[#allocation2 + $0x8] sm:$0x8] %vm724_vm8, %v721_v27 }
0x16ef   :  { %v846_v28 = vpop.permute.xlu1 %845 }
0x16f0   :  { %v848_v30 = vpop.permute.xlu0 %847  ;;  %852 = vst.msk [vmem:[#allocation2] sm:$0x10] %vm851_vm9, %v846_v28 }
0x16f1   :  { %853 = vst.msk [vmem:[#allocation2 + $0x8] sm:$0x10] %vm851_vm9, %v848_v30  ;;  %v3390_v30 = vmov 1966171168  }
0x16f3   :  { %v973_v31 = vpop.permute.xlu1 %972 }
0x16f4   :  { %v975_v32 = vpop.permute.xlu0 %974  ;;  %979 = vst.msk [vmem:[#allocation2] sm:$0x20] %vm978_vm10, %v973_v31  ;;  %v1484_v31 = vunpack.c.l.s4 %v3390_v30 }
0x16f5   :  { %980 = vst.msk [vmem:[#allocation2 + $0x8] sm:$0x20] %vm978_vm10, %v975_v32 }
0x16f6   :  { %v1485_v32 = vunpack.c.0.s8 %v1484_v31 }
0x16f7   :  { %v1100_v34 = vpop.permute.xlu1 %1099 }
0x16f8   :  { %v1102_v37 = vpop.permute.xlu0 %1101  ;;  %1106 = vst.msk [vmem:[#allocation2] sm:$0x40] %vm1105_vm11, %v1100_v34  ;;  %v3835_v34 = vsub.s32 %v1485_v32, %v3495_v47 }
0x16f9   :  { %1107 = vst.msk [vmem:[#allocation2 + $0x8] sm:$0x40] %vm1105_vm11, %v1102_v37 }
0x1750   :  { %v1227_v55 = vpop.permute.xlu1 %1226 }
0x1751   :  { %v1229_v56 = vpop.permute.xlu0 %1228  ;;  %1233 = vst.msk [vmem:[#allocation2] sm:$0x80] %vm1232_vm12, %v1227_v55 }
0x1752   :  { %1234 = vst.msk [vmem:[#allocation2 + $0x8] sm:$0x80] %vm1232_vm12, %v1229_v56 }
0x1754   :  { %v1245_v38 = vpop.permute.xlu1 %1244 }
0x1755   :  { %2979 = vmatpush3.bf16.msra.mxu1 %v1245_v38  ;;  %v1247_v39 = vpop.permute.xlu0 %1246 }
0x1756   :  { %2980 = vmatprep.subr.bf16.mxu1 %v3385_v0 }
0x1758   :  { %v1235_v42 = vld [vmem:[#allocation2] sm:$0xff] }
0x1759   :  { %2981 = vmatpush3.bf16.msra.mxu1 %v1247_v39  ;;  %v1236_v43 = vld [vmem:[#allocation2 + $0x8] sm:$0xff] }
0x175a   :  { %v1313_v45 = vpop.permute.xlu1 %1312  ;;  %v1237_v49 = vpack.c.bf16 %v1236_v43, %v1235_v42  ;;  %2994 = vmatprep.subr.bf16.mxu1 %v3385_v0 }
0x175b   :  { %2991 = vmatmul.mubr.msk.bf16.vlgmr.msra.gmra.mrb[24].mxu0 %vm196_vm4, %v1313_v45 }
0x175c   :  { %2983 = vmatmul.mubr.msk.bf16.vlgmr.msra.gmra.mrb[20].mxu1 %vm196_vm4, %v1237_v49  ;;  %3003 = vmatpush3.bf16.msra.mxu0 %v3756_v51 }
0x175d   :  { %2995 = vmatpush3.bf16.msra.mxu1 %v3768_v44  ;;  %2998 = vmatprep.mubr.msk.bf16.mxu1 %vm3386_vm0, %v3385_v0 }
0x175e   :  { %2996 = vmatprep.subr.bf16.mxu1 %v3385_v0  ;;  %3004 = vmatprep.subr.bf16.mxu0 %v3385_v0 }
0x175f   :  { %3006 = vmatprep.mubr.msk.bf16.mxu0 %vm3386_vm0, %v3385_v0 }
0x1760   :  { %3005 = vmatpush3.bf16.msra.mxu0 %v3759_v13 }
0x1761   :  { %2997 = vmatpush3.bf16.msra.mxu1 %v3775_v58  ;;  %3018 = vmatprep.subr.bf16.mxu0 %v3385_v0 }
0x1762   :  { %3010 = vmatprep.subr.bf16.mxu1 %v3385_v0 }
0x1764   :  { %2999 = vmatmul.mubr.msk.bf16.vlgmr.msra.gmra.mrb[24].mxu1 %vm196_vm4, %v1301_v54 }
0x1765   :  { %3014 = vmatprep.mubr.msk.bf16.mxu1 %vm3386_vm0, %v3385_v0 }
0x182e   :  { %v1351_v3 = vpop.f32.mrb[24].mxu0 }
0x182f   :  { %v2992_v7 = vpop.f32.mrb[25].mxu0  ;;  %v3792_v8 = vpop.f32.mrb[20].mxu1 }
0x1830   :  { %v1354_v20 = vpop.f32.mrb[26].mxu0  ;;  %v2984_v24 = vpop.f32.mrb[21].mxu1 }
0x1831   :  { %v2993_v12 = vpop.f32.mrb[27].mxu0  ;;  %v3794_v4 = vpop.f32.mrb[22].mxu1 }
0x1832   :  { %v2985_v36 = vpop.f32.mrb[23].mxu1 }
0x1833   :  { %v1521_v36 = vsub.s32 3, %v3495_v47 }
0x1837   :  { %v1394_v62 = vpop.f32.mrb[24].mxu1 }
0x1838   :  { %v1395_v2 = vadd.f32 %v1394_v62, %v1351_v3  ;;  %v3000_v53 = vpop.f32.mrb[25].mxu1  ;;  %v3855_v62 = vrot.slane %v3799_v1, %v1521_v36 }
0x1839   :  { %v1397_v59 = vpop.f32.mrb[26].mxu1 }
0x183a   :  { %v1404_v60 = vadd.f32 %v3803_v61, %v1395_v2  ;;  %v3001_v6 = vpop.f32.mrb[27].mxu1 }
0x183c   :  { %3230 = vtanh.f32 %v1404_v60  ;;  %v2803_v11 = vmul.f32 -1.442695, %v1404_v60 }
0x183e   :  { %3232 = vpow2.f32 %v2803_v11 }
0x1846   :  { %v3231_v9 = vpop.eup %3230 }
0x1847   :  { %1420 = vrot.lane.b32.xlu0 %v3231_v9, %s3388_s1  ;;  %v3862_v9 = vand.u32 127, %v192_v46 }
0x1848   :  { %v3233_v14 = vpop.eup %3232 }
0x1849   :  { %v1408_v15 = vadd.f32 1.0, %v3233_v14  ;;  %v3866_v11 = vsub.s32 %v3862_v9, %v3495_v47 }
0x184b   :  { %3234 = vrcp.f32 %v1408_v15 }
0x1855   :  { %v3235_v16 = vpop.eup %3234 }
0x1856   :  { %v1418_v19 = vmul.f32 %v3235_v16, %v3715_v52 }
0x18b9   :  { %v1421_v17 = vpop.permute.xlu0 %1420 }
0x18ba   :  { %v1423_v18 = vmul.f32 %v3235_v16, %v1421_v17 }
0x18bc   :  { %1425 = vrot.lane.b32.xlu1 %v1423_v18, %s3388_s1 }
0x192e   :  { %v1426_v21 = vpop.permute.xlu1 %1425 }
0x192f   :  { %v3809_v22 = vadd.f32 %v1426_v21, %v1418_v19 }
0x1931   :  { %3236 = vtanh.f32 %v3809_v22 }
0x193b   :  { %v3237_v25 = vpop.eup %3236 }
0x193c   :  { %1431 = vrot.lane.b32.xlu0 %v3237_v25, %s3388_s1 }
0x1940   :  { %1251 = vrot.lane.b32.xlu0 %v3814_v26, %s3389_s17 }
0x19ae   :  { %v1432_v29 = vpop.permute.xlu0 %1431 }
0x19af   :  { %v1434_v27 = vmul.f32 %v3235_v16, %v1432_v29 }
0x19b1   :  { %v1435_v28 = vpack.c.bf16 %v1434_v27, %v1434_v27 }
0x19b2   :  { %v1252_v41 = vpop.permute.xlu0 %1251 }
0x19b3   :  { %1437 = vrot.lane.b32.xlu1 %v1435_v28, %s3389_s17  ;;  %v3841_v45 = vadd.f32 %v3792_v8, %v1252_v41  ;;  %v3848_v54 = vadd.f32 %v3794_v4, %v1252_v41 }
0x1a25   :  { %v1438_v52 = vpop.permute.xlu1 %1437 }
0x1a26   :  { %3007 = vmatmul.mubr.msk.bf16.vlgmr.msra.gmra.mrb[28].mxu0 %vm196_vm4, %v1438_v52 }
0x1a27   :  { %3019 = vmatpush3.bf16.msra.mxu0 %v3747_v10  ;;  %3022 = vmatprep.mubr.msk.bf16.mxu0 %vm3386_vm0, %v3385_v0 }
0x1a28   :  { %3020 = vmatprep.subr.bf16.mxu0 %v3385_v0 }
0x1a2b   :  { %3021 = vmatpush3.bf16.msra.mxu0 %v3751_v5 }
0x1a2c   :  { %3034 = vmatprep.subr.bf16.mxu0 %v3385_v0 }
0x1a2e   :  { %3023 = vmatmul.mubr.msk.bf16.vlgmr.msra.gmra.mrb[32].mxu0 %vm196_vm4, %v1438_v52 }
0x1a2f   :  { %3035 = vmatpush3.bf16.msra.mxu0 %v3756_v51  ;;  %3038 = vmatprep.mubr.msk.bf16.mxu0 %vm3386_vm0, %v3385_v0 }
0x1a30   :  { %3036 = vmatprep.subr.bf16.mxu0 %v3385_v0 }
0x1a33   :  { %3037 = vmatpush3.bf16.msra.mxu0 %v3759_v13 }
0x1a34   :  { %3050 = vmatprep.subr.bf16.mxu0 %v3385_v0 }
0x1af9   :  { %v1476_v37 = vpop.f32.mrb[28].mxu0 }
0x1afa   :  { %v1477_v55 = vadd.f32 %v1476_v37, %v3814_v26  ;;  %v3008_v56 = vpop.f32.mrb[29].mxu0 }
0x1afb   :  { %v1479_v38 = vpop.f32.mrb[30].mxu0 }
0x1afc   :  { %v1489_v39 = vrot.slane %v1477_v55, %v3835_v34  ;;  %v3009_v40 = vpop.f32.mrb[31].mxu0 }
0x1afe   :  { %v1490_v42 = vcombine.high %v1489_v39, %v1489_v39  ;;  %v1497_v43 = vrot.slane %v1489_v39, %v3835_v34 }
0x1b00   :  { %v1504_v49 = vrot.slane %v1490_v42, %v3835_v34  ;;  %v1508_v50 = vrot.slane %v1497_v43, %v3498_v48 }
0x1b01   :  { %v3845_v57 = vpop.f32.mrb[32].mxu0 }
0x1b02   :  { %v1512_v3 = vrot.slane %v1504_v49, %v3498_v48  ;;  %v1515_v7 = vadd.f32 %v1508_v50, %v3841_v45  ;;  %v3024_v20 = vpop.f32.mrb[33].mxu0 }
0x1b03   :  { %v1955_v24 = vpop.f32.mrb[34].mxu0 }
0x1b04   :  { %v1516_v12 = vadd.f32 %v1512_v3, %v3848_v54  ;;  %3238 = vtanh.f32 %v1515_v7  ;;  %v3025_v8 = vpop.f32.mrb[35].mxu0 }
0x1b06   :  { %3240 = vtanh.f32 %v1516_v12 }
0x1b0e   :  { %v3239_v2 = vpop.eup %3238 }
0x1b0f   :  { %v1523_v4 = vmul.f32 %v3239_v2, %v3855_v62 }
0x1b10   :  { %v3241_v53 = vpop.eup %3240 }
0x1b11   :  { %v1525_v59 = vsel %vm196_vm4, %v1523_v4, 0.0  ;;  %v1524_v60 = vmul.f32 %v3241_v53, %v3855_v62 }
0x1b12   :  { %1526 = vadd.xlane.f32.xlu1 %v1525_v59 }
0x1b13   :  { %v1528_v6 = vsel %vm196_vm4, %v1524_v60, 0.0 }
0x1b14   :  { %1529 = vadd.xlane.f32.xlu0 %v1528_v6 }
0x1b9f   :  { %v1527_v1 = vpop.xlane.xlu1 %1526 }
0x1ba0   :  { %v1536_v15 = vrot.slane %v1527_v1, %v3866_v11 }
0x1ba1   :  { %v1530_v14 = vpop.xlane.xlu0 %1529 }
0x1ba2   :  { %v1540_v16 = vrot.slane %v1530_v14, %v3866_v11 }
0x1ba4   :  { %v1541_v17 = vsel %vm145_vm2, %v1540_v16, %v1536_v15 }
0x1ba5   :  { %v1544_v18 = vsel %vm1543_vm13, %v1541_v17, -inf }
0x1ba6   :  { %1545 = vmax.xlane.f32.xlu0 %v1544_v18 }
0x1c33   :  { %v1546_v19 = vpop.xlane.xlu0 %1545 }
0x1c34   :  { %v1551_v46 = vrot.slane %v1546_v19, %v3498_v48  ;;  %v1555_v21 = vrot.slane %v1546_v19, %v3797_v63 }
0x1c36   :  { %v1558_v23 = vsub.f32 %v1527_v1, %v1551_v46  ;;  %v1559_v47 = vsub.f32 %v1530_v14, %v1555_v21 }
0x1c38   :  { %v1560_v25 = vmul.f32 1.442695, %v1558_v23  ;;  %v1562_v29 = vmul.f32 1.442695, %v1559_v47 }
0x1c3a   :  { %3242 = vpow2.f32 %v1560_v25 }
0x1c3b   :  { %3244 = vpow2.f32 %v1562_v29 }
0x1c44   :  { %v3243_v27 = vpop.eup %3242 }
0x1c45   :  { %v3245_v28 = vpop.eup %3244  ;;  %1567 = vperm.xlu1 %3100, %v3243_v27  }
0x1c46   :  { %1570 = vperm.xlu0 %3101, %v3245_v28  }
0x1cc4   :  { %v1568_v52 = vpop.permute.xlu1 %1567 }
0x1cc5   :  { %v1571_v30 = vpop.permute.xlu0 %1570  ;;  %v1575_v31 = vrot.slane %v1568_v52, %v3866_v11 }
0x1cc6   :  { %v1579_v32 = vrot.slane %v1571_v30, %v3866_v11 }
0x1cc8   :  { %v1580_v37 = vsel %vm145_vm2, %v1579_v32, %v1575_v31 }
0x1cc9   :  { %v1582_v55 = vsel %vm1543_vm13, %v1580_v37, 0.0 }
0x1cca   :  { %1583 = vadd.xlane.f32.xlu1 %v1582_v55 }
0x1cdb   :  { %1634 = vrot.lane.b32.xlu1 %v3756_v51, %s3391_s18 }
0x1cdf   :  { %1734 = vrot.lane.b32.xlu1 %v3855_v62, %s3391_s18 }
0x1d57   :  { %v1584_v56 = vpop.xlane.xlu1 %1583 }
0x1d58   :  { %v1589_v38 = vrot.slane %v1584_v56, %v3498_v48  ;;  %v1593_v39 = vrot.slane %v1584_v56, %v3797_v63 }
0x1d5a   :  { %3246 = vrcp.f32 %v1589_v38 }
0x1d5b   :  { %3248 = vrcp.f32 %v1593_v39  ;;  %v3885_v49 = vpop.permute.xlu1 %1634 }
0x1d5c   :  { %3011 = vmatpush3.bf16.msra.mxu1 %v3885_v49 }
0x1d5d   :  { %3012 = vmatprep.subr.bf16.mxu1 %v3385_v0 }
0x1d64   :  { %v3247_v40 = vpop.eup %3246 }
0x1d65   :  { %v1597_v41 = vmul.f32 %v3247_v40, %v3243_v27  ;;  %v3249_v42 = vpop.eup %3248 }
0x1d66   :  { %v1599_v43 = vmul.f32 %v3249_v42, %v3245_v28 }
0x1d67   :  { %1602 = vperm.xlu0 %3101, %v1597_v41  }
0x1d6b   :  { %1607 = vperm.xlu0 %3101, %v1599_v43  }
0x1d6f   :  { %1636 = vrot.lane.b32.xlu0 %v3759_v13, %s3391_s18 }
0x1d73   :  { %1640 = vrot.lane.b32.xlu0 %v3814_v26, %s3391_s18 }
0x1d77   :  { %1721 = vrot.lane.b32.xlu0 %v3841_v45, %s3391_s18 }
0x1d7b   :  { %1723 = vrot.lane.b32.xlu0 %v3848_v54, %s3391_s18 }
0x1de6   :  { %v1603_v50 = vpop.permute.xlu0 %1602 }
0x1de7   :  { %v1610_v3 = vmul.f32 %v1603_v50, %v3841_v45  ;;  %v3920_v50 = vpop.permute.xlu1 %1734 }
0x1de9   :  { %v1612_v7 = vsel %vm196_vm4, %v1610_v3, 0.0 }
0x1dea   :  { %v1613_v20 = vrot.slane %v1612_v7, 4  ;;  %v1608_v24 = vpop.permute.xlu0 %1607 }
0x1deb   :  { %v1611_v12 = vmul.f32 %v1608_v24, %v3848_v54 }
0x1dec   :  { %v1614_v8 = vadd.f32 %v1613_v20, %v1612_v7 }
0x1ded   :  { %v1619_v36 = vsel %vm196_vm4, %v1611_v12, 0.0 }
0x1dee   :  { %v1615_v2 = vrot.slane %v1614_v8, 2  ;;  %v1620_v4 = vrot.slane %v1619_v36, 4  ;;  %v3894_v53 = vpop.permute.xlu0 %1636 }
0x1def   :  { %3013 = vmatpush3.bf16.msra.mxu1 %v3894_v53 }
0x1df0   :  { %v1616_v59 = vadd.f32 %v1615_v2, %v1614_v8  ;;  %v1621_v60 = vadd.f32 %v1620_v4, %v1619_v36  ;;  %3026 = vmatprep.subr.bf16.mxu1 %v3385_v0 }
0x1df2   :  { %v1617_v6 = vrot.slane %v1616_v59, 1  ;;  %v1622_v1 = vrot.slane %v1621_v60, 2  ;;  %v3906_v25 = vpop.permute.xlu0 %1640 }
0x1df4   :  { %v1618_v14 = vadd.f32 %v1617_v6, %v1616_v59  ;;  %v1623_v15 = vadd.f32 %v1622_v1, %v1621_v60 }
0x1df6   :  { %v1624_v16 = vrot.slane %v1623_v15, 1  ;;  %v1626_v17 = vpack.c.bf16 %v1618_v14, %v1618_v14  ;;  %v3910_v32 = vpop.permute.xlu0 %1721 }
0x1df8   :  { %v1625_v18 = vadd.f32 %v1624_v16, %v1623_v15  ;;  %v1630_v46 = vunpack.c.l.b16 %v1626_v17 }
0x1dfa   :  { %v1627_v19 = vpack.c.bf16 %v1625_v18, %v1625_v18  ;;  %v3917_v41 = vpop.permute.xlu0 %1723 }
0x1dfc   :  { %v1631_v21 = vunpack.c.l.b16 %v1627_v19 }
0x1dfe   :  { %v1632_v23 = vsel %vm145_vm2, %v1631_v21, %v1630_v46 }
0x1dff   :  { %v1633_v47 = vpack.c.b16 %v1632_v23, %v1632_v23 }
0x1e01   :  { %3015 = vmatmul.mubr.msk.bf16.vlgmr.msra.gmra.mrb[28].mxu1 %vm196_vm4, %v1633_v47 }
0x1e02   :  { %3027 = vmatpush3.bf16.msra.mxu1 %v3768_v44  ;;  %3030 = vmatprep.mubr.msk.bf16.mxu1 %vm3386_vm0, %v3385_v0 }
0x1e03   :  { %3028 = vmatprep.subr.bf16.mxu1 %v3385_v0 }
0x1e06   :  { %3029 = vmatpush3.bf16.msra.mxu1 %v3775_v58 }
0x1e07   :  { %3042 = vmatprep.subr.bf16.mxu1 %v3385_v0 }
0x1ed4   :  { %v1680_v29 = vpop.f32.mrb[28].mxu1 }
0x1ed5   :  { %v1681_v27 = vadd.f32 %v1680_v29, %v3906_v25  ;;  %v3016_v28 = vpop.f32.mrb[29].mxu1 }
0x1ed6   :  { %v1683_v52 = vpop.f32.mrb[30].mxu1 }
0x1ed7   :  { %v1693_v30 = vrot.slane %v1681_v27, %v3835_v34  ;;  %v3017_v31 = vpop.f32.mrb[31].mxu1 }
0x1ed9   :  { %v1694_v37 = vcombine.high %v1693_v30, %v1693_v30  ;;  %v1701_v55 = vrot.slane %v1693_v30, %v3835_v34 }
0x1edb   :  { %v1708_v56 = vrot.slane %v1694_v37, %v3835_v34  ;;  %v1712_v38 = vrot.slane %v1701_v55, %v3498_v48 }
0x1edd   :  { %v1716_v39 = vrot.slane %v1708_v56, %v3498_v48  ;;  %v1727_v40 = vadd.f32 %v3910_v32, %v1712_v38 }
0x1edf   :  { %3250 = vtanh.f32 %v1727_v40  ;;  %v1728_v42 = vadd.f32 %v3917_v41, %v1716_v39 }
0x1ee1   :  { %3252 = vtanh.f32 %v1728_v42  ;;  %v3939_v42 = vcvt.s32.f32 %v3862_v9 }
0x1ee9   :  { %v3251_v43 = vpop.eup %3250 }
0x1eea   :  { %v1731_v3 = vmul.f32 10.0, %v3251_v43 }
0x1eeb   :  { %v3253_v7 = vpop.eup %3252 }
0x1eec   :  { %v1737_v20 = vmul.f32 %v3920_v50, %v1731_v3  ;;  %v1732_v24 = vmul.f32 10.0, %v3253_v7 }
0x1eee   :  { %v1739_v12 = vsel %vm196_vm4, %v1737_v20, 0.0  ;;  %v1738_v8 = vmul.f32 %v3920_v50, %v1732_v24 }
0x1eef   :  { %1740 = vadd.xlane.f32.xlu0 %v1739_v12 }
0x1ef0   :  { %v1742_v36 = vsel %vm196_vm4, %v1738_v8, 0.0 }
0x1ef1   :  { %1743 = vadd.xlane.f32.xlu1 %v1742_v36 }
0x1f7c   :  { %v1741_v2 = vpop.xlane.xlu0 %1740 }
0x1f7d   :  { %v1750_v59 = vrot.slane %v1741_v2, %v3866_v11 }
0x1f7e   :  { %v1744_v4 = vpop.xlane.xlu1 %1743 }
0x1f7f   :  { %v1754_v60 = vrot.slane %v1744_v4, %v3866_v11 }
0x1f81   :  { %v1755_v6 = vsel %vm145_vm2, %v1754_v60, %v1750_v59 }
0x1f82   :  { %v1757_v1 = vsel %vm1543_vm13, %v1755_v6, -inf }
0x1f83   :  { %1758 = vmax.xlane.f32.xlu0 %v1757_v1 }
0x2010   :  { %v1759_v14 = vpop.xlane.xlu0 %1758 }
0x2011   :  { %v1764_v15 = vrot.slane %v1759_v14, %v3498_v48  ;;  %v1768_v16 = vrot.slane %v1759_v14, %v3797_v63 }
0x2013   :  { %v1771_v17 = vsub.f32 %v1741_v2, %v1764_v15  ;;  %v1772_v18 = vsub.f32 %v1744_v4, %v1768_v16 }
0x2015   :  { %v1773_v19 = vmul.f32 1.442695, %v1771_v17  ;;  %v1775_v46 = vmul.f32 1.442695, %v1772_v18 }
0x2017   :  { %3254 = vpow2.f32 %v1773_v19 }
0x2018   :  { %3256 = vpow2.f32 %v1775_v46 }
0x2021   :  { %v3255_v21 = vpop.eup %3254 }
0x2022   :  { %v3257_v23 = vpop.eup %3256  ;;  %1780 = vperm.xlu0 %3101, %v3255_v21  }
0x2023   :  { %1783 = vperm.xlu1 %3100, %v3257_v23  }
0x20a1   :  { %v1781_v47 = vpop.permute.xlu0 %1780 }
0x20a2   :  { %v1784_v29 = vpop.permute.xlu1 %1783  ;;  %v1788_v27 = vrot.slane %v1781_v47, %v3866_v11 }
0x20a3   :  { %v1792_v28 = vrot.slane %v1784_v29, %v3866_v11 }
0x20a5   :  { %v1793_v52 = vsel %vm145_vm2, %v1792_v28, %v1788_v27 }
0x20a6   :  { %v1795_v30 = vsel %vm1543_vm13, %v1793_v52, 0.0 }
0x20a7   :  { %1796 = vadd.xlane.f32.xlu1 %v1795_v30 }
0x20b8   :  { %1849 = vbcast.lane.b32.xlu1 %v3939_v42, 256 }
0x2134   :  { %v1797_v31 = vpop.xlane.xlu1 %1796 }
0x2135   :  { %3258 = vlog2.f32 %v1797_v31 }
0x2138   :  { %v1850_v4 = vpop.permute.xlu1 %1849 }
0x213f   :  { %v3259_v37 = vpop.eup %3258 }
0x2140   :  { %v1799_v55 = vmul.f32 0.6931472, %v3259_v37 }
0x2142   :  { %v1804_v56 = vrot.slane %v1799_v55, %v3498_v48  ;;  %v1808_v38 = vrot.slane %v1799_v55, %v3797_v63 }
0x2144   :  { %v1811_v39 = vsub.f32 %v1771_v17, %v1804_v56  ;;  %v1812_v40 = vsub.f32 %v1772_v18, %v1808_v38 }
0x2146   :  { %1816 = vperm.xlu0 %3101, %v1811_v39  }
0x214a   :  { %1819 = vperm.xlu0 %3101, %v1812_v40  }
0x21c5   :  { %v1817_v43 = vpop.permute.xlu0 %1816 }
0x21c6   :  { %v1824_v7 = vrot.slane %v1817_v43, %v3866_v11 }
0x21c9   :  { %v1820_v3 = vpop.permute.xlu0 %1819 }
0x21ca   :  { %v1828_v20 = vrot.slane %v1820_v3, %v3866_v11 }
0x21cc   :  { %v3945_v24 = vsel %vm145_vm2, %v1828_v20, %v1824_v7 }
0x21cd   :  { %v1831_v12 = vsel %vm1543_vm13, %v3945_v24, -inf }
0x21ce   :  { %1832 = vmax.xlane.f32.xlu0 %v1831_v12 }
0x225b   :  { %v1833_v8 = vpop.xlane.xlu0 %1832 }
0x225c   :  { %v1838_v36 = vrot.slane %v1833_v8, %v3498_v48  ;;  %v1842_v2 = vrot.slane %v1833_v8, %v3797_v63 }
0x225e   :  { %vm1845_vm14 = vcmp.ge.f32.partialorder %v1811_v39, %v1838_v36  ;;  %vm1846_vm15 = vcmp.ge.f32.partialorder %v1812_v40, %v1842_v2 }
0x225f   :  { %v1852_v59 = vsel %vm1845_vm14, %v1850_v4, 8.0  ;;  %v1853_v60 = vsel %vm1846_vm15, %v1850_v4, 8.0 }
0x2260   :  { %1860 = vperm.xlu1 %3100, %v1853_v60   ;;  %1857 = vperm.xlu0 %3101, %v1852_v59  }
0x22df   :  { %v1861_v6 = vpop.permute.xlu1 %1860  ;;  %v1858_v1 = vpop.permute.xlu0 %1857 }
0x22e0   :  { %v1869_v14 = vrot.slane %v1861_v6, %v3866_v11  ;;  %v1865_v15 = vrot.slane %v1858_v1, %v3866_v11 }
0x22e2   :  { %v1870_v16 = vsel %vm145_vm2, %v1869_v14, %v1865_v15 }
0x22e3   :  { %v1872_v17 = vsel %vm1543_vm13, %v1870_v16, inf }
0x22e4   :  { %1873 = vmin.xlane.f32.xlu1 %v1872_v17 }
0x2371   :  { %v1874_v18 = vpop.xlane.xlu1 %1873 }
0x2372   :  { %v3082_v19 = vtrunc.f32 %v1874_v18 }
0x2374   :  { %v3083_v46 = vcvt.f32.s32 %v3082_v19 }
0x2376   :  { %vm3956_vm3 = vcmp.eq.s32.totalorder %v3862_v9, %v3083_v46  ;;  %1915 = vst.msk [vmem:[#allocation8] sm:$0x3] %vm1914_vm1, %v3083_v46 }
0x2377   :  { %v2806_v23 = vsel %vm3956_vm3, 1.0, %v3385_v0 }
0x2378   :  { %v1882_v47 = vrot.slane %v2806_v23, %v3498_v48  ;;  %v1889_v29 = vrot.slane %v2806_v23, %v3797_v63 }
0x237a   :  { %1884 = vbcast.lane.b32.xlu0 %v1882_v47, 256 }
0x237e   :  { %1891 = vbcast.lane.b32.xlu0 %v1889_v29, 256 }
0x23ec   :  { %v1885_v27 = vpop.permute.xlu0 %1884 }
0x23ed   :  { %v1893_v28 = vmul.f32 %v1885_v27, %v3479_v33 }
0x23ef   :  { %v1895_v52 = vsel %vm196_vm4, %v1893_v28, 0.0 }
0x23f0   :  { %v1896_v30 = vrot.slane %v1895_v52, 4  ;;  %v1892_v31 = vpop.permute.xlu0 %1891 }
0x23f1   :  { %v1894_v37 = vmul.f32 %v1892_v31, %v3481_v35 }
0x23f2   :  { %v1897_v55 = vadd.f32 %v1896_v30, %v1895_v52 }
0x23f3   :  { %v1902_v56 = vsel %vm196_vm4, %v1894_v37, 0.0 }
0x23f4   :  { %v1898_v38 = vrot.slane %v1897_v55, 2  ;;  %v1903_v39 = vrot.slane %v1902_v56, 4 }
0x23f6   :  { %v1899_v40 = vadd.f32 %v1898_v38, %v1897_v55  ;;  %v1904_v43 = vadd.f32 %v1903_v39, %v1902_v56 }
0x23f8   :  { %v1900_v3 = vrot.slane %v1899_v40, 1  ;;  %v1905_v7 = vrot.slane %v1904_v43, 2 }
0x23fa   :  { %v1901_v20 = vadd.f32 %v1900_v3, %v1899_v40  ;;  %v1906_v12 = vadd.f32 %v1905_v7, %v1904_v43 }
0x23fc   :  { %v1907_v8 = vrot.slane %v1906_v12, 1  ;;  %v1916_v36 = vpack.c.bf16 %v1901_v20, %v1901_v20 }
0x23fe   :  { %v1908_v2 = vadd.f32 %v1907_v8, %v1906_v12  ;;  %v1960_v59 = vunpack.c.l.b16 %v1916_v36 }
0x2400   :  { %v1917_v4 = vpack.c.bf16 %v1908_v2, %v1908_v2 }
0x2402   :  { %v1961_v60 = vunpack.c.l.b16 %v1917_v4 }
0x2404   :  { %v1962_v6 = vsel %vm145_vm2, %v1961_v60, %v1960_v59 }
0x2405   :  { %v1963_v1 = vpack.c.b16 %v1962_v6, %v1962_v6 }
0x2407   :  { %3031 = vmatmul.mubr.msk.bf16.vlgmr.msra.gmra.mrb[32].mxu1 %vm196_vm4, %v1963_v1 }
0x2408   :  { %3043 = vmatpush3.bf16.msra.mxu1 %v3885_v49  ;;  %3046 = vmatprep.mubr.msk.bf16.mxu1 %vm3386_vm0, %v3385_v0 }
0x2409   :  { %3044 = vmatprep.subr.bf16.mxu1 %v3385_v0 }
0x240c   :  { %3045 = vmatpush3.bf16.msra.mxu1 %v3894_v53 }
0x240d   :  { %3058 = vmatprep.subr.bf16.mxu1 %v3385_v0 }
0x24da   :  { %v2001_v14 = vpop.f32.mrb[32].mxu1 }
0x24db   :  { %v2002_v15 = vadd.f32 %v2001_v14, %v3845_v57  ;;  %v3032_v16 = vpop.f32.mrb[33].mxu1 }
0x24dc   :  { %v2004_v17 = vpop.f32.mrb[34].mxu1 }
0x24dd   :  { %v2007_v18 = vadd.f32 %v2002_v15, %v3803_v61  ;;  %v3033_v19 = vpop.f32.mrb[35].mxu1 }
0x24df   :  { %3260 = vtanh.f32 %v2007_v18  ;;  %v2809_v23 = vmul.f32 -1.442695, %v2007_v18 }
0x24e1   :  { %3262 = vpow2.f32 %v2809_v23 }
0x24e9   :  { %v3261_v46 = vpop.eup %3260 }
0x24ea   :  { %2017 = vrot.lane.b32.xlu0 %v3261_v46, %s3388_s1 }
0x24eb   :  { %v3263_v47 = vpop.eup %3262 }
0x24ec   :  { %v2011_v29 = vadd.f32 1.0, %v3263_v47 }
0x24ee   :  { %3264 = vrcp.f32 %v2011_v29 }
0x24f8   :  { %v3265_v27 = vpop.eup %3264 }
0x24f9   :  { %v2015_v57 = vmul.f32 %v3265_v27, %v3809_v22 }
0x255c   :  { %v2018_v28 = vpop.permute.xlu0 %2017 }
0x255d   :  { %v2020_v52 = vmul.f32 %v3265_v27, %v2018_v28 }
0x255f   :  { %2022 = vrot.lane.b32.xlu0 %v2020_v52, %s3388_s1 }
0x25d1   :  { %v2023_v30 = vpop.permute.xlu0 %2022 }
0x25d2   :  { %v3983_v31 = vadd.f32 %v2023_v30, %v2015_v57 }
0x25d4   :  { %3266 = vtanh.f32 %v3983_v31 }
0x25de   :  { %v3267_v37 = vpop.eup %3266 }
0x25df   :  { %2028 = vrot.lane.b32.xlu0 %v3267_v37, %s3388_s1 }
0x2651   :  { %v2029_v55 = vpop.permute.xlu0 %2028 }
0x2652   :  { %v2031_v56 = vmul.f32 %v3265_v27, %v2029_v55 }
0x2654   :  { %v2032_v38 = vpack.c.bf16 %v2031_v56, %v2031_v56 }
0x2656   :  { %2034 = vrot.lane.b32.xlu0 %v2032_v38, %s3389_s17 }
0x26c8   :  { %v2035_v39 = vpop.permute.xlu0 %2034 }
0x26c9   :  { %3039 = vmatmul.mubr.msk.bf16.vlgmr.msra.gmra.mrb[36].mxu0 %vm196_vm4, %v2035_v39 }
0x26ca   :  { %3051 = vmatpush3.bf16.msra.mxu0 %v3747_v10  ;;  %3054 = vmatprep.mubr.msk.bf16.mxu0 %vm3386_vm0, %v3385_v0 }
0x26cb   :  { %3052 = vmatprep.subr.bf16.mxu0 %v3385_v0 }
0x26ce   :  { %3053 = vmatpush3.bf16.msra.mxu0 %v3751_v5 }
0x26cf   :  { %3066 = vmatprep.subr.bf16.mxu0 %v3385_v0 }
0x26d1   :  { %3055 = vmatmul.mubr.msk.bf16.vlgmr.msra.gmra.mrb[40].mxu0 %vm196_vm4, %v2035_v39 }
0x26d2   :  { %3067 = vmatpush3.bf16.msra.mxu0 %v3756_v51  ;;  %3070 = vmatprep.mubr.msk.bf16.mxu0 %vm3386_vm0, %v3385_v0 }
0x26d3   :  { %3068 = vmatprep.subr.bf16.mxu0 %v3385_v0 }
0x26d6   :  { %3069 = vmatpush3.bf16.msra.mxu0 %v3759_v13 }
0x279c   :  { %v2073_v10 = vpop.f32.mrb[36].mxu0 }
0x279d   :  { %v2074_v22 = vadd.f32 %v2073_v10, %v3814_v26  ;;  %v3040_v40 = vpop.f32.mrb[37].mxu0 }
0x279e   :  { %v2076_v43 = vpop.f32.mrb[38].mxu0 }
0x279f   :  { %v2086_v5 = vrot.slane %v2074_v22, %v3835_v34  ;;  %v3041_v3 = vpop.f32.mrb[39].mxu0 }
0x27a1   :  { %v2087_v7 = vcombine.high %v2086_v5, %v2086_v5  ;;  %v2094_v20 = vrot.slane %v2086_v5, %v3835_v34 }
0x27a3   :  { %v2101_v51 = vrot.slane %v2087_v7, %v3835_v34  ;;  %v2105_v12 = vrot.slane %v2094_v20, %v3498_v48 }
0x27a4   :  { %v4006_v8 = vpop.f32.mrb[40].mxu0 }
0x27a5   :  { %v2109_v36 = vrot.slane %v2101_v51, %v3498_v48  ;;  %v2112_v13 = vadd.f32 %v2105_v12, %v3841_v45  ;;  %v3056_v2 = vpop.f32.mrb[41].mxu0 }
0x27a6   :  { %v2390_v4 = vpop.f32.mrb[42].mxu0 }
0x27a7   :  { %v2113_v59 = vadd.f32 %v2109_v36, %v3848_v54  ;;  %3268 = vtanh.f32 %v2112_v13  ;;  %v3057_v60 = vpop.f32.mrb[43].mxu0 }
0x27a9   :  { %3270 = vtanh.f32 %v2113_v59 }
0x27b1   :  { %v3269_v6 = vpop.eup %3268 }
0x27b2   :  { %v2116_v1 = vmul.f32 %v3269_v6, %v3855_v62 }
0x27b3   :  { %v3271_v14 = vpop.eup %3270 }
0x27b4   :  { %v2118_v15 = vsel %vm196_vm4, %v2116_v1, 0.0  ;;  %v2117_v16 = vmul.f32 %v3271_v14, %v3855_v62 }
0x27b5   :  { %2119 = vadd.xlane.f32.xlu0 %v2118_v15 }
0x27b6   :  { %v2121_v17 = vsel %vm196_vm4, %v2117_v16, 0.0 }
0x27b7   :  { %2122 = vadd.xlane.f32.xlu1 %v2121_v17 }
0x2842   :  { %v2120_v18 = vpop.xlane.xlu0 %2119 }
0x2843   :  { %v2129_v46 = vrot.slane %v2120_v18, %v3866_v11 }
0x2844   :  { %v2123_v19 = vpop.xlane.xlu1 %2122 }
0x2845   :  { %v2133_v23 = vrot.slane %v2123_v19, %v3866_v11 }
0x2847   :  { %v2134_v47 = vsel %vm145_vm2, %v2133_v23, %v2129_v46 }
0x2848   :  { %v2136_v29 = vsel %vm3956_vm3, -1e+08, %v2134_v47 }
0x2849   :  { %v2137_v27 = vsel %vm1543_vm13, %v2136_v29, -inf }
0x284a   :  { %2138 = vmax.xlane.f32.xlu1 %v2137_v27 }
0x28d7   :  { %v2139_v28 = vpop.xlane.xlu1 %2138 }
0x28d8   :  { %v2140_v52 = vsub.f32 %v2136_v29, %v2139_v28 }
0x28da   :  { %v2141_v57 = vmul.f32 1.442695, %v2140_v52 }
0x28dc   :  { %3272 = vpow2.f32 %v2141_v57 }
0x28e6   :  { %v3273_v30 = vpop.eup %3272 }
0x28e7   :  { %v2143_v37 = vsel %vm1543_vm13, %v3273_v30, 0.0 }
0x28e8   :  { %2144 = vadd.xlane.f32.xlu1 %v2143_v37 }
0x2975   :  { %v2145_v55 = vpop.xlane.xlu1 %2144 }
0x2976   :  { %3274 = vrcp.f32 %v2145_v55 }
0x2980   :  { %v3275_v56 = vpop.eup %3274 }
0x2981   :  { %v2147_v38 = vmul.f32 %v3275_v56, %v3273_v30 }
0x2983   :  { %v2158_v39 = vrot.slane %v2147_v38, %v3797_v63  ;;  %v2151_v10 = vrot.slane %v2147_v38, %v3498_v48 }
0x2985   :  { %2160 = vbcast.lane.b32.xlu0 %v2158_v39, 256  ;;  %2153 = vbcast.lane.b32.xlu1 %v2151_v10, 256 }
0x29f7   :  { %v2161_v22 = vpop.permute.xlu0 %2160  ;;  %v2154_v40 = vpop.permute.xlu1 %2153 }
0x29f8   :  { %v2163_v43 = vmul.f32 %v2161_v22, %v3848_v54  ;;  %v2162_v5 = vmul.f32 %v2154_v40, %v3841_v45 }
0x29fa   :  { %v2171_v3 = vsel %vm196_vm4, %v2163_v43, 0.0  ;;  %v2164_v7 = vsel %vm196_vm4, %v2162_v5, 0.0 }
0x29fb   :  { %v2172_v20 = vrot.slane %v2171_v3, 4  ;;  %v2165_v51 = vrot.slane %v2164_v7, 4 }
0x29fd   :  { %v2173_v12 = vadd.f32 %v2172_v20, %v2171_v3  ;;  %v2166_v36 = vadd.f32 %v2165_v51, %v2164_v7 }
0x29ff   :  { %v2174_v13 = vrot.slane %v2173_v12, 2  ;;  %v2167_v2 = vrot.slane %v2166_v36, 2 }
0x2a01   :  { %v2175_v4 = vadd.f32 %v2174_v13, %v2173_v12  ;;  %v2168_v59 = vadd.f32 %v2167_v2, %v2166_v36 }
0x2a03   :  { %v2176_v60 = vrot.slane %v2175_v4, 1  ;;  %v2169_v6 = vrot.slane %v2168_v59, 1 }
0x2a05   :  { %v2177_v1 = vadd.f32 %v2176_v60, %v2175_v4  ;;  %v2170_v14 = vadd.f32 %v2169_v6, %v2168_v59 }
0x2a07   :  { %v2179_v15 = vpack.c.bf16 %v2177_v1, %v2177_v1  ;;  %v2178_v16 = vpack.c.bf16 %v2170_v14, %v2170_v14 }
0x2a09   :  { %v2183_v17 = vunpack.c.l.b16 %v2179_v15  ;;  %v2182_v18 = vunpack.c.l.b16 %v2178_v16 }
0x2a0b   :  { %v2184_v19 = vsel %vm145_vm2, %v2183_v17, %v2182_v18 }
0x2a0c   :  { %v2185_v46 = vpack.c.b16 %v2184_v19, %v2184_v19 }
0x2a0e   :  { %3047 = vmatmul.mubr.msk.bf16.vlgmr.msra.gmra.mrb[36].mxu1 %vm196_vm4, %v2185_v46 }
0x2a0f   :  { %3059 = vmatpush3.bf16.msra.mxu1 %v3768_v44  ;;  %3062 = vmatprep.mubr.msk.bf16.mxu1 %vm3386_vm0, %v3385_v0 }
0x2a10   :  { %3060 = vmatprep.subr.bf16.mxu1 %v3385_v0 }
0x2a13   :  { %3061 = vmatpush3.bf16.msra.mxu1 %v3775_v58 }
0x2a14   :  { %3074 = vmatprep.subr.bf16.mxu1 %v3385_v0 }
0x2ae1   :  { %v2223_v23 = vpop.f32.mrb[36].mxu1 }
0x2ae2   :  { %v2224_v47 = vadd.f32 %v2223_v23, %v3906_v25  ;;  %v3048_v29 = vpop.f32.mrb[37].mxu1 }
0x2ae3   :  { %v2226_v27 = vpop.f32.mrb[38].mxu1 }
0x2ae4   :  { %v2236_v28 = vrot.slane %v2224_v47, %v3835_v34  ;;  %v3049_v52 = vpop.f32.mrb[39].mxu1 }
0x2ae6   :  { %v2237_v57 = vcombine.high %v2236_v28, %v2236_v28  ;;  %v2244_v44 = vrot.slane %v2236_v28, %v3835_v34 }
0x2ae8   :  { %v2251_v30 = vrot.slane %v2237_v57, %v3835_v34  ;;  %v2255_v37 = vrot.slane %v2244_v44, %v3498_v48 }
0x2aea   :  { %v2259_v55 = vrot.slane %v2251_v30, %v3498_v48  ;;  %v2262_v58 = vadd.f32 %v2255_v37, %v3910_v32 }
0x2aec   :  { %3276 = vtanh.f32 %v2262_v58  ;;  %v2263_v56 = vadd.f32 %v2259_v55, %v3917_v41 }
0x2aee   :  { %3278 = vtanh.f32 %v2263_v56 }
0x2af6   :  { %v3277_v38 = vpop.eup %3276 }
0x2af7   :  { %v2266_v39 = vmul.f32 10.0, %v3277_v38 }
0x2af8   :  { %v3279_v10 = vpop.eup %3278 }
0x2af9   :  { %v2268_v22 = vmul.f32 %v2266_v39, %v3920_v50  ;;  %v2267_v40 = vmul.f32 10.0, %v3279_v10 }
0x2afb   :  { %v2270_v43 = vsel %vm196_vm4, %v2268_v22, 0.0  ;;  %v2269_v5 = vmul.f32 %v2267_v40, %v3920_v50 }
0x2afc   :  { %2271 = vadd.xlane.f32.xlu1 %v2270_v43 }
0x2afd   :  { %v2273_v3 = vsel %vm196_vm4, %v2269_v5, 0.0 }
0x2afe   :  { %2274 = vadd.xlane.f32.xlu0 %v2273_v3 }
0x2b89   :  { %v2272_v7 = vpop.xlane.xlu1 %2271 }
0x2b8a   :  { %v2281_v51 = vrot.slane %v2272_v7, %v3866_v11 }
0x2b8b   :  { %v2275_v20 = vpop.xlane.xlu0 %2274 }
0x2b8c   :  { %v2285_v12 = vrot.slane %v2275_v20, %v3866_v11 }
0x2b8e   :  { %v2286_v36 = vsel %vm145_vm2, %v2285_v12, %v2281_v51 }
0x2b8f   :  { %v2288_v13 = vsel %vm3956_vm3, -1e+08, %v2286_v36 }
0x2b90   :  { %v2289_v2 = vsel %vm1543_vm13, %v2288_v13, -inf }
0x2b91   :  { %2290 = vmax.xlane.f32.xlu1 %v2289_v2 }
0x2c1e   :  { %v2291_v4 = vpop.xlane.xlu1 %2290 }
0x2c1f   :  { %v2292_v59 = vsub.f32 %v2288_v13, %v2291_v4 }
0x2c21   :  { %v2293_v60 = vmul.f32 1.442695, %v2292_v59 }
0x2c23   :  { %3280 = vpow2.f32 %v2293_v60 }
0x2c2d   :  { %v3281_v6 = vpop.eup %3280 }
0x2c2e   :  { %v2295_v1 = vsel %vm1543_vm13, %v3281_v6, 0.0 }
0x2c2f   :  { %2296 = vadd.xlane.f32.xlu1 %v2295_v1 }
0x2cbc   :  { %v2297_v14 = vpop.xlane.xlu1 %2296 }
0x2cbd   :  { %3282 = vlog2.f32 %v2297_v14 }
0x2cc7   :  { %v3283_v15 = vpop.eup %3282 }
0x2cc8   :  { %v2299_v16 = vmul.f32 0.6931472, %v3283_v15 }
0x2cca   :  { %v4055_v17 = vsub.f32 %v2292_v59, %v2299_v16 }
0x2ccc   :  { %v2301_v18 = vsel %vm1543_vm13, %v4055_v17, -inf }
0x2ccd   :  { %2302 = vmax.xlane.f32.xlu1 %v2301_v18 }
0x2d5a   :  { %v2303_v19 = vpop.xlane.xlu1 %2302 }
0x2d5b   :  { %vm2304_vm5 = vcmp.ge.f32.partialorder %v4055_v17, %v2303_v19 }
0x2d5c   :  { %v2305_v46 = vsel %vm2304_vm5, %v3939_v42, 8.0 }
0x2d5d   :  { %v2306_v23 = vsel %vm1543_vm13, %v2305_v46, inf }
0x2d5e   :  { %2307 = vmin.xlane.f32.xlu0 %v2306_v23 }
0x2deb   :  { %v2308_v47 = vpop.xlane.xlu0 %2307 }
0x2dec   :  { %v3084_v29 = vtrunc.f32 %v2308_v47 }
0x2dee   :  { %v4062_v27 = vcvt.f32.s32 %v3084_v29 }
0x2df0   :  { %vm2310_vm7 = vcmp.eq.s32.totalorder %v3862_v9, %v4062_v27  ;;  %2350 = vst.msk [vmem:[#allocation8] sm:$0x3] %vm2349_vm6, %v4062_v27 }
0x2df1   :  { %v2812_v28 = vsel %vm2310_vm7, 1.0, %v3385_v0 }
0x2df2   :  { %v2323_v52 = vrot.slane %v2812_v28, %v3797_v63  ;;  %v2316_v57 = vrot.slane %v2812_v28, %v3498_v48 }
0x2df4   :  { %2325 = vbcast.lane.b32.xlu0 %v2323_v52, 256  ;;  %2318 = vbcast.lane.b32.xlu1 %v2316_v57, 256 }
0x2e66   :  { %v2326_v44 = vpop.permute.xlu0 %2325  ;;  %v2319_v30 = vpop.permute.xlu1 %2318 }
0x2e67   :  { %v2328_v37 = vmul.f32 %v2326_v44, %v3481_v35  ;;  %v2327_v55 = vmul.f32 %v2319_v30, %v3479_v33 }
0x2e69   :  { %v2336_v58 = vsel %vm196_vm4, %v2328_v37, 0.0  ;;  %v2329_v56 = vsel %vm196_vm4, %v2327_v55, 0.0 }
0x2e6a   :  { %v2337_v38 = vrot.slane %v2336_v58, 4  ;;  %v2330_v39 = vrot.slane %v2329_v56, 4 }
0x2e6c   :  { %v2338_v10 = vadd.f32 %v2337_v38, %v2336_v58  ;;  %v2331_v22 = vadd.f32 %v2330_v39, %v2329_v56 }
0x2e6e   :  { %v2339_v40 = vrot.slane %v2338_v10, 2  ;;  %v2332_v43 = vrot.slane %v2331_v22, 2 }
0x2e70   :  { %v2340_v5 = vadd.f32 %v2339_v40, %v2338_v10  ;;  %v2333_v3 = vadd.f32 %v2332_v43, %v2331_v22 }
0x2e72   :  { %v2341_v7 = vrot.slane %v2340_v5, 1  ;;  %v2334_v20 = vrot.slane %v2333_v3, 1 }
0x2e74   :  { %v2342_v51 = vadd.f32 %v2341_v7, %v2340_v5  ;;  %v2335_v12 = vadd.f32 %v2334_v20, %v2333_v3 }
0x2e76   :  { %v2352_v36 = vpack.c.bf16 %v2342_v51, %v2342_v51  ;;  %v2351_v35 = vpack.c.bf16 %v2335_v12, %v2335_v12 }
0x2e78   :  { %v2396_v13 = vunpack.c.l.b16 %v2352_v36  ;;  %v2395_v33 = vunpack.c.l.b16 %v2351_v35 }
0x2e7a   :  { %v2397_v2 = vsel %vm145_vm2, %v2396_v13, %v2395_v33  ;;  %v1909_v33 = vsel %vm3956_vm3, %v3945_v24, 0.0 }
0x2e7b   :  { %v2398_v4 = vpack.c.b16 %v2397_v2, %v2397_v2 }
0x2e7d   :  { %3063 = vmatmul.mubr.msk.bf16.vlgmr.msra.gmra.mrb[40].mxu1 %vm196_vm4, %v2398_v4 }
0x2e7e   :  { %3075 = vmatpush3.bf16.msra.mxu1 %v3885_v49  ;;  %3078 = vmatprep.mubr.msk.bf16.mxu1 %vm3386_vm0, %v3385_v0  ;;  %vm4111_vm0 = vmor %vm3956_vm3, %vm2310_vm7 }
0x2e7f   :  { %3076 = vmatprep.subr.bf16.mxu1 %v3385_v0 }
0x2e82   :  { %3077 = vmatpush3.bf16.msra.mxu1 %v3894_v53 }
0x2f50   :  { %v2436_v59 = vpop.f32.mrb[40].mxu1 }
0x2f51   :  { %v2437_v60 = vadd.f32 %v2436_v59, %v4006_v8  ;;  %v3064_v6 = vpop.f32.mrb[41].mxu1 }
0x2f52   :  { %v2439_v1 = vpop.f32.mrb[42].mxu1 }
0x2f53   :  { %v2442_v14 = vadd.f32 %v2437_v60, %v3803_v61  ;;  %v3065_v15 = vpop.f32.mrb[43].mxu1 }
0x2f55   :  { %3284 = vtanh.f32 %v2442_v14  ;;  %v2815_v49 = vmul.f32 -1.442695, %v2442_v14 }
0x2f57   :  { %3286 = vpow2.f32 %v2815_v49 }
0x2f5f   :  { %v3285_v16 = vpop.eup %3284 }
0x2f60   :  { %2452 = vrot.lane.b32.xlu1 %v3285_v16, %s3388_s1 }
0x2f61   :  { %v3287_v18 = vpop.eup %3286 }
0x2f62   :  { %v2446_v19 = vadd.f32 1.0, %v3287_v18 }
0x2f64   :  { %3288 = vrcp.f32 %v2446_v19 }
0x2f6e   :  { %v3289_v0 = vpop.eup %3288 }
0x2f6f   :  { %v2450_v8 = vmul.f32 %v3289_v0, %v3983_v31 }
0x2fd2   :  { %v2453_v46 = vpop.permute.xlu1 %2452 }
0x2fd3   :  { %v2455_v53 = vmul.f32 %v3289_v0, %v2453_v46 }
0x2fd5   :  { %2457 = vrot.lane.b32.xlu1 %v2455_v53, %s3388_s1 }
0x3047   :  { %v2458_v23 = vpop.permute.xlu1 %2457 }
0x3048   :  { %v2460_v47 = vadd.f32 %v2458_v23, %v2450_v8 }
0x304a   :  { %3290 = vtanh.f32 %v2460_v47 }
0x3054   :  { %v3291_v61 = vpop.eup %3290 }
0x3055   :  { %2463 = vrot.lane.b32.xlu1 %v3291_v61, %s3388_s1 }
0x30c7   :  { %v2464_v29 = vpop.permute.xlu1 %2463 }
0x30c8   :  { %v2466_v28 = vmul.f32 %v3289_v0, %v2464_v29 }
0x30ca   :  { %v2467_v52 = vpack.c.bf16 %v2466_v28, %v2466_v28 }
0x30cc   :  { %2469 = vrot.lane.b32.xlu0 %v2467_v52, %s3389_s17 }
0x313e   :  { %v2470_v57 = vpop.permute.xlu0 %2469 }
0x313f   :  { %3071 = vmatmul.mubr.msk.bf16.vlgmr.msra.gmra.mrb[44].mxu0 %vm196_vm4, %v2470_v57 }
0x3212   :  { %v2508_v44 = vpop.f32.mrb[44].mxu0 }
0x3213   :  { %v2509_v30 = vadd.f32 %v2508_v44, %v3814_v26  ;;  %v3072_v37 = vpop.f32.mrb[45].mxu0 }
0x3214   :  { %v2511_v55 = vpop.f32.mrb[46].mxu0 }
0x3215   :  { %v2521_v31 = vrot.slane %v2509_v30, %v3835_v34  ;;  %v3073_v58 = vpop.f32.mrb[47].mxu0 }
0x3217   :  { %v2522_v56 = vcombine.high %v2521_v31, %v2521_v31  ;;  %v2529_v38 = vrot.slane %v2521_v31, %v3835_v34 }
0x3219   :  { %v2536_v39 = vrot.slane %v2522_v56, %v3835_v34  ;;  %v2540_v10 = vrot.slane %v2529_v38, %v3498_v48 }
0x321b   :  { %v2544_v22 = vrot.slane %v2536_v39, %v3498_v48  ;;  %v2547_v40 = vadd.f32 %v2540_v10, %v3841_v45 }
0x321d   :  { %v2548_v43 = vadd.f32 %v2544_v22, %v3848_v54  ;;  %3292 = vtanh.f32 %v2547_v40 }
0x321f   :  { %3294 = vtanh.f32 %v2548_v43 }
0x3227   :  { %v3293_v26 = vpop.eup %3292 }
0x3228   :  { %v2551_v5 = vmul.f32 %v3293_v26, %v3855_v62 }
0x3229   :  { %v3295_v3 = vpop.eup %3294 }
0x322a   :  { %v2553_v7 = vsel %vm196_vm4, %v2551_v5, 0.0  ;;  %v2552_v20 = vmul.f32 %v3295_v3, %v3855_v62 }
0x322b   :  { %2554 = vadd.xlane.f32.xlu1 %v2553_v7 }
0x322c   :  { %v2556_v51 = vsel %vm196_vm4, %v2552_v20, 0.0 }
0x322d   :  { %2557 = vadd.xlane.f32.xlu0 %v2556_v51 }
0x32b8   :  { %v2555_v12 = vpop.xlane.xlu1 %2554 }
0x32b9   :  { %v2564_v35 = vrot.slane %v2555_v12, %v3866_v11 }
0x32ba   :  { %v2558_v36 = vpop.xlane.xlu0 %2557 }
0x32bb   :  { %v2568_v13 = vrot.slane %v2558_v36, %v3866_v11 }
0x32bd   :  { %v2569_v62 = vsel %vm145_vm2, %v2568_v13, %v2564_v35 }
0x32be   :  { %v2571_v2 = vsel %vm4111_vm0, -1e+08, %v2569_v62 }
0x32bf   :  { %v2572_v4 = vsel %vm1543_vm13, %v2571_v2, -inf }
0x32c0   :  { %2573 = vmax.xlane.f32.xlu0 %v2572_v4 }
0x334d   :  { %v2574_v59 = vpop.xlane.xlu0 %2573 }
0x334e   :  { %v2575_v60 = vsub.f32 %v2571_v2, %v2574_v59 }
0x3350   :  { %v2576_v6 = vmul.f32 1.442695, %v2575_v60 }
0x3352   :  { %3296 = vpow2.f32 %v2576_v6 }
0x335c   :  { %v3297_v1 = vpop.eup %3296 }
0x335d   :  { %v2578_v14 = vsel %vm1543_vm13, %v3297_v1, 0.0 }
0x335e   :  { %2579 = vadd.xlane.f32.xlu0 %v2578_v14 }
0x33eb   :  { %v2580_v15 = vpop.xlane.xlu0 %2579 }
0x33ec   :  { %3298 = vrcp.f32 %v2580_v15 }
0x33f6   :  { %v3299_v16 = vpop.eup %3298 }
0x33f7   :  { %v2582_v49 = vmul.f32 %v3299_v16, %v3297_v1 }
0x33f9   :  { %v2593_v18 = vrot.slane %v2582_v49, %v3797_v63  ;;  %v2586_v19 = vrot.slane %v2582_v49, %v3498_v48 }
0x33fb   :  { %2595 = vbcast.lane.b32.xlu0 %v2593_v18, 256  ;;  %2588 = vbcast.lane.b32.xlu1 %v2586_v19, 256 }
0x346d   :  { %v2596_v0 = vpop.permute.xlu0 %2595  ;;  %v2589_v46 = vpop.permute.xlu1 %2588 }
0x346e   :  { %v2598_v53 = vmul.f32 %v2596_v0, %v3848_v54  ;;  %v2597_v8 = vmul.f32 %v2589_v46, %v3841_v45 }
0x3470   :  { %v2606_v23 = vsel %vm196_vm4, %v2598_v53, 0.0  ;;  %v2599_v47 = vsel %vm196_vm4, %v2597_v8, 0.0 }
0x3471   :  { %v2607_v61 = vrot.slane %v2606_v23, 4  ;;  %v2600_v29 = vrot.slane %v2599_v47, 4 }
0x3473   :  { %v2608_v28 = vadd.f32 %v2607_v61, %v2606_v23  ;;  %v2601_v52 = vadd.f32 %v2600_v29, %v2599_v47  ;;  %v1910_v47 = vsel %vm1543_vm13, %v1909_v33, 0.0 }
0x3475   :  { %v2609_v57 = vrot.slane %v2608_v28, 2  ;;  %v2602_v63 = vrot.slane %v2601_v52, 2 }
0x3477   :  { %v2610_v44 = vadd.f32 %v2609_v57, %v2608_v28  ;;  %v2603_v30 = vadd.f32 %v2602_v63, %v2601_v52  ;;  %v2343_v52 = vsel %vm2310_vm7, %v4055_v17, 0.0 }
0x3478   :  { %v2344_v57 = vsel %vm1543_vm13, %v2343_v52, 0.0 }
0x3479   :  { %v2611_v37 = vrot.slane %v2610_v44, 1  ;;  %v2604_v55 = vrot.slane %v2603_v30, 1 }
0x347b   :  { %v2612_v31 = vadd.f32 %v2611_v37, %v2610_v44  ;;  %v2605_v58 = vadd.f32 %v2604_v55, %v2603_v30 }
0x347d   :  { %v2614_v56 = vpack.c.bf16 %v2612_v31, %v2612_v31  ;;  %v2613_v54 = vpack.c.bf16 %v2605_v58, %v2605_v58 }
0x347f   :  { %v2618_v38 = vunpack.c.l.b16 %v2614_v56  ;;  %v2617_v45 = vunpack.c.l.b16 %v2613_v54 }
0x3481   :  { %v2619_v39 = vsel %vm145_vm2, %v2618_v38, %v2617_v45 }
0x3482   :  { %v2620_v10 = vpack.c.b16 %v2619_v39, %v2619_v39 }
0x3484   :  { %3079 = vmatmul.mubr.msk.bf16.vlgmr.msra.gmra.mrb[44].mxu1 %vm196_vm4, %v2620_v10 }
0x3557   :  { %v2658_v22 = vpop.f32.mrb[44].mxu1 }
0x3558   :  { %v2659_v40 = vadd.f32 %v2658_v22, %v3906_v25  ;;  %v3080_v43 = vpop.f32.mrb[45].mxu1 }
0x3559   :  { %v2661_v26 = vpop.f32.mrb[46].mxu1 }
0x355a   :  { %v2671_v5 = vrot.slane %v2659_v40, %v3835_v34  ;;  %v3081_v3 = vpop.f32.mrb[47].mxu1 }
0x355c   :  { %v2672_v7 = vcombine.high %v2671_v5, %v2671_v5  ;;  %v2679_v20 = vrot.slane %v2671_v5, %v3835_v34 }
0x355e   :  { %v2686_v51 = vrot.slane %v2672_v7, %v3835_v34  ;;  %v2690_v12 = vrot.slane %v2679_v20, %v3498_v48 }
0x3560   :  { %v2694_v36 = vrot.slane %v2686_v51, %v3498_v48  ;;  %v2697_v35 = vadd.f32 %v2690_v12, %v3910_v32 }
0x3562   :  { %3300 = vtanh.f32 %v2697_v35  ;;  %v2698_v13 = vadd.f32 %v2694_v36, %v3917_v41 }
0x3564   :  { %3302 = vtanh.f32 %v2698_v13 }
0x356c   :  { %v3301_v25 = vpop.eup %3300 }
0x356d   :  { %v2701_v62 = vmul.f32 10.0, %v3301_v25 }
0x356e   :  { %v3303_v2 = vpop.eup %3302 }
0x356f   :  { %v2703_v4 = vmul.f32 %v2701_v62, %v3920_v50  ;;  %v2702_v59 = vmul.f32 10.0, %v3303_v2 }
0x3571   :  { %v2705_v60 = vsel %vm196_vm4, %v2703_v4, 0.0  ;;  %v2704_v34 = vmul.f32 %v2702_v59, %v3920_v50 }
0x3572   :  { %2706 = vadd.xlane.f32.xlu1 %v2705_v60 }
0x3573   :  { %v2708_v6 = vsel %vm196_vm4, %v2704_v34, 0.0  ;;  %vm2751_vm4 = vcmask 17424  }
0x3574   :  { %2709 = vadd.xlane.f32.xlu0 %v2708_v6 }
0x35ff   :  { %v2707_v48 = vpop.xlane.xlu1 %2706 }
0x3600   :  { %v2716_v1 = vrot.slane %v2707_v48, %v3866_v11 }
0x3601   :  { %v2710_v32 = vpop.xlane.xlu0 %2709 }
0x3602   :  { %v2720_v41 = vrot.slane %v2710_v32, %v3866_v11 }
0x3604   :  { %v2721_v14 = vsel %vm145_vm2, %v2720_v41, %v2716_v1 }
0x3605   :  { %v2723_v15 = vsel %vm4111_vm0, -1e+08, %v2721_v14 }
0x3606   :  { %v2724_v16 = vsel %vm1543_vm13, %v2723_v15, -inf }
0x3607   :  { %2725 = vmax.xlane.f32.xlu1 %v2724_v16 }
0x3694   :  { %v2726_v49 = vpop.xlane.xlu1 %2725 }
0x3695   :  { %v2727_v50 = vsub.f32 %v2723_v15, %v2726_v49 }
0x3697   :  { %v2728_v18 = vmul.f32 1.442695, %v2727_v50 }
0x3699   :  { %3304 = vpow2.f32 %v2728_v18 }
0x36a3   :  { %v3305_v19 = vpop.eup %3304 }
0x36a4   :  { %v2730_v0 = vsel %vm1543_vm13, %v3305_v19, 0.0 }
0x36a5   :  { %2731 = vadd.xlane.f32.xlu0 %v2730_v0 }
0x3732   :  { %v2732_v46 = vpop.xlane.xlu0 %2731 }
0x3733   :  { %3306 = vlog2.f32 %v2732_v46 }
0x373d   :  { %v3307_v53 = vpop.eup %3306 }
0x373e   :  { %v2734_v11 = vmul.f32 0.6931472, %v3307_v53 }
0x3740   :  { %v2735_v8 = vsub.f32 %v2727_v50, %v2734_v11 }
0x3742   :  { %v2736_v23 = vsel %vm1543_vm13, %v2735_v8, -inf }
0x3743   :  { %2737 = vmax.xlane.f32.xlu1 %v2736_v23 }
0x3747   :  { %1911 = vadd.xlane.f32.xlu1 %v1910_v47 }
0x37d0   :  { %v2738_v61 = vpop.xlane.xlu1 %2737 }
0x37d1   :  { %vm2739_vm2 = vcmp.ge.f32.partialorder %v2735_v8, %v2738_v61 }
0x37d2   :  { %v2740_v29 = vsel %vm2739_vm2, %v3939_v42, 8.0 }
0x37d3   :  { %v2741_v28 = vsel %vm1543_vm13, %v2740_v29, inf }
0x37d4   :  { %2742 = vmin.xlane.f32.xlu0 %v2741_v28 }
0x37d8   :  { %2345 = vadd.xlane.f32.xlu0 %v2344_v57 }
0x3861   :  { %v2743_v21 = vpop.xlane.xlu0 %2742 }
0x3862   :  { %v3086_v24 = vtrunc.f32 %v2743_v21 }
0x3864   :  { %v3087_v63 = vcvt.f32.s32 %v3086_v24 }
0x3866   :  { %vm2745_vm8 = vcmp.eq.s32.totalorder %v3862_v9, %v3087_v63  ;;  %2752 = vst.msk [vmem:[#allocation8] sm:$0x3] %vm2751_vm4, %v3087_v63 }
0x3867   :  { %v2746_v44 = vsel %vm2745_vm8, %v2735_v8, 0.0 }
0x3868   :  { %v2747_v42 = vsel %vm1543_vm13, %v2746_v44, 0.0 }
0x3869   :  { %2748 = vadd.xlane.f32.xlu1 %v2747_v42 }
0x386a   :  { %3364 = shalt.err (!%p3361_p6)
}
0x386b   :  { %s3365_s24 = scalar_lea.hbm %s4180_s3, 32 }
0x386c   :  { %p3366_p7 = scmp.ne.s32.totalorder %s4180_s3, %s3365_s24  ;;  %p3369_p8 = scmp.lt.u32.totalorder %s3365_s24, %s4180_s3 }
0x386e   :  { %p3371_p9 = pnand %p3369_p8, %p3366_p7 }
0x3870   :  { %3374 = shalt.err (!%p3371_p9)
}
0x3871   :  { %2763 = dma.vmem_to_hbm [thread:$0]  %s2761_s20, 32, %s4180_s3, [#allocation5]   ;;  %v1912_v9 = vpop.xlane.xlu1 %1911  ;;  %v2346_v17 = vpop.xlane.xlu0 %2345 }
0x3872   :  { %v2347_v27 = vadd.f32 %v2346_v17, %v1912_v9 }
0x38f6   :  { %v2749_v30 = vpop.xlane.xlu1 %2748 }
0x38f7   :  { %v2750_v37 = vadd.f32 %v2749_v30, %v2347_v27 }
0x38f9   :  { %2753 = vst.msk [vmem:[%s4181_s4] sm:$0x3] %vm1914_vm1, %v2750_v37 }
0x38fa   :  { %3379 = dma.done.wait [#allocation5], 32  }
0x38fb   :  { %3380 = vsyncadd [#allocation5], 4294967264 }
0x38fc   :  { %2771 = vsyncpa [#allocation4], 1 }
0x38fd   :  { %2772 = vsyncpa [#allocation7], 1 }
0x38fe   :  { %2773 = vsyncpa [#allocation5], 1 }

</bundles_post_ra>
